<compile_context>
chip_gen: v7x
topology: tpu7x:2x2x1
jax: 0.10.0
libtpu: 0.0.40
codegen_flags: <defaults>
</compile_context>

<pallas_src>
import functools

import jax
import jax.numpy as jnp
import numpy as np
from jax import lax
from jax.experimental import pallas as pl
from jax.experimental.pallas import tpu as pltpu

C_PAD = 128          # every channel dim is zero-padded to a full 128-lane vreg
COUT_FINAL = 66      # true number of output channels of conv4


def _net_kernel(x_ref, w1_ref, b1_ref, w2_ref, b2_ref, w3_ref, b3_ref,
                w4_ref, b4_ref, o_ref, act1_ref, act2_ref, act3_ref,
                *, dims, cout_valid):
    """Fused 4x [conv3x3(valid) -> maxpool2 -> relu] -> log_softmax, one sample."""
    (_, OW1, PH1, PW1), (_, OW2, PH2, PW2), (_, OW3, PH3, PW3), (_, OW4, PH4, PW4) = dims
    f32 = jnp.float32

    def run_layer(conv_row, OW, PH, PW, b_ref, write_row):
        # Even/odd column-selection matrices: implement the W direction of the
        # 2x2 max-pool as two small matmuls (no strided sublane slicing).
        jj = lax.broadcasted_iota(jnp.int32, (PW, OW), 0)
        ss = lax.broadcasted_iota(jnp.int32, (PW, OW), 1)
        sel_e = (ss == 2 * jj).astype(f32)
        sel_o = (ss == 2 * jj + 1).astype(f32)
        bias = b_ref[...]                                        # (1, 128) f32

        def body(i, carry):
            r0 = conv_row(2 * i)                                 # (OW, 128) f32
            r1 = conv_row(2 * i + 1)
            t = jnp.maximum(r0, r1)                              # pool along H
            p = jnp.maximum(
                jnp.dot(sel_e, t, preferred_element_type=f32),
                jnp.dot(sel_o, t, preferred_element_type=f32))   # pool along W
            y = jnp.maximum(p + bias, 0.0)                       # hoisted bias + ReLU
            write_row(i, y)                                      # (PW, 128) f32
            return carry

        lax.fori_loop(0, PH, body, 0)

    # ---- layer 1: Cin = 1 -> pure VPU outer-product FMAs (no K=9 GEMM) ----
    def conv_row_l1(r):
        acc = jnp.zeros((OW1, C_PAD), f32)
        for dh in range(3):
            for dw in range(3):
                xs = x_ref[0, r + dh, pl.ds(dw, OW1), :]         # (OW1, 1) f32
                wt = w1_ref[3 * dh + dw]                         # (1, 128) f32
                acc = acc + xs * wt
        return acc

    # ---- layers 2..4: bf16 MXU dots, f32 accumulation ----
    def mxu_conv_row(in_ref, w_ref, OW):
        def conv_row(r):
            acc = jnp.zeros((OW, C_PAD), f32)
            for dh in range(3):
                for dw in range(3):
                    a = in_ref[r + dh, pl.ds(dw, OW), :].astype(jnp.bfloat16)
                    acc = acc + jnp.dot(a, w_ref[3 * dh + dw],
                                        preferred_element_type=f32)
            return acc
        return conv_row

    def write_to(ref):
        def write(i, y):
            ref[i, :, :] = y
        return write

    def write_final(i, y):
        # log_softmax over the channel (lane) axis in f32, masking the padding.
        lane = lax.broadcasted_iota(jnp.int32, y.shape, 1)
        ym = jnp.where(lane < cout_valid, y, -1e30)
        m = jnp.max(ym, axis=-1, keepdims=True)
        lse = m + jnp.log(jnp.sum(jnp.exp(ym - m), axis=-1, keepdims=True))
        o_ref[0, i, :, :] = y - lse

    run_layer(conv_row_l1, OW1, PH1, PW1, b1_ref, write_to(act1_ref))
    run_layer(mxu_conv_row(act1_ref, w2_ref, OW2), OW2, PH2, PW2, b2_ref,
              write_to(act2_ref))
    run_layer(mxu_conv_row(act2_ref, w3_ref, OW3), OW3, PH3, PW3, b3_ref,
              write_to(act3_ref))
    run_layer(mxu_conv_row(act3_ref, w4_ref, OW4), OW4, PH4, PW4, b4_ref,
              write_final)


def _layer_dims(h, w):
    dims = []
    for _ in range(4):
        oh, ow = h - 2, w - 2          # valid 3x3 conv
        ph, pw = oh // 2, ow // 2      # floor-mode 2x2 pool
        dims.append((oh, ow, ph, pw))
        h, w = ph, pw
    return tuple(dims)


def fused_net(x_nhwc, params):
    """x_nhwc: (N, H, W, 1) f32 -> (N, H', W', 128) f32 (channel-padded)."""
    w1, b1, w2, b2, w3, b3, w4, b4 = params
    N, H, W, _ = x_nhwc.shape
    dims = _layer_dims(H, W)
    (_, _, PH1, PW1), (_, _, PH2, PW2), (_, _, PH3, PW3), (_, _, PH4, PW4) = dims

    # Rough cost hint for XLA's scheduler.
    flops = 0
    true_c = [(1, 120), (120, 100), (100, 85), (85, 66)]
    for (oh, ow, _, _), (ci, co) in zip(dims, true_c):
        flops += 2 * 9 * oh * ow * ci * co
    flops *= N
    bytes_accessed = int(x_nhwc.size * 4
                         + sum(int(p.size) * p.dtype.itemsize for p in params)
                         + N * PH4 * PW4 * C_PAD * 4)
    cost = pl.CostEstimate(flops=int(flops),
                           transcendentals=int(2 * N * PH4 * PW4 * C_PAD),
                           bytes_accessed=bytes_accessed)

    kernel = functools.partial(_net_kernel, dims=dims, cout_valid=COUT_FINAL)

    return pl.pallas_call(
        kernel,
        out_shape=jax.ShapeDtypeStruct((N, PH4, PW4, C_PAD), jnp.float32),
        grid_spec=pltpu.PrefetchScalarGridSpec(
            num_scalar_prefetch=0,
            grid=(N,),
            in_specs=[
                pl.BlockSpec((1, H, W, 1), lambda n: (n, 0, 0, 0)),       # x
                pl.BlockSpec((9, 1, C_PAD), lambda n: (0, 0, 0)),         # w1 (f32)
                pl.BlockSpec((1, C_PAD), lambda n: (0, 0)),               # b1
                pl.BlockSpec((9, C_PAD, C_PAD), lambda n: (0, 0, 0)),     # w2 (bf16)
                pl.BlockSpec((1, C_PAD), lambda n: (0, 0)),               # b2
                pl.BlockSpec((9, C_PAD, C_PAD), lambda n: (0, 0, 0)),     # w3 (bf16)
                pl.BlockSpec((1, C_PAD), lambda n: (0, 0)),               # b3
                pl.BlockSpec((9, C_PAD, C_PAD), lambda n: (0, 0, 0)),     # w4 (bf16)
                pl.BlockSpec((1, C_PAD), lambda n: (0, 0)),               # b4
            ],
            out_specs=pl.BlockSpec((1, PH4, PW4, C_PAD), lambda n: (n, 0, 0, 0)),
            scratch_shapes=[
                pltpu.VMEM((PH1, PW1, C_PAD), jnp.float32),   # act1 (~248 KiB max)
                pltpu.VMEM((PH2, PW2, C_PAD), jnp.float32),   # act2
                pltpu.VMEM((PH3, PW3, C_PAD), jnp.float32),   # act3
            ],
        ),
        compiler_params=pltpu.CompilerParams(
            dimension_semantics=("parallel",),
            vmem_limit_bytes=32 * 1024 * 1024,
        ),
        cost_estimate=cost,
    )(x_nhwc, w1, b1, w2, b2, w3, b3, w4, b4)


def init_params(key):
    # Conv2d shapes from Net.__init__: 1->120, 120->100, 100->85, 85->66, k=3.
    # Weights stored as (9, Cin_pad, Cout_pad) with tap index t = 3*dh + dw;
    # padded channels are zero so they stay inert through the network.
    specs = [(1, 120), (120, 100), (100, 85), (85, 66)]
    params = []
    for li, (cin, cout) in enumerate(specs):
        key, kw, kb = jax.random.split(key, 3)
        w = jax.random.normal(kw, (9, cin, cout), jnp.float32) / np.sqrt(9 * cin)
        b = jax.random.normal(kb, (cout,), jnp.float32) * 0.01
        cin_p = cin if li == 0 else C_PAD          # layer 1 keeps its true Cin=1
        wp = jnp.zeros((9, cin_p, C_PAD), jnp.float32).at[:, :cin, :cout].set(w)
        bp = jnp.zeros((1, C_PAD), jnp.float32).at[0, :cout].set(b)
        if li > 0:
            wp = wp.astype(jnp.bfloat16)           # bf16 MXU operands, f32 accum
        params.extend([wp, bp])
    return tuple(params)


@jax.jit
def net_forward(x_nchw, params):
    x = jnp.transpose(x_nchw, (0, 2, 3, 1))        # NCHW -> NHWC (C == 1)
    out = fused_net(x, params)                     # (N, H', W', 128)
    out = out[..., :COUT_FINAL]
    return jnp.transpose(out, (0, 3, 1, 2))        # back to NCHW, like PyTorch


def reference_forward(x_nchw, params):
    """Pure-JAX/XLA reference (same bf16-rounded weights, f32 math)."""
    w1, b1, w2, b2, w3, b3, w4, b4 = params
    x = jnp.transpose(x_nchw, (0, 2, 3, 1)).astype(jnp.float32)
    for w9, b in ((w1, b1), (w2, b2), (w3, b3), (w4, b4)):
        k = w9.astype(jnp.float32).reshape(3, 3, w9.shape[1], w9.shape[2])
        y = lax.conv_general_dilated(
            x, k, (1, 1), "VALID",
            dimension_numbers=("NHWC", "HWIO", "NHWC"),
            precision=lax.Precision.HIGHEST)
        y = y + b.reshape(1, 1, 1, -1)
        y = lax.reduce_window(y, -jnp.inf, lax.max,
                              (1, 2, 2, 1), (1, 2, 2, 1), "VALID")
        x = jnp.maximum(y, 0.0)
    out = jax.nn.log_softmax(x[..., :COUT_FINAL], axis=-1)
    return jnp.transpose(out, (0, 3, 1, 2))


if __name__ == "__main__":
    key = jax.random.PRNGKey(0)
    kx, kp = jax.random.split(key)
    # N=2, C=1, H=W=46  ->  44/22 -> 20/10 -> 8/4 -> 2/1 spatial; output (2, 66, 1, 1)
    x = jax.random.normal(kx, (2, 1, 46, 46), jnp.float32)
    params = init_params(kp)

    out = jax.block_until_ready(net_forward(x, params))
    assert out.shape == (2, 66, 1, 1), out.shape

    # log_softmax sanity: exp(output) sums to 1 over the channel dim.
    probs = np.exp(np.asarray(out, np.float64)).sum(axis=1)
    assert np.allclose(probs, 1.0, atol=1e-4), probs

    # Numerical check against the pure-JAX reference (bf16 weight path allowed).
    ref = jax.block_until_ready(reference_forward(x, params))
    err = float(jnp.max(jnp.abs(out - ref)))
    assert err < 0.2, f"max |kernel - reference| = {err}"

    print("KERNEL_OK")
</pallas_src>

<mosaic_0001>
module attributes {stable_mosaic.version = 11 : i64} {
  func.func @_net_kernel(%arg0: i32, %arg1: memref<1x46x46x1xf32, #tpu.memory_space<vmem>>, %arg2: memref<9x1x128xf32, #tpu.memory_space<vmem>>, %arg3: memref<1x128xf32, #tpu.memory_space<vmem>>, %arg4: memref<9x128x128xbf16, #tpu.memory_space<vmem>>, %arg5: memref<1x128xf32, #tpu.memory_space<vmem>>, %arg6: memref<9x128x128xbf16, #tpu.memory_space<vmem>>, %arg7: memref<1x128xf32, #tpu.memory_space<vmem>>, %arg8: memref<9x128x128xbf16, #tpu.memory_space<vmem>>, %arg9: memref<1x128xf32, #tpu.memory_space<vmem>>, %arg10: memref<1x1x1x128xf32, #tpu.memory_space<vmem>>, %arg11: memref<22x22x128xf32, #tpu.memory_space<vmem>>, %arg12: memref<10x10x128xf32, #tpu.memory_space<vmem>>, %arg13: memref<4x4x128xf32, #tpu.memory_space<vmem>>) attributes {dimension_semantics = [#tpu.dimension_semantics<parallel>], iteration_bounds = array<i64: 2>, scalar_prefetch = 0 : i64, scratch_operands = 3 : i64, tpu.core_type = #tpu.core_type<tc>, window_params = [{transform_indices = @transform_0, window_bounds = array<i64: 1, 46, 46, 1>}, {pipeline_mode = #tpu.pipeline_mode<synchronous>, transform_indices = @transform_1, window_bounds = array<i64: 9, 1, 128>}, {pipeline_mode = #tpu.pipeline_mode<synchronous>, transform_indices = @transform_2, window_bounds = array<i64: 1, 128>}, {pipeline_mode = #tpu.pipeline_mode<synchronous>, transform_indices = @transform_3, window_bounds = array<i64: 9, 128, 128>}, {pipeline_mode = #tpu.pipeline_mode<synchronous>, transform_indices = @transform_4, window_bounds = array<i64: 1, 128>}, {pipeline_mode = #tpu.pipeline_mode<synchronous>, transform_indices = @transform_5, window_bounds = array<i64: 9, 128, 128>}, {pipeline_mode = #tpu.pipeline_mode<synchronous>, transform_indices = @transform_6, window_bounds = array<i64: 1, 128>}, {pipeline_mode = #tpu.pipeline_mode<synchronous>, transform_indices = @transform_7, window_bounds = array<i64: 9, 128, 128>}, {pipeline_mode = #tpu.pipeline_mode<synchronous>, transform_indices = @transform_8, window_bounds = array<i64: 1, 128>}, {transform_indices = @transform_9, window_bounds = array<i64: 1, 1, 1, 128>}]} {
    %0 = tpu.iota {dimensions = array<i32: 0>} : vector<22x44xi32>
    %1 = tpu.iota {dimensions = array<i32: 1>} : vector<22x44xi32>
    %c2_i32 = arith.constant 2 : i32
    %2 = vector.broadcast %c2_i32 : i32 to vector<22x44xi32>
    %3 = arith.muli %2, %0 : vector<22x44xi32>
    %4 = arith.cmpi eq, %1, %3 : vector<22x44xi32>
    %5 = arith.extui %4 : vector<22x44xi1> to vector<22x44xi32>
    %6 = arith.sitofp %5 : vector<22x44xi32> to vector<22x44xf32>
    %c2_i32_0 = arith.constant 2 : i32
    %7 = vector.broadcast %c2_i32_0 : i32 to vector<22x44xi32>
    %8 = arith.muli %7, %0 : vector<22x44xi32>
    %c1_i32 = arith.constant 1 : i32
    %9 = vector.broadcast %c1_i32 : i32 to vector<22x44xi32>
    %10 = arith.addi %8, %9 : vector<22x44xi32>
    %11 = arith.cmpi eq, %1, %10 : vector<22x44xi32>
    %12 = arith.extui %11 : vector<22x44xi1> to vector<22x44xi32>
    %13 = arith.sitofp %12 : vector<22x44xi32> to vector<22x44xf32>
    %c0 = arith.constant 0 : index
    %c0_1 = arith.constant 0 : index
    %14 = vector.load %arg3[%c0, %c0_1] : memref<1x128xf32, #tpu.memory_space<vmem>>, vector<1x128xf32>
    %c0_i32 = arith.constant 0 : i32
    %c22_i32 = arith.constant 22 : i32
    %15 = arith.addi %c0_i32, %c22_i32 : i32
    %c1_i32_2 = arith.constant 1 : i32
    scf.for %arg14 = %c0_i32 to %15 step %c1_i32_2  : i32 {
      %c2_i32_158 = arith.constant 2 : i32
      %257 = arith.muli %c2_i32_158, %arg14 : i32
      %cst_159 = arith.constant 0.000000e+00 : f32
      %258 = vector.broadcast %cst_159 : f32 to vector<44x128xf32>
      %c0_i32_160 = arith.constant 0 : i32
      %259 = arith.addi %257, %c0_i32_160 : i32
      %c0_161 = arith.constant 0 : index
      %260 = arith.index_cast %259 : i32 to index
      %c0_162 = arith.constant 0 : index
      %c0_163 = arith.constant 0 : index
      %261 = vector.load %arg1[%c0_161, %260, %c0_162, %c0_163] : memref<1x46x46x1xf32, #tpu.memory_space<vmem>>, vector<1x1x44x1xf32>
      %262 = vector.shape_cast %261 : vector<1x1x44x1xf32> to vector<44x1xf32>
      %c0_164 = arith.constant 0 : index
      %c0_165 = arith.constant 0 : index
      %c0_166 = arith.constant 0 : index
      %263 = vector.load %arg2[%c0_164, %c0_165, %c0_166] : memref<9x1x128xf32, #tpu.memory_space<vmem>>, vector<1x1x128xf32>
      %264 = vector.shape_cast %263 : vector<1x1x128xf32> to vector<1x128xf32>
      %265 = vector.broadcast %262 : vector<44x1xf32> to vector<44x128xf32>
      %266 = vector.broadcast %264 : vector<1x128xf32> to vector<44x128xf32>
      %267 = arith.mulf %265, %266 : vector<44x128xf32>
      %268 = arith.addf %258, %267 : vector<44x128xf32>
      %c0_i32_167 = arith.constant 0 : i32
      %269 = arith.addi %257, %c0_i32_167 : i32
      %c0_168 = arith.constant 0 : index
      %270 = arith.index_cast %269 : i32 to index
      %c1_169 = arith.constant 1 : index
      %c0_170 = arith.constant 0 : index
      %271 = vector.load %arg1[%c0_168, %270, %c1_169, %c0_170] : memref<1x46x46x1xf32, #tpu.memory_space<vmem>>, vector<1x1x44x1xf32>
      %272 = vector.shape_cast %271 : vector<1x1x44x1xf32> to vector<44x1xf32>
      %c1_171 = arith.constant 1 : index
      %c0_172 = arith.constant 0 : index
      %c0_173 = arith.constant 0 : index
      %273 = vector.load %arg2[%c1_171, %c0_172, %c0_173] : memref<9x1x128xf32, #tpu.memory_space<vmem>>, vector<1x1x128xf32>
      %274 = vector.shape_cast %273 : vector<1x1x128xf32> to vector<1x128xf32>
      %275 = vector.broadcast %272 : vector<44x1xf32> to vector<44x128xf32>
      %276 = vector.broadcast %274 : vector<1x128xf32> to vector<44x128xf32>
      %277 = arith.mulf %275, %276 : vector<44x128xf32>
      %278 = arith.addf %268, %277 : vector<44x128xf32>
      %c0_i32_174 = arith.constant 0 : i32
      %279 = arith.addi %257, %c0_i32_174 : i32
      %c0_175 = arith.constant 0 : index
      %280 = arith.index_cast %279 : i32 to index
      %c2_176 = arith.constant 2 : index
      %c0_177 = arith.constant 0 : index
      %281 = vector.load %arg1[%c0_175, %280, %c2_176, %c0_177] : memref<1x46x46x1xf32, #tpu.memory_space<vmem>>, vector<1x1x44x1xf32>
      %282 = vector.shape_cast %281 : vector<1x1x44x1xf32> to vector<44x1xf32>
      %c2_178 = arith.constant 2 : index
      %c0_179 = arith.constant 0 : index
      %c0_180 = arith.constant 0 : index
      %283 = vector.load %arg2[%c2_178, %c0_179, %c0_180] : memref<9x1x128xf32, #tpu.memory_space<vmem>>, vector<1x1x128xf32>
      %284 = vector.shape_cast %283 : vector<1x1x128xf32> to vector<1x128xf32>
      %285 = vector.broadcast %282 : vector<44x1xf32> to vector<44x128xf32>
      %286 = vector.broadcast %284 : vector<1x128xf32> to vector<44x128xf32>
      %287 = arith.mulf %285, %286 : vector<44x128xf32>
      %288 = arith.addf %278, %287 : vector<44x128xf32>
      %c1_i32_181 = arith.constant 1 : i32
      %289 = arith.addi %257, %c1_i32_181 : i32
      %c0_182 = arith.constant 0 : index
      %290 = arith.index_cast %289 : i32 to index
      %c0_183 = arith.constant 0 : index
      %c0_184 = arith.constant 0 : index
      %291 = vector.load %arg1[%c0_182, %290, %c0_183, %c0_184] : memref<1x46x46x1xf32, #tpu.memory_space<vmem>>, vector<1x1x44x1xf32>
      %292 = vector.shape_cast %291 : vector<1x1x44x1xf32> to vector<44x1xf32>
      %c3_185 = arith.constant 3 : index
      %c0_186 = arith.constant 0 : index
      %c0_187 = arith.constant 0 : index
      %293 = vector.load %arg2[%c3_185, %c0_186, %c0_187] : memref<9x1x128xf32, #tpu.memory_space<vmem>>, vector<1x1x128xf32>
      %294 = vector.shape_cast %293 : vector<1x1x128xf32> to vector<1x128xf32>
      %295 = vector.broadcast %292 : vector<44x1xf32> to vector<44x128xf32>
      %296 = vector.broadcast %294 : vector<1x128xf32> to vector<44x128xf32>
      %297 = arith.mulf %295, %296 : vector<44x128xf32>
      %298 = arith.addf %288, %297 : vector<44x128xf32>
      %c1_i32_188 = arith.constant 1 : i32
      %299 = arith.addi %257, %c1_i32_188 : i32
      %c0_189 = arith.constant 0 : index
      %300 = arith.index_cast %299 : i32 to index
      %c1_190 = arith.constant 1 : index
      %c0_191 = arith.constant 0 : index
      %301 = vector.load %arg1[%c0_189, %300, %c1_190, %c0_191] : memref<1x46x46x1xf32, #tpu.memory_space<vmem>>, vector<1x1x44x1xf32>
      %302 = vector.shape_cast %301 : vector<1x1x44x1xf32> to vector<44x1xf32>
      %c4_192 = arith.constant 4 : index
      %c0_193 = arith.constant 0 : index
      %c0_194 = arith.constant 0 : index
      %303 = vector.load %arg2[%c4_192, %c0_193, %c0_194] : memref<9x1x128xf32, #tpu.memory_space<vmem>>, vector<1x1x128xf32>
      %304 = vector.shape_cast %303 : vector<1x1x128xf32> to vector<1x128xf32>
      %305 = vector.broadcast %302 : vector<44x1xf32> to vector<44x128xf32>
      %306 = vector.broadcast %304 : vector<1x128xf32> to vector<44x128xf32>
      %307 = arith.mulf %305, %306 : vector<44x128xf32>
      %308 = arith.addf %298, %307 : vector<44x128xf32>
      %c1_i32_195 = arith.constant 1 : i32
      %309 = arith.addi %257, %c1_i32_195 : i32
      %c0_196 = arith.constant 0 : index
      %310 = arith.index_cast %309 : i32 to index
      %c2_197 = arith.constant 2 : index
      %c0_198 = arith.constant 0 : index
      %311 = vector.load %arg1[%c0_196, %310, %c2_197, %c0_198] : memref<1x46x46x1xf32, #tpu.memory_space<vmem>>, vector<1x1x44x1xf32>
      %312 = vector.shape_cast %311 : vector<1x1x44x1xf32> to vector<44x1xf32>
      %c5_199 = arith.constant 5 : index
      %c0_200 = arith.constant 0 : index
      %c0_201 = arith.constant 0 : index
      %313 = vector.load %arg2[%c5_199, %c0_200, %c0_201] : memref<9x1x128xf32, #tpu.memory_space<vmem>>, vector<1x1x128xf32>
      %314 = vector.shape_cast %313 : vector<1x1x128xf32> to vector<1x128xf32>
      %315 = vector.broadcast %312 : vector<44x1xf32> to vector<44x128xf32>
      %316 = vector.broadcast %314 : vector<1x128xf32> to vector<44x128xf32>
      %317 = arith.mulf %315, %316 : vector<44x128xf32>
      %318 = arith.addf %308, %317 : vector<44x128xf32>
      %c2_i32_202 = arith.constant 2 : i32
      %319 = arith.addi %257, %c2_i32_202 : i32
      %c0_203 = arith.constant 0 : index
      %320 = arith.index_cast %319 : i32 to index
      %c0_204 = arith.constant 0 : index
      %c0_205 = arith.constant 0 : index
      %321 = vector.load %arg1[%c0_203, %320, %c0_204, %c0_205] : memref<1x46x46x1xf32, #tpu.memory_space<vmem>>, vector<1x1x44x1xf32>
      %322 = vector.shape_cast %321 : vector<1x1x44x1xf32> to vector<44x1xf32>
      %c6_206 = arith.constant 6 : index
      %c0_207 = arith.constant 0 : index
      %c0_208 = arith.constant 0 : index
      %323 = vector.load %arg2[%c6_206, %c0_207, %c0_208] : memref<9x1x128xf32, #tpu.memory_space<vmem>>, vector<1x1x128xf32>
      %324 = vector.shape_cast %323 : vector<1x1x128xf32> to vector<1x128xf32>
      %325 = vector.broadcast %322 : vector<44x1xf32> to vector<44x128xf32>
      %326 = vector.broadcast %324 : vector<1x128xf32> to vector<44x128xf32>
      %327 = arith.mulf %325, %326 : vector<44x128xf32>
      %328 = arith.addf %318, %327 : vector<44x128xf32>
      %c2_i32_209 = arith.constant 2 : i32
      %329 = arith.addi %257, %c2_i32_209 : i32
      %c0_210 = arith.constant 0 : index
      %330 = arith.index_cast %329 : i32 to index
      %c1_211 = arith.constant 1 : index
      %c0_212 = arith.constant 0 : index
      %331 = vector.load %arg1[%c0_210, %330, %c1_211, %c0_212] : memref<1x46x46x1xf32, #tpu.memory_space<vmem>>, vector<1x1x44x1xf32>
      %332 = vector.shape_cast %331 : vector<1x1x44x1xf32> to vector<44x1xf32>
      %c7_213 = arith.constant 7 : index
      %c0_214 = arith.constant 0 : index
      %c0_215 = arith.constant 0 : index
      %333 = vector.load %arg2[%c7_213, %c0_214, %c0_215] : memref<9x1x128xf32, #tpu.memory_space<vmem>>, vector<1x1x128xf32>
      %334 = vector.shape_cast %333 : vector<1x1x128xf32> to vector<1x128xf32>
      %335 = vector.broadcast %332 : vector<44x1xf32> to vector<44x128xf32>
      %336 = vector.broadcast %334 : vector<1x128xf32> to vector<44x128xf32>
      %337 = arith.mulf %335, %336 : vector<44x128xf32>
      %338 = arith.addf %328, %337 : vector<44x128xf32>
      %c2_i32_216 = arith.constant 2 : i32
      %339 = arith.addi %257, %c2_i32_216 : i32
      %c0_217 = arith.constant 0 : index
      %340 = arith.index_cast %339 : i32 to index
      %c2_218 = arith.constant 2 : index
      %c0_219 = arith.constant 0 : index
      %341 = vector.load %arg1[%c0_217, %340, %c2_218, %c0_219] : memref<1x46x46x1xf32, #tpu.memory_space<vmem>>, vector<1x1x44x1xf32>
      %342 = vector.shape_cast %341 : vector<1x1x44x1xf32> to vector<44x1xf32>
      %c8_220 = arith.constant 8 : index
      %c0_221 = arith.constant 0 : index
      %c0_222 = arith.constant 0 : index
      %343 = vector.load %arg2[%c8_220, %c0_221, %c0_222] : memref<9x1x128xf32, #tpu.memory_space<vmem>>, vector<1x1x128xf32>
      %344 = vector.shape_cast %343 : vector<1x1x128xf32> to vector<1x128xf32>
      %345 = vector.broadcast %342 : vector<44x1xf32> to vector<44x128xf32>
      %346 = vector.broadcast %344 : vector<1x128xf32> to vector<44x128xf32>
      %347 = arith.mulf %345, %346 : vector<44x128xf32>
      %348 = arith.addf %338, %347 : vector<44x128xf32>
      %c2_i32_223 = arith.constant 2 : i32
      %349 = arith.muli %c2_i32_223, %arg14 : i32
      %c1_i32_224 = arith.constant 1 : i32
      %350 = arith.addi %349, %c1_i32_224 : i32
      %cst_225 = arith.constant 0.000000e+00 : f32
      %351 = vector.broadcast %cst_225 : f32 to vector<44x128xf32>
      %c0_i32_226 = arith.constant 0 : i32
      %352 = arith.addi %350, %c0_i32_226 : i32
      %c0_227 = arith.constant 0 : index
      %353 = arith.index_cast %352 : i32 to index
      %c0_228 = arith.constant 0 : index
      %c0_229 = arith.constant 0 : index
      %354 = vector.load %arg1[%c0_227, %353, %c0_228, %c0_229] : memref<1x46x46x1xf32, #tpu.memory_space<vmem>>, vector<1x1x44x1xf32>
      %355 = vector.shape_cast %354 : vector<1x1x44x1xf32> to vector<44x1xf32>
      %c0_230 = arith.constant 0 : index
      %c0_231 = arith.constant 0 : index
      %c0_232 = arith.constant 0 : index
      %356 = vector.load %arg2[%c0_230, %c0_231, %c0_232] : memref<9x1x128xf32, #tpu.memory_space<vmem>>, vector<1x1x128xf32>
      %357 = vector.shape_cast %356 : vector<1x1x128xf32> to vector<1x128xf32>
      %358 = vector.broadcast %355 : vector<44x1xf32> to vector<44x128xf32>
      %359 = vector.broadcast %357 : vector<1x128xf32> to vector<44x128xf32>
      %360 = arith.mulf %358, %359 : vector<44x128xf32>
      %361 = arith.addf %351, %360 : vector<44x128xf32>
      %c0_i32_233 = arith.constant 0 : i32
      %362 = arith.addi %350, %c0_i32_233 : i32
      %c0_234 = arith.constant 0 : index
      %363 = arith.index_cast %362 : i32 to index
      %c1_235 = arith.constant 1 : index
      %c0_236 = arith.constant 0 : index
      %364 = vector.load %arg1[%c0_234, %363, %c1_235, %c0_236] : memref<1x46x46x1xf32, #tpu.memory_space<vmem>>, vector<1x1x44x1xf32>
      %365 = vector.shape_cast %364 : vector<1x1x44x1xf32> to vector<44x1xf32>
      %c1_237 = arith.constant 1 : index
      %c0_238 = arith.constant 0 : index
      %c0_239 = arith.constant 0 : index
      %366 = vector.load %arg2[%c1_237, %c0_238, %c0_239] : memref<9x1x128xf32, #tpu.memory_space<vmem>>, vector<1x1x128xf32>
      %367 = vector.shape_cast %366 : vector<1x1x128xf32> to vector<1x128xf32>
      %368 = vector.broadcast %365 : vector<44x1xf32> to vector<44x128xf32>
      %369 = vector.broadcast %367 : vector<1x128xf32> to vector<44x128xf32>
      %370 = arith.mulf %368, %369 : vector<44x128xf32>
      %371 = arith.addf %361, %370 : vector<44x128xf32>
      %c0_i32_240 = arith.constant 0 : i32
      %372 = arith.addi %350, %c0_i32_240 : i32
      %c0_241 = arith.constant 0 : index
      %373 = arith.index_cast %372 : i32 to index
      %c2_242 = arith.constant 2 : index
      %c0_243 = arith.constant 0 : index
      %374 = vector.load %arg1[%c0_241, %373, %c2_242, %c0_243] : memref<1x46x46x1xf32, #tpu.memory_space<vmem>>, vector<1x1x44x1xf32>
      %375 = vector.shape_cast %374 : vector<1x1x44x1xf32> to vector<44x1xf32>
      %c2_244 = arith.constant 2 : index
      %c0_245 = arith.constant 0 : index
      %c0_246 = arith.constant 0 : index
      %376 = vector.load %arg2[%c2_244, %c0_245, %c0_246] : memref<9x1x128xf32, #tpu.memory_space<vmem>>, vector<1x1x128xf32>
      %377 = vector.shape_cast %376 : vector<1x1x128xf32> to vector<1x128xf32>
      %378 = vector.broadcast %375 : vector<44x1xf32> to vector<44x128xf32>
      %379 = vector.broadcast %377 : vector<1x128xf32> to vector<44x128xf32>
      %380 = arith.mulf %378, %379 : vector<44x128xf32>
      %381 = arith.addf %371, %380 : vector<44x128xf32>
      %c1_i32_247 = arith.constant 1 : i32
      %382 = arith.addi %350, %c1_i32_247 : i32
      %c0_248 = arith.constant 0 : index
      %383 = arith.index_cast %382 : i32 to index
      %c0_249 = arith.constant 0 : index
      %c0_250 = arith.constant 0 : index
      %384 = vector.load %arg1[%c0_248, %383, %c0_249, %c0_250] : memref<1x46x46x1xf32, #tpu.memory_space<vmem>>, vector<1x1x44x1xf32>
      %385 = vector.shape_cast %384 : vector<1x1x44x1xf32> to vector<44x1xf32>
      %c3_251 = arith.constant 3 : index
      %c0_252 = arith.constant 0 : index
      %c0_253 = arith.constant 0 : index
      %386 = vector.load %arg2[%c3_251, %c0_252, %c0_253] : memref<9x1x128xf32, #tpu.memory_space<vmem>>, vector<1x1x128xf32>
      %387 = vector.shape_cast %386 : vector<1x1x128xf32> to vector<1x128xf32>
      %388 = vector.broadcast %385 : vector<44x1xf32> to vector<44x128xf32>
      %389 = vector.broadcast %387 : vector<1x128xf32> to vector<44x128xf32>
      %390 = arith.mulf %388, %389 : vector<44x128xf32>
      %391 = arith.addf %381, %390 : vector<44x128xf32>
      %c1_i32_254 = arith.constant 1 : i32
      %392 = arith.addi %350, %c1_i32_254 : i32
      %c0_255 = arith.constant 0 : index
      %393 = arith.index_cast %392 : i32 to index
      %c1_256 = arith.constant 1 : index
      %c0_257 = arith.constant 0 : index
      %394 = vector.load %arg1[%c0_255, %393, %c1_256, %c0_257] : memref<1x46x46x1xf32, #tpu.memory_space<vmem>>, vector<1x1x44x1xf32>
      %395 = vector.shape_cast %394 : vector<1x1x44x1xf32> to vector<44x1xf32>
      %c4_258 = arith.constant 4 : index
      %c0_259 = arith.constant 0 : index
      %c0_260 = arith.constant 0 : index
      %396 = vector.load %arg2[%c4_258, %c0_259, %c0_260] : memref<9x1x128xf32, #tpu.memory_space<vmem>>, vector<1x1x128xf32>
      %397 = vector.shape_cast %396 : vector<1x1x128xf32> to vector<1x128xf32>
      %398 = vector.broadcast %395 : vector<44x1xf32> to vector<44x128xf32>
      %399 = vector.broadcast %397 : vector<1x128xf32> to vector<44x128xf32>
      %400 = arith.mulf %398, %399 : vector<44x128xf32>
      %401 = arith.addf %391, %400 : vector<44x128xf32>
      %c1_i32_261 = arith.constant 1 : i32
      %402 = arith.addi %350, %c1_i32_261 : i32
      %c0_262 = arith.constant 0 : index
      %403 = arith.index_cast %402 : i32 to index
      %c2_263 = arith.constant 2 : index
      %c0_264 = arith.constant 0 : index
      %404 = vector.load %arg1[%c0_262, %403, %c2_263, %c0_264] : memref<1x46x46x1xf32, #tpu.memory_space<vmem>>, vector<1x1x44x1xf32>
      %405 = vector.shape_cast %404 : vector<1x1x44x1xf32> to vector<44x1xf32>
      %c5_265 = arith.constant 5 : index
      %c0_266 = arith.constant 0 : index
      %c0_267 = arith.constant 0 : index
      %406 = vector.load %arg2[%c5_265, %c0_266, %c0_267] : memref<9x1x128xf32, #tpu.memory_space<vmem>>, vector<1x1x128xf32>
      %407 = vector.shape_cast %406 : vector<1x1x128xf32> to vector<1x128xf32>
      %408 = vector.broadcast %405 : vector<44x1xf32> to vector<44x128xf32>
      %409 = vector.broadcast %407 : vector<1x128xf32> to vector<44x128xf32>
      %410 = arith.mulf %408, %409 : vector<44x128xf32>
      %411 = arith.addf %401, %410 : vector<44x128xf32>
      %c2_i32_268 = arith.constant 2 : i32
      %412 = arith.addi %350, %c2_i32_268 : i32
      %c0_269 = arith.constant 0 : index
      %413 = arith.index_cast %412 : i32 to index
      %c0_270 = arith.constant 0 : index
      %c0_271 = arith.constant 0 : index
      %414 = vector.load %arg1[%c0_269, %413, %c0_270, %c0_271] : memref<1x46x46x1xf32, #tpu.memory_space<vmem>>, vector<1x1x44x1xf32>
      %415 = vector.shape_cast %414 : vector<1x1x44x1xf32> to vector<44x1xf32>
      %c6_272 = arith.constant 6 : index
      %c0_273 = arith.constant 0 : index
      %c0_274 = arith.constant 0 : index
      %416 = vector.load %arg2[%c6_272, %c0_273, %c0_274] : memref<9x1x128xf32, #tpu.memory_space<vmem>>, vector<1x1x128xf32>
      %417 = vector.shape_cast %416 : vector<1x1x128xf32> to vector<1x128xf32>
      %418 = vector.broadcast %415 : vector<44x1xf32> to vector<44x128xf32>
      %419 = vector.broadcast %417 : vector<1x128xf32> to vector<44x128xf32>
      %420 = arith.mulf %418, %419 : vector<44x128xf32>
      %421 = arith.addf %411, %420 : vector<44x128xf32>
      %c2_i32_275 = arith.constant 2 : i32
      %422 = arith.addi %350, %c2_i32_275 : i32
      %c0_276 = arith.constant 0 : index
      %423 = arith.index_cast %422 : i32 to index
      %c1_277 = arith.constant 1 : index
      %c0_278 = arith.constant 0 : index
      %424 = vector.load %arg1[%c0_276, %423, %c1_277, %c0_278] : memref<1x46x46x1xf32, #tpu.memory_space<vmem>>, vector<1x1x44x1xf32>
      %425 = vector.shape_cast %424 : vector<1x1x44x1xf32> to vector<44x1xf32>
      %c7_279 = arith.constant 7 : index
      %c0_280 = arith.constant 0 : index
      %c0_281 = arith.constant 0 : index
      %426 = vector.load %arg2[%c7_279, %c0_280, %c0_281] : memref<9x1x128xf32, #tpu.memory_space<vmem>>, vector<1x1x128xf32>
      %427 = vector.shape_cast %426 : vector<1x1x128xf32> to vector<1x128xf32>
      %428 = vector.broadcast %425 : vector<44x1xf32> to vector<44x128xf32>
      %429 = vector.broadcast %427 : vector<1x128xf32> to vector<44x128xf32>
      %430 = arith.mulf %428, %429 : vector<44x128xf32>
      %431 = arith.addf %421, %430 : vector<44x128xf32>
      %c2_i32_282 = arith.constant 2 : i32
      %432 = arith.addi %350, %c2_i32_282 : i32
      %c0_283 = arith.constant 0 : index
      %433 = arith.index_cast %432 : i32 to index
      %c2_284 = arith.constant 2 : index
      %c0_285 = arith.constant 0 : index
      %434 = vector.load %arg1[%c0_283, %433, %c2_284, %c0_285] : memref<1x46x46x1xf32, #tpu.memory_space<vmem>>, vector<1x1x44x1xf32>
      %435 = vector.shape_cast %434 : vector<1x1x44x1xf32> to vector<44x1xf32>
      %c8_286 = arith.constant 8 : index
      %c0_287 = arith.constant 0 : index
      %c0_288 = arith.constant 0 : index
      %436 = vector.load %arg2[%c8_286, %c0_287, %c0_288] : memref<9x1x128xf32, #tpu.memory_space<vmem>>, vector<1x1x128xf32>
      %437 = vector.shape_cast %436 : vector<1x1x128xf32> to vector<1x128xf32>
      %438 = vector.broadcast %435 : vector<44x1xf32> to vector<44x128xf32>
      %439 = vector.broadcast %437 : vector<1x128xf32> to vector<44x128xf32>
      %440 = arith.mulf %438, %439 : vector<44x128xf32>
      %441 = arith.addf %431, %440 : vector<44x128xf32>
      %442 = arith.maximumf %348, %441 : vector<44x128xf32>
      %cst_289 = arith.constant dense<0.000000e+00> : vector<22x128xf32>
      %443 = tpu.matmul %6, %442, %cst_289 {dimension_numbers = #tpu.dot_dimension_numbers<[1], [0], [0], [1], [0, 0, 1, 1], [], []>} : vector<22x44xf32>, vector<44x128xf32>, vector<22x128xf32> -> vector<22x128xf32>
      %cst_290 = arith.constant dense<0.000000e+00> : vector<22x128xf32>
      %444 = tpu.matmul %13, %442, %cst_290 {dimension_numbers = #tpu.dot_dimension_numbers<[1], [0], [0], [1], [0, 0, 1, 1], [], []>} : vector<22x44xf32>, vector<44x128xf32>, vector<22x128xf32> -> vector<22x128xf32>
      %445 = arith.maximumf %443, %444 : vector<22x128xf32>
      %446 = vector.broadcast %14 : vector<1x128xf32> to vector<22x128xf32>
      %447 = arith.addf %445, %446 : vector<22x128xf32>
      %cst_291 = arith.constant 0.000000e+00 : f32
      %448 = vector.broadcast %cst_291 : f32 to vector<22x128xf32>
      %449 = arith.maximumf %447, %448 : vector<22x128xf32>
      %450 = arith.index_cast %arg14 : i32 to index
      %c0_292 = arith.constant 0 : index
      %c0_293 = arith.constant 0 : index
      %451 = vector.load %arg11[%450, %c0_292, %c0_293] : memref<22x22x128xf32, #tpu.memory_space<vmem>>, vector<1x22x128xf32>
      %452 = vector.shape_cast %451 : vector<1x22x128xf32> to vector<22x128xf32>
      %453 = vector.shape_cast %449 : vector<22x128xf32> to vector<1x22x128xf32>
      tpu.vector_store %arg11[%450, %c0_292, %c0_293], %453 {strides = array<i32>} : memref<22x22x128xf32, #tpu.memory_space<vmem>>, vector<1x22x128xf32>,
    }
    %c22_i32_3 = arith.constant 22 : i32
    %16 = tpu.iota {dimensions = array<i32: 0>} : vector<10x20xi32>
    %17 = tpu.iota {dimensions = array<i32: 1>} : vector<10x20xi32>
    %c2_i32_4 = arith.constant 2 : i32
    %18 = vector.broadcast %c2_i32_4 : i32 to vector<10x20xi32>
    %19 = arith.muli %18, %16 : vector<10x20xi32>
    %20 = arith.cmpi eq, %17, %19 : vector<10x20xi32>
    %21 = arith.extui %20 : vector<10x20xi1> to vector<10x20xi32>
    %22 = arith.sitofp %21 : vector<10x20xi32> to vector<10x20xf32>
    %c2_i32_5 = arith.constant 2 : i32
    %23 = vector.broadcast %c2_i32_5 : i32 to vector<10x20xi32>
    %24 = arith.muli %23, %16 : vector<10x20xi32>
    %c1_i32_6 = arith.constant 1 : i32
    %25 = vector.broadcast %c1_i32_6 : i32 to vector<10x20xi32>
    %26 = arith.addi %24, %25 : vector<10x20xi32>
    %27 = arith.cmpi eq, %17, %26 : vector<10x20xi32>
    %28 = arith.extui %27 : vector<10x20xi1> to vector<10x20xi32>
    %29 = arith.sitofp %28 : vector<10x20xi32> to vector<10x20xf32>
    %c0_7 = arith.constant 0 : index
    %c0_8 = arith.constant 0 : index
    %30 = vector.load %arg5[%c0_7, %c0_8] : memref<1x128xf32, #tpu.memory_space<vmem>>, vector<1x128xf32>
    %c0_i32_9 = arith.constant 0 : i32
    %c10_i32 = arith.constant 10 : i32
    %31 = arith.addi %c0_i32_9, %c10_i32 : i32
    %c1_i32_10 = arith.constant 1 : i32
    scf.for %arg14 = %c0_i32_9 to %31 step %c1_i32_10  : i32 {
      %c2_i32_158 = arith.constant 2 : i32
      %257 = arith.muli %c2_i32_158, %arg14 : i32
      %cst_159 = arith.constant 0.000000e+00 : f32
      %258 = vector.broadcast %cst_159 : f32 to vector<20x128xf32>
      %c0_i32_160 = arith.constant 0 : i32
      %259 = arith.addi %257, %c0_i32_160 : i32
      %260 = arith.index_cast %259 : i32 to index
      %c0_161 = arith.constant 0 : index
      %c0_162 = arith.constant 0 : index
      %261 = vector.load %arg11[%260, %c0_161, %c0_162] : memref<22x22x128xf32, #tpu.memory_space<vmem>>, vector<1x20x128xf32>
      %262 = vector.shape_cast %261 : vector<1x20x128xf32> to vector<20x128xf32>
      %263 = arith.truncf %262 : vector<20x128xf32> to vector<20x128xbf16>
      %c0_163 = arith.constant 0 : index
      %c0_164 = arith.constant 0 : index
      %c0_165 = arith.constant 0 : index
      %264 = vector.load %arg4[%c0_163, %c0_164, %c0_165] : memref<9x128x128xbf16, #tpu.memory_space<vmem>>, vector<1x128x128xbf16>
      %265 = vector.shape_cast %264 : vector<1x128x128xbf16> to vector<128x128xbf16>
      %cst_166 = arith.constant dense<0.000000e+00> : vector<20x128xf32>
      %266 = tpu.matmul %263, %265, %cst_166 {dimension_numbers = #tpu.dot_dimension_numbers<[1], [0], [0], [1], [0, 0, 1, 1], [], []>} : vector<20x128xbf16>, vector<128x128xbf16>, vector<20x128xf32> -> vector<20x128xf32>
      %267 = arith.addf %258, %266 : vector<20x128xf32>
      %c0_i32_167 = arith.constant 0 : i32
      %268 = arith.addi %257, %c0_i32_167 : i32
      %269 = arith.index_cast %268 : i32 to index
      %c1_168 = arith.constant 1 : index
      %c0_169 = arith.constant 0 : index
      %270 = vector.load %arg11[%269, %c1_168, %c0_169] : memref<22x22x128xf32, #tpu.memory_space<vmem>>, vector<1x20x128xf32>
      %271 = vector.shape_cast %270 : vector<1x20x128xf32> to vector<20x128xf32>
      %272 = arith.truncf %271 : vector<20x128xf32> to vector<20x128xbf16>
      %c1_170 = arith.constant 1 : index
      %c0_171 = arith.constant 0 : index
      %c0_172 = arith.constant 0 : index
      %273 = vector.load %arg4[%c1_170, %c0_171, %c0_172] : memref<9x128x128xbf16, #tpu.memory_space<vmem>>, vector<1x128x128xbf16>
      %274 = vector.shape_cast %273 : vector<1x128x128xbf16> to vector<128x128xbf16>
      %cst_173 = arith.constant dense<0.000000e+00> : vector<20x128xf32>
      %275 = tpu.matmul %272, %274, %cst_173 {dimension_numbers = #tpu.dot_dimension_numbers<[1], [0], [0], [1], [0, 0, 1, 1], [], []>} : vector<20x128xbf16>, vector<128x128xbf16>, vector<20x128xf32> -> vector<20x128xf32>
      %276 = arith.addf %267, %275 : vector<20x128xf32>
      %c0_i32_174 = arith.constant 0 : i32
      %277 = arith.addi %257, %c0_i32_174 : i32
      %278 = arith.index_cast %277 : i32 to index
      %c2_175 = arith.constant 2 : index
      %c0_176 = arith.constant 0 : index
      %279 = vector.load %arg11[%278, %c2_175, %c0_176] : memref<22x22x128xf32, #tpu.memory_space<vmem>>, vector<1x20x128xf32>
      %280 = vector.shape_cast %279 : vector<1x20x128xf32> to vector<20x128xf32>
      %281 = arith.truncf %280 : vector<20x128xf32> to vector<20x128xbf16>
      %c2_177 = arith.constant 2 : index
      %c0_178 = arith.constant 0 : index
      %c0_179 = arith.constant 0 : index
      %282 = vector.load %arg4[%c2_177, %c0_178, %c0_179] : memref<9x128x128xbf16, #tpu.memory_space<vmem>>, vector<1x128x128xbf16>
      %283 = vector.shape_cast %282 : vector<1x128x128xbf16> to vector<128x128xbf16>
      %cst_180 = arith.constant dense<0.000000e+00> : vector<20x128xf32>
      %284 = tpu.matmul %281, %283, %cst_180 {dimension_numbers = #tpu.dot_dimension_numbers<[1], [0], [0], [1], [0, 0, 1, 1], [], []>} : vector<20x128xbf16>, vector<128x128xbf16>, vector<20x128xf32> -> vector<20x128xf32>
      %285 = arith.addf %276, %284 : vector<20x128xf32>
      %c1_i32_181 = arith.constant 1 : i32
      %286 = arith.addi %257, %c1_i32_181 : i32
      %287 = arith.index_cast %286 : i32 to index
      %c0_182 = arith.constant 0 : index
      %c0_183 = arith.constant 0 : index
      %288 = vector.load %arg11[%287, %c0_182, %c0_183] : memref<22x22x128xf32, #tpu.memory_space<vmem>>, vector<1x20x128xf32>
      %289 = vector.shape_cast %288 : vector<1x20x128xf32> to vector<20x128xf32>
      %290 = arith.truncf %289 : vector<20x128xf32> to vector<20x128xbf16>
      %c3_184 = arith.constant 3 : index
      %c0_185 = arith.constant 0 : index
      %c0_186 = arith.constant 0 : index
      %291 = vector.load %arg4[%c3_184, %c0_185, %c0_186] : memref<9x128x128xbf16, #tpu.memory_space<vmem>>, vector<1x128x128xbf16>
      %292 = vector.shape_cast %291 : vector<1x128x128xbf16> to vector<128x128xbf16>
      %cst_187 = arith.constant dense<0.000000e+00> : vector<20x128xf32>
      %293 = tpu.matmul %290, %292, %cst_187 {dimension_numbers = #tpu.dot_dimension_numbers<[1], [0], [0], [1], [0, 0, 1, 1], [], []>} : vector<20x128xbf16>, vector<128x128xbf16>, vector<20x128xf32> -> vector<20x128xf32>
      %294 = arith.addf %285, %293 : vector<20x128xf32>
      %c1_i32_188 = arith.constant 1 : i32
      %295 = arith.addi %257, %c1_i32_188 : i32
      %296 = arith.index_cast %295 : i32 to index
      %c1_189 = arith.constant 1 : index
      %c0_190 = arith.constant 0 : index
      %297 = vector.load %arg11[%296, %c1_189, %c0_190] : memref<22x22x128xf32, #tpu.memory_space<vmem>>, vector<1x20x128xf32>
      %298 = vector.shape_cast %297 : vector<1x20x128xf32> to vector<20x128xf32>
      %299 = arith.truncf %298 : vector<20x128xf32> to vector<20x128xbf16>
      %c4_191 = arith.constant 4 : index
      %c0_192 = arith.constant 0 : index
      %c0_193 = arith.constant 0 : index
      %300 = vector.load %arg4[%c4_191, %c0_192, %c0_193] : memref<9x128x128xbf16, #tpu.memory_space<vmem>>, vector<1x128x128xbf16>
      %301 = vector.shape_cast %300 : vector<1x128x128xbf16> to vector<128x128xbf16>
      %cst_194 = arith.constant dense<0.000000e+00> : vector<20x128xf32>
      %302 = tpu.matmul %299, %301, %cst_194 {dimension_numbers = #tpu.dot_dimension_numbers<[1], [0], [0], [1], [0, 0, 1, 1], [], []>} : vector<20x128xbf16>, vector<128x128xbf16>, vector<20x128xf32> -> vector<20x128xf32>
      %303 = arith.addf %294, %302 : vector<20x128xf32>
      %c1_i32_195 = arith.constant 1 : i32
      %304 = arith.addi %257, %c1_i32_195 : i32
      %305 = arith.index_cast %304 : i32 to index
      %c2_196 = arith.constant 2 : index
      %c0_197 = arith.constant 0 : index
      %306 = vector.load %arg11[%305, %c2_196, %c0_197] : memref<22x22x128xf32, #tpu.memory_space<vmem>>, vector<1x20x128xf32>
      %307 = vector.shape_cast %306 : vector<1x20x128xf32> to vector<20x128xf32>
      %308 = arith.truncf %307 : vector<20x128xf32> to vector<20x128xbf16>
      %c5_198 = arith.constant 5 : index
      %c0_199 = arith.constant 0 : index
      %c0_200 = arith.constant 0 : index
      %309 = vector.load %arg4[%c5_198, %c0_199, %c0_200] : memref<9x128x128xbf16, #tpu.memory_space<vmem>>, vector<1x128x128xbf16>
      %310 = vector.shape_cast %309 : vector<1x128x128xbf16> to vector<128x128xbf16>
      %cst_201 = arith.constant dense<0.000000e+00> : vector<20x128xf32>
      %311 = tpu.matmul %308, %310, %cst_201 {dimension_numbers = #tpu.dot_dimension_numbers<[1], [0], [0], [1], [0, 0, 1, 1], [], []>} : vector<20x128xbf16>, vector<128x128xbf16>, vector<20x128xf32> -> vector<20x128xf32>
      %312 = arith.addf %303, %311 : vector<20x128xf32>
      %c2_i32_202 = arith.constant 2 : i32
      %313 = arith.addi %257, %c2_i32_202 : i32
      %314 = arith.index_cast %313 : i32 to index
      %c0_203 = arith.constant 0 : index
      %c0_204 = arith.constant 0 : index
      %315 = vector.load %arg11[%314, %c0_203, %c0_204] : memref<22x22x128xf32, #tpu.memory_space<vmem>>, vector<1x20x128xf32>
      %316 = vector.shape_cast %315 : vector<1x20x128xf32> to vector<20x128xf32>
      %317 = arith.truncf %316 : vector<20x128xf32> to vector<20x128xbf16>
      %c6_205 = arith.constant 6 : index
      %c0_206 = arith.constant 0 : index
      %c0_207 = arith.constant 0 : index
      %318 = vector.load %arg4[%c6_205, %c0_206, %c0_207] : memref<9x128x128xbf16, #tpu.memory_space<vmem>>, vector<1x128x128xbf16>
      %319 = vector.shape_cast %318 : vector<1x128x128xbf16> to vector<128x128xbf16>
      %cst_208 = arith.constant dense<0.000000e+00> : vector<20x128xf32>
      %320 = tpu.matmul %317, %319, %cst_208 {dimension_numbers = #tpu.dot_dimension_numbers<[1], [0], [0], [1], [0, 0, 1, 1], [], []>} : vector<20x128xbf16>, vector<128x128xbf16>, vector<20x128xf32> -> vector<20x128xf32>
      %321 = arith.addf %312, %320 : vector<20x128xf32>
      %c2_i32_209 = arith.constant 2 : i32
      %322 = arith.addi %257, %c2_i32_209 : i32
      %323 = arith.index_cast %322 : i32 to index
      %c1_210 = arith.constant 1 : index
      %c0_211 = arith.constant 0 : index
      %324 = vector.load %arg11[%323, %c1_210, %c0_211] : memref<22x22x128xf32, #tpu.memory_space<vmem>>, vector<1x20x128xf32>
      %325 = vector.shape_cast %324 : vector<1x20x128xf32> to vector<20x128xf32>
      %326 = arith.truncf %325 : vector<20x128xf32> to vector<20x128xbf16>
      %c7_212 = arith.constant 7 : index
      %c0_213 = arith.constant 0 : index
      %c0_214 = arith.constant 0 : index
      %327 = vector.load %arg4[%c7_212, %c0_213, %c0_214] : memref<9x128x128xbf16, #tpu.memory_space<vmem>>, vector<1x128x128xbf16>
      %328 = vector.shape_cast %327 : vector<1x128x128xbf16> to vector<128x128xbf16>
      %cst_215 = arith.constant dense<0.000000e+00> : vector<20x128xf32>
      %329 = tpu.matmul %326, %328, %cst_215 {dimension_numbers = #tpu.dot_dimension_numbers<[1], [0], [0], [1], [0, 0, 1, 1], [], []>} : vector<20x128xbf16>, vector<128x128xbf16>, vector<20x128xf32> -> vector<20x128xf32>
      %330 = arith.addf %321, %329 : vector<20x128xf32>
      %c2_i32_216 = arith.constant 2 : i32
      %331 = arith.addi %257, %c2_i32_216 : i32
      %332 = arith.index_cast %331 : i32 to index
      %c2_217 = arith.constant 2 : index
      %c0_218 = arith.constant 0 : index
      %333 = vector.load %arg11[%332, %c2_217, %c0_218] : memref<22x22x128xf32, #tpu.memory_space<vmem>>, vector<1x20x128xf32>
      %334 = vector.shape_cast %333 : vector<1x20x128xf32> to vector<20x128xf32>
      %335 = arith.truncf %334 : vector<20x128xf32> to vector<20x128xbf16>
      %c8_219 = arith.constant 8 : index
      %c0_220 = arith.constant 0 : index
      %c0_221 = arith.constant 0 : index
      %336 = vector.load %arg4[%c8_219, %c0_220, %c0_221] : memref<9x128x128xbf16, #tpu.memory_space<vmem>>, vector<1x128x128xbf16>
      %337 = vector.shape_cast %336 : vector<1x128x128xbf16> to vector<128x128xbf16>
      %cst_222 = arith.constant dense<0.000000e+00> : vector<20x128xf32>
      %338 = tpu.matmul %335, %337, %cst_222 {dimension_numbers = #tpu.dot_dimension_numbers<[1], [0], [0], [1], [0, 0, 1, 1], [], []>} : vector<20x128xbf16>, vector<128x128xbf16>, vector<20x128xf32> -> vector<20x128xf32>
      %339 = arith.addf %330, %338 : vector<20x128xf32>
      %c2_i32_223 = arith.constant 2 : i32
      %340 = arith.muli %c2_i32_223, %arg14 : i32
      %c1_i32_224 = arith.constant 1 : i32
      %341 = arith.addi %340, %c1_i32_224 : i32
      %cst_225 = arith.constant 0.000000e+00 : f32
      %342 = vector.broadcast %cst_225 : f32 to vector<20x128xf32>
      %c0_i32_226 = arith.constant 0 : i32
      %343 = arith.addi %341, %c0_i32_226 : i32
      %344 = arith.index_cast %343 : i32 to index
      %c0_227 = arith.constant 0 : index
      %c0_228 = arith.constant 0 : index
      %345 = vector.load %arg11[%344, %c0_227, %c0_228] : memref<22x22x128xf32, #tpu.memory_space<vmem>>, vector<1x20x128xf32>
      %346 = vector.shape_cast %345 : vector<1x20x128xf32> to vector<20x128xf32>
      %347 = arith.truncf %346 : vector<20x128xf32> to vector<20x128xbf16>
      %c0_229 = arith.constant 0 : index
      %c0_230 = arith.constant 0 : index
      %c0_231 = arith.constant 0 : index
      %348 = vector.load %arg4[%c0_229, %c0_230, %c0_231] : memref<9x128x128xbf16, #tpu.memory_space<vmem>>, vector<1x128x128xbf16>
      %349 = vector.shape_cast %348 : vector<1x128x128xbf16> to vector<128x128xbf16>
      %cst_232 = arith.constant dense<0.000000e+00> : vector<20x128xf32>
      %350 = tpu.matmul %347, %349, %cst_232 {dimension_numbers = #tpu.dot_dimension_numbers<[1], [0], [0], [1], [0, 0, 1, 1], [], []>} : vector<20x128xbf16>, vector<128x128xbf16>, vector<20x128xf32> -> vector<20x128xf32>
      %351 = arith.addf %342, %350 : vector<20x128xf32>
      %c0_i32_233 = arith.constant 0 : i32
      %352 = arith.addi %341, %c0_i32_233 : i32
      %353 = arith.index_cast %352 : i32 to index
      %c1_234 = arith.constant 1 : index
      %c0_235 = arith.constant 0 : index
      %354 = vector.load %arg11[%353, %c1_234, %c0_235] : memref<22x22x128xf32, #tpu.memory_space<vmem>>, vector<1x20x128xf32>
      %355 = vector.shape_cast %354 : vector<1x20x128xf32> to vector<20x128xf32>
      %356 = arith.truncf %355 : vector<20x128xf32> to vector<20x128xbf16>
      %c1_236 = arith.constant 1 : index
      %c0_237 = arith.constant 0 : index
      %c0_238 = arith.constant 0 : index
      %357 = vector.load %arg4[%c1_236, %c0_237, %c0_238] : memref<9x128x128xbf16, #tpu.memory_space<vmem>>, vector<1x128x128xbf16>
      %358 = vector.shape_cast %357 : vector<1x128x128xbf16> to vector<128x128xbf16>
      %cst_239 = arith.constant dense<0.000000e+00> : vector<20x128xf32>
      %359 = tpu.matmul %356, %358, %cst_239 {dimension_numbers = #tpu.dot_dimension_numbers<[1], [0], [0], [1], [0, 0, 1, 1], [], []>} : vector<20x128xbf16>, vector<128x128xbf16>, vector<20x128xf32> -> vector<20x128xf32>
      %360 = arith.addf %351, %359 : vector<20x128xf32>
      %c0_i32_240 = arith.constant 0 : i32
      %361 = arith.addi %341, %c0_i32_240 : i32
      %362 = arith.index_cast %361 : i32 to index
      %c2_241 = arith.constant 2 : index
      %c0_242 = arith.constant 0 : index
      %363 = vector.load %arg11[%362, %c2_241, %c0_242] : memref<22x22x128xf32, #tpu.memory_space<vmem>>, vector<1x20x128xf32>
      %364 = vector.shape_cast %363 : vector<1x20x128xf32> to vector<20x128xf32>
      %365 = arith.truncf %364 : vector<20x128xf32> to vector<20x128xbf16>
      %c2_243 = arith.constant 2 : index
      %c0_244 = arith.constant 0 : index
      %c0_245 = arith.constant 0 : index
      %366 = vector.load %arg4[%c2_243, %c0_244, %c0_245] : memref<9x128x128xbf16, #tpu.memory_space<vmem>>, vector<1x128x128xbf16>
      %367 = vector.shape_cast %366 : vector<1x128x128xbf16> to vector<128x128xbf16>
      %cst_246 = arith.constant dense<0.000000e+00> : vector<20x128xf32>
      %368 = tpu.matmul %365, %367, %cst_246 {dimension_numbers = #tpu.dot_dimension_numbers<[1], [0], [0], [1], [0, 0, 1, 1], [], []>} : vector<20x128xbf16>, vector<128x128xbf16>, vector<20x128xf32> -> vector<20x128xf32>
      %369 = arith.addf %360, %368 : vector<20x128xf32>
      %c1_i32_247 = arith.constant 1 : i32
      %370 = arith.addi %341, %c1_i32_247 : i32
      %371 = arith.index_cast %370 : i32 to index
      %c0_248 = arith.constant 0 : index
      %c0_249 = arith.constant 0 : index
      %372 = vector.load %arg11[%371, %c0_248, %c0_249] : memref<22x22x128xf32, #tpu.memory_space<vmem>>, vector<1x20x128xf32>
      %373 = vector.shape_cast %372 : vector<1x20x128xf32> to vector<20x128xf32>
      %374 = arith.truncf %373 : vector<20x128xf32> to vector<20x128xbf16>
      %c3_250 = arith.constant 3 : index
      %c0_251 = arith.constant 0 : index
      %c0_252 = arith.constant 0 : index
      %375 = vector.load %arg4[%c3_250, %c0_251, %c0_252] : memref<9x128x128xbf16, #tpu.memory_space<vmem>>, vector<1x128x128xbf16>
      %376 = vector.shape_cast %375 : vector<1x128x128xbf16> to vector<128x128xbf16>
      %cst_253 = arith.constant dense<0.000000e+00> : vector<20x128xf32>
      %377 = tpu.matmul %374, %376, %cst_253 {dimension_numbers = #tpu.dot_dimension_numbers<[1], [0], [0], [1], [0, 0, 1, 1], [], []>} : vector<20x128xbf16>, vector<128x128xbf16>, vector<20x128xf32> -> vector<20x128xf32>
      %378 = arith.addf %369, %377 : vector<20x128xf32>
      %c1_i32_254 = arith.constant 1 : i32
      %379 = arith.addi %341, %c1_i32_254 : i32
      %380 = arith.index_cast %379 : i32 to index
      %c1_255 = arith.constant 1 : index
      %c0_256 = arith.constant 0 : index
      %381 = vector.load %arg11[%380, %c1_255, %c0_256] : memref<22x22x128xf32, #tpu.memory_space<vmem>>, vector<1x20x128xf32>
      %382 = vector.shape_cast %381 : vector<1x20x128xf32> to vector<20x128xf32>
      %383 = arith.truncf %382 : vector<20x128xf32> to vector<20x128xbf16>
      %c4_257 = arith.constant 4 : index
      %c0_258 = arith.constant 0 : index
      %c0_259 = arith.constant 0 : index
      %384 = vector.load %arg4[%c4_257, %c0_258, %c0_259] : memref<9x128x128xbf16, #tpu.memory_space<vmem>>, vector<1x128x128xbf16>
      %385 = vector.shape_cast %384 : vector<1x128x128xbf16> to vector<128x128xbf16>
      %cst_260 = arith.constant dense<0.000000e+00> : vector<20x128xf32>
      %386 = tpu.matmul %383, %385, %cst_260 {dimension_numbers = #tpu.dot_dimension_numbers<[1], [0], [0], [1], [0, 0, 1, 1], [], []>} : vector<20x128xbf16>, vector<128x128xbf16>, vector<20x128xf32> -> vector<20x128xf32>
      %387 = arith.addf %378, %386 : vector<20x128xf32>
      %c1_i32_261 = arith.constant 1 : i32
      %388 = arith.addi %341, %c1_i32_261 : i32
      %389 = arith.index_cast %388 : i32 to index
      %c2_262 = arith.constant 2 : index
      %c0_263 = arith.constant 0 : index
      %390 = vector.load %arg11[%389, %c2_262, %c0_263] : memref<22x22x128xf32, #tpu.memory_space<vmem>>, vector<1x20x128xf32>
      %391 = vector.shape_cast %390 : vector<1x20x128xf32> to vector<20x128xf32>
      %392 = arith.truncf %391 : vector<20x128xf32> to vector<20x128xbf16>
      %c5_264 = arith.constant 5 : index
      %c0_265 = arith.constant 0 : index
      %c0_266 = arith.constant 0 : index
      %393 = vector.load %arg4[%c5_264, %c0_265, %c0_266] : memref<9x128x128xbf16, #tpu.memory_space<vmem>>, vector<1x128x128xbf16>
      %394 = vector.shape_cast %393 : vector<1x128x128xbf16> to vector<128x128xbf16>
      %cst_267 = arith.constant dense<0.000000e+00> : vector<20x128xf32>
      %395 = tpu.matmul %392, %394, %cst_267 {dimension_numbers = #tpu.dot_dimension_numbers<[1], [0], [0], [1], [0, 0, 1, 1], [], []>} : vector<20x128xbf16>, vector<128x128xbf16>, vector<20x128xf32> -> vector<20x128xf32>
      %396 = arith.addf %387, %395 : vector<20x128xf32>
      %c2_i32_268 = arith.constant 2 : i32
      %397 = arith.addi %341, %c2_i32_268 : i32
      %398 = arith.index_cast %397 : i32 to index
      %c0_269 = arith.constant 0 : index
      %c0_270 = arith.constant 0 : index
      %399 = vector.load %arg11[%398, %c0_269, %c0_270] : memref<22x22x128xf32, #tpu.memory_space<vmem>>, vector<1x20x128xf32>
      %400 = vector.shape_cast %399 : vector<1x20x128xf32> to vector<20x128xf32>
      %401 = arith.truncf %400 : vector<20x128xf32> to vector<20x128xbf16>
      %c6_271 = arith.constant 6 : index
      %c0_272 = arith.constant 0 : index
      %c0_273 = arith.constant 0 : index
      %402 = vector.load %arg4[%c6_271, %c0_272, %c0_273] : memref<9x128x128xbf16, #tpu.memory_space<vmem>>, vector<1x128x128xbf16>
      %403 = vector.shape_cast %402 : vector<1x128x128xbf16> to vector<128x128xbf16>
      %cst_274 = arith.constant dense<0.000000e+00> : vector<20x128xf32>
      %404 = tpu.matmul %401, %403, %cst_274 {dimension_numbers = #tpu.dot_dimension_numbers<[1], [0], [0], [1], [0, 0, 1, 1], [], []>} : vector<20x128xbf16>, vector<128x128xbf16>, vector<20x128xf32> -> vector<20x128xf32>
      %405 = arith.addf %396, %404 : vector<20x128xf32>
      %c2_i32_275 = arith.constant 2 : i32
      %406 = arith.addi %341, %c2_i32_275 : i32
      %407 = arith.index_cast %406 : i32 to index
      %c1_276 = arith.constant 1 : index
      %c0_277 = arith.constant 0 : index
      %408 = vector.load %arg11[%407, %c1_276, %c0_277] : memref<22x22x128xf32, #tpu.memory_space<vmem>>, vector<1x20x128xf32>
      %409 = vector.shape_cast %408 : vector<1x20x128xf32> to vector<20x128xf32>
      %410 = arith.truncf %409 : vector<20x128xf32> to vector<20x128xbf16>
      %c7_278 = arith.constant 7 : index
      %c0_279 = arith.constant 0 : index
      %c0_280 = arith.constant 0 : index
      %411 = vector.load %arg4[%c7_278, %c0_279, %c0_280] : memref<9x128x128xbf16, #tpu.memory_space<vmem>>, vector<1x128x128xbf16>
      %412 = vector.shape_cast %411 : vector<1x128x128xbf16> to vector<128x128xbf16>
      %cst_281 = arith.constant dense<0.000000e+00> : vector<20x128xf32>
      %413 = tpu.matmul %410, %412, %cst_281 {dimension_numbers = #tpu.dot_dimension_numbers<[1], [0], [0], [1], [0, 0, 1, 1], [], []>} : vector<20x128xbf16>, vector<128x128xbf16>, vector<20x128xf32> -> vector<20x128xf32>
      %414 = arith.addf %405, %413 : vector<20x128xf32>
      %c2_i32_282 = arith.constant 2 : i32
      %415 = arith.addi %341, %c2_i32_282 : i32
      %416 = arith.index_cast %415 : i32 to index
      %c2_283 = arith.constant 2 : index
      %c0_284 = arith.constant 0 : index
      %417 = vector.load %arg11[%416, %c2_283, %c0_284] : memref<22x22x128xf32, #tpu.memory_space<vmem>>, vector<1x20x128xf32>
      %418 = vector.shape_cast %417 : vector<1x20x128xf32> to vector<20x128xf32>
      %419 = arith.truncf %418 : vector<20x128xf32> to vector<20x128xbf16>
      %c8_285 = arith.constant 8 : index
      %c0_286 = arith.constant 0 : index
      %c0_287 = arith.constant 0 : index
      %420 = vector.load %arg4[%c8_285, %c0_286, %c0_287] : memref<9x128x128xbf16, #tpu.memory_space<vmem>>, vector<1x128x128xbf16>
      %421 = vector.shape_cast %420 : vector<1x128x128xbf16> to vector<128x128xbf16>
      %cst_288 = arith.constant dense<0.000000e+00> : vector<20x128xf32>
      %422 = tpu.matmul %419, %421, %cst_288 {dimension_numbers = #tpu.dot_dimension_numbers<[1], [0], [0], [1], [0, 0, 1, 1], [], []>} : vector<20x128xbf16>, vector<128x128xbf16>, vector<20x128xf32> -> vector<20x128xf32>
      %423 = arith.addf %414, %422 : vector<20x128xf32>
      %424 = arith.maximumf %339, %423 : vector<20x128xf32>
      %cst_289 = arith.constant dense<0.000000e+00> : vector<10x128xf32>
      %425 = tpu.matmul %22, %424, %cst_289 {dimension_numbers = #tpu.dot_dimension_numbers<[1], [0], [0], [1], [0, 0, 1, 1], [], []>} : vector<10x20xf32>, vector<20x128xf32>, vector<10x128xf32> -> vector<10x128xf32>
      %cst_290 = arith.constant dense<0.000000e+00> : vector<10x128xf32>
      %426 = tpu.matmul %29, %424, %cst_290 {dimension_numbers = #tpu.dot_dimension_numbers<[1], [0], [0], [1], [0, 0, 1, 1], [], []>} : vector<10x20xf32>, vector<20x128xf32>, vector<10x128xf32> -> vector<10x128xf32>
      %427 = arith.maximumf %425, %426 : vector<10x128xf32>
      %428 = vector.broadcast %30 : vector<1x128xf32> to vector<10x128xf32>
      %429 = arith.addf %427, %428 : vector<10x128xf32>
      %cst_291 = arith.constant 0.000000e+00 : f32
      %430 = vector.broadcast %cst_291 : f32 to vector<10x128xf32>
      %431 = arith.maximumf %429, %430 : vector<10x128xf32>
      %432 = arith.index_cast %arg14 : i32 to index
      %c0_292 = arith.constant 0 : index
      %c0_293 = arith.constant 0 : index
      %433 = vector.load %arg12[%432, %c0_292, %c0_293] : memref<10x10x128xf32, #tpu.memory_space<vmem>>, vector<1x10x128xf32>
      %434 = vector.shape_cast %433 : vector<1x10x128xf32> to vector<10x128xf32>
      %435 = vector.shape_cast %431 : vector<10x128xf32> to vector<1x10x128xf32>
      tpu.vector_store %arg12[%432, %c0_292, %c0_293], %435 {strides = array<i32>} : memref<10x10x128xf32, #tpu.memory_space<vmem>>, vector<1x10x128xf32>,
    }
    %c10_i32_11 = arith.constant 10 : i32
    %32 = tpu.iota {dimensions = array<i32: 0>} : vector<4x8xi32>
    %33 = tpu.iota {dimensions = array<i32: 1>} : vector<4x8xi32>
    %c2_i32_12 = arith.constant 2 : i32
    %34 = vector.broadcast %c2_i32_12 : i32 to vector<4x8xi32>
    %35 = arith.muli %34, %32 : vector<4x8xi32>
    %36 = arith.cmpi eq, %33, %35 : vector<4x8xi32>
    %37 = arith.extui %36 : vector<4x8xi1> to vector<4x8xi32>
    %38 = arith.sitofp %37 : vector<4x8xi32> to vector<4x8xf32>
    %c2_i32_13 = arith.constant 2 : i32
    %39 = vector.broadcast %c2_i32_13 : i32 to vector<4x8xi32>
    %40 = arith.muli %39, %32 : vector<4x8xi32>
    %c1_i32_14 = arith.constant 1 : i32
    %41 = vector.broadcast %c1_i32_14 : i32 to vector<4x8xi32>
    %42 = arith.addi %40, %41 : vector<4x8xi32>
    %43 = arith.cmpi eq, %33, %42 : vector<4x8xi32>
    %44 = arith.extui %43 : vector<4x8xi1> to vector<4x8xi32>
    %45 = arith.sitofp %44 : vector<4x8xi32> to vector<4x8xf32>
    %c0_15 = arith.constant 0 : index
    %c0_16 = arith.constant 0 : index
    %46 = vector.load %arg7[%c0_15, %c0_16] : memref<1x128xf32, #tpu.memory_space<vmem>>, vector<1x128xf32>
    %c0_i32_17 = arith.constant 0 : i32
    %c4_i32 = arith.constant 4 : i32
    %47 = arith.addi %c0_i32_17, %c4_i32 : i32
    %c1_i32_18 = arith.constant 1 : i32
    scf.for %arg14 = %c0_i32_17 to %47 step %c1_i32_18  : i32 {
      %c2_i32_158 = arith.constant 2 : i32
      %257 = arith.muli %c2_i32_158, %arg14 : i32
      %cst_159 = arith.constant 0.000000e+00 : f32
      %258 = vector.broadcast %cst_159 : f32 to vector<8x128xf32>
      %c0_i32_160 = arith.constant 0 : i32
      %259 = arith.addi %257, %c0_i32_160 : i32
      %260 = arith.index_cast %259 : i32 to index
      %c0_161 = arith.constant 0 : index
      %c0_162 = arith.constant 0 : index
      %261 = vector.load %arg12[%260, %c0_161, %c0_162] : memref<10x10x128xf32, #tpu.memory_space<vmem>>, vector<1x8x128xf32>
      %262 = vector.shape_cast %261 : vector<1x8x128xf32> to vector<8x128xf32>
      %263 = arith.truncf %262 : vector<8x128xf32> to vector<8x128xbf16>
      %c0_163 = arith.constant 0 : index
      %c0_164 = arith.constant 0 : index
      %c0_165 = arith.constant 0 : index
      %264 = vector.load %arg6[%c0_163, %c0_164, %c0_165] : memref<9x128x128xbf16, #tpu.memory_space<vmem>>, vector<1x128x128xbf16>
      %265 = vector.shape_cast %264 : vector<1x128x128xbf16> to vector<128x128xbf16>
      %cst_166 = arith.constant dense<0.000000e+00> : vector<8x128xf32>
      %266 = tpu.matmul %263, %265, %cst_166 {dimension_numbers = #tpu.dot_dimension_numbers<[1], [0], [0], [1], [0, 0, 1, 1], [], []>} : vector<8x128xbf16>, vector<128x128xbf16>, vector<8x128xf32> -> vector<8x128xf32>
      %267 = arith.addf %258, %266 : vector<8x128xf32>
      %c0_i32_167 = arith.constant 0 : i32
      %268 = arith.addi %257, %c0_i32_167 : i32
      %269 = arith.index_cast %268 : i32 to index
      %c1_168 = arith.constant 1 : index
      %c0_169 = arith.constant 0 : index
      %270 = vector.load %arg12[%269, %c1_168, %c0_169] : memref<10x10x128xf32, #tpu.memory_space<vmem>>, vector<1x8x128xf32>
      %271 = vector.shape_cast %270 : vector<1x8x128xf32> to vector<8x128xf32>
      %272 = arith.truncf %271 : vector<8x128xf32> to vector<8x128xbf16>
      %c1_170 = arith.constant 1 : index
      %c0_171 = arith.constant 0 : index
      %c0_172 = arith.constant 0 : index
      %273 = vector.load %arg6[%c1_170, %c0_171, %c0_172] : memref<9x128x128xbf16, #tpu.memory_space<vmem>>, vector<1x128x128xbf16>
      %274 = vector.shape_cast %273 : vector<1x128x128xbf16> to vector<128x128xbf16>
      %cst_173 = arith.constant dense<0.000000e+00> : vector<8x128xf32>
      %275 = tpu.matmul %272, %274, %cst_173 {dimension_numbers = #tpu.dot_dimension_numbers<[1], [0], [0], [1], [0, 0, 1, 1], [], []>} : vector<8x128xbf16>, vector<128x128xbf16>, vector<8x128xf32> -> vector<8x128xf32>
      %276 = arith.addf %267, %275 : vector<8x128xf32>
      %c0_i32_174 = arith.constant 0 : i32
      %277 = arith.addi %257, %c0_i32_174 : i32
      %278 = arith.index_cast %277 : i32 to index
      %c2_175 = arith.constant 2 : index
      %c0_176 = arith.constant 0 : index
      %279 = vector.load %arg12[%278, %c2_175, %c0_176] : memref<10x10x128xf32, #tpu.memory_space<vmem>>, vector<1x8x128xf32>
      %280 = vector.shape_cast %279 : vector<1x8x128xf32> to vector<8x128xf32>
      %281 = arith.truncf %280 : vector<8x128xf32> to vector<8x128xbf16>
      %c2_177 = arith.constant 2 : index
      %c0_178 = arith.constant 0 : index
      %c0_179 = arith.constant 0 : index
      %282 = vector.load %arg6[%c2_177, %c0_178, %c0_179] : memref<9x128x128xbf16, #tpu.memory_space<vmem>>, vector<1x128x128xbf16>
      %283 = vector.shape_cast %282 : vector<1x128x128xbf16> to vector<128x128xbf16>
      %cst_180 = arith.constant dense<0.000000e+00> : vector<8x128xf32>
      %284 = tpu.matmul %281, %283, %cst_180 {dimension_numbers = #tpu.dot_dimension_numbers<[1], [0], [0], [1], [0, 0, 1, 1], [], []>} : vector<8x128xbf16>, vector<128x128xbf16>, vector<8x128xf32> -> vector<8x128xf32>
      %285 = arith.addf %276, %284 : vector<8x128xf32>
      %c1_i32_181 = arith.constant 1 : i32
      %286 = arith.addi %257, %c1_i32_181 : i32
      %287 = arith.index_cast %286 : i32 to index
      %c0_182 = arith.constant 0 : index
      %c0_183 = arith.constant 0 : index
      %288 = vector.load %arg12[%287, %c0_182, %c0_183] : memref<10x10x128xf32, #tpu.memory_space<vmem>>, vector<1x8x128xf32>
      %289 = vector.shape_cast %288 : vector<1x8x128xf32> to vector<8x128xf32>
      %290 = arith.truncf %289 : vector<8x128xf32> to vector<8x128xbf16>
      %c3_184 = arith.constant 3 : index
      %c0_185 = arith.constant 0 : index
      %c0_186 = arith.constant 0 : index
      %291 = vector.load %arg6[%c3_184, %c0_185, %c0_186] : memref<9x128x128xbf16, #tpu.memory_space<vmem>>, vector<1x128x128xbf16>
      %292 = vector.shape_cast %291 : vector<1x128x128xbf16> to vector<128x128xbf16>
      %cst_187 = arith.constant dense<0.000000e+00> : vector<8x128xf32>
      %293 = tpu.matmul %290, %292, %cst_187 {dimension_numbers = #tpu.dot_dimension_numbers<[1], [0], [0], [1], [0, 0, 1, 1], [], []>} : vector<8x128xbf16>, vector<128x128xbf16>, vector<8x128xf32> -> vector<8x128xf32>
      %294 = arith.addf %285, %293 : vector<8x128xf32>
      %c1_i32_188 = arith.constant 1 : i32
      %295 = arith.addi %257, %c1_i32_188 : i32
      %296 = arith.index_cast %295 : i32 to index
      %c1_189 = arith.constant 1 : index
      %c0_190 = arith.constant 0 : index
      %297 = vector.load %arg12[%296, %c1_189, %c0_190] : memref<10x10x128xf32, #tpu.memory_space<vmem>>, vector<1x8x128xf32>
      %298 = vector.shape_cast %297 : vector<1x8x128xf32> to vector<8x128xf32>
      %299 = arith.truncf %298 : vector<8x128xf32> to vector<8x128xbf16>
      %c4_191 = arith.constant 4 : index
      %c0_192 = arith.constant 0 : index
      %c0_193 = arith.constant 0 : index
      %300 = vector.load %arg6[%c4_191, %c0_192, %c0_193] : memref<9x128x128xbf16, #tpu.memory_space<vmem>>, vector<1x128x128xbf16>
      %301 = vector.shape_cast %300 : vector<1x128x128xbf16> to vector<128x128xbf16>
      %cst_194 = arith.constant dense<0.000000e+00> : vector<8x128xf32>
      %302 = tpu.matmul %299, %301, %cst_194 {dimension_numbers = #tpu.dot_dimension_numbers<[1], [0], [0], [1], [0, 0, 1, 1], [], []>} : vector<8x128xbf16>, vector<128x128xbf16>, vector<8x128xf32> -> vector<8x128xf32>
      %303 = arith.addf %294, %302 : vector<8x128xf32>
      %c1_i32_195 = arith.constant 1 : i32
      %304 = arith.addi %257, %c1_i32_195 : i32
      %305 = arith.index_cast %304 : i32 to index
      %c2_196 = arith.constant 2 : index
      %c0_197 = arith.constant 0 : index
      %306 = vector.load %arg12[%305, %c2_196, %c0_197] : memref<10x10x128xf32, #tpu.memory_space<vmem>>, vector<1x8x128xf32>
      %307 = vector.shape_cast %306 : vector<1x8x128xf32> to vector<8x128xf32>
      %308 = arith.truncf %307 : vector<8x128xf32> to vector<8x128xbf16>
      %c5_198 = arith.constant 5 : index
      %c0_199 = arith.constant 0 : index
      %c0_200 = arith.constant 0 : index
      %309 = vector.load %arg6[%c5_198, %c0_199, %c0_200] : memref<9x128x128xbf16, #tpu.memory_space<vmem>>, vector<1x128x128xbf16>
      %310 = vector.shape_cast %309 : vector<1x128x128xbf16> to vector<128x128xbf16>
      %cst_201 = arith.constant dense<0.000000e+00> : vector<8x128xf32>
      %311 = tpu.matmul %308, %310, %cst_201 {dimension_numbers = #tpu.dot_dimension_numbers<[1], [0], [0], [1], [0, 0, 1, 1], [], []>} : vector<8x128xbf16>, vector<128x128xbf16>, vector<8x128xf32> -> vector<8x128xf32>
      %312 = arith.addf %303, %311 : vector<8x128xf32>
      %c2_i32_202 = arith.constant 2 : i32
      %313 = arith.addi %257, %c2_i32_202 : i32
      %314 = arith.index_cast %313 : i32 to index
      %c0_203 = arith.constant 0 : index
      %c0_204 = arith.constant 0 : index
      %315 = vector.load %arg12[%314, %c0_203, %c0_204] : memref<10x10x128xf32, #tpu.memory_space<vmem>>, vector<1x8x128xf32>
      %316 = vector.shape_cast %315 : vector<1x8x128xf32> to vector<8x128xf32>
      %317 = arith.truncf %316 : vector<8x128xf32> to vector<8x128xbf16>
      %c6_205 = arith.constant 6 : index
      %c0_206 = arith.constant 0 : index
      %c0_207 = arith.constant 0 : index
      %318 = vector.load %arg6[%c6_205, %c0_206, %c0_207] : memref<9x128x128xbf16, #tpu.memory_space<vmem>>, vector<1x128x128xbf16>
      %319 = vector.shape_cast %318 : vector<1x128x128xbf16> to vector<128x128xbf16>
      %cst_208 = arith.constant dense<0.000000e+00> : vector<8x128xf32>
      %320 = tpu.matmul %317, %319, %cst_208 {dimension_numbers = #tpu.dot_dimension_numbers<[1], [0], [0], [1], [0, 0, 1, 1], [], []>} : vector<8x128xbf16>, vector<128x128xbf16>, vector<8x128xf32> -> vector<8x128xf32>
      %321 = arith.addf %312, %320 : vector<8x128xf32>
      %c2_i32_209 = arith.constant 2 : i32
      %322 = arith.addi %257, %c2_i32_209 : i32
      %323 = arith.index_cast %322 : i32 to index
      %c1_210 = arith.constant 1 : index
      %c0_211 = arith.constant 0 : index
      %324 = vector.load %arg12[%323, %c1_210, %c0_211] : memref<10x10x128xf32, #tpu.memory_space<vmem>>, vector<1x8x128xf32>
      %325 = vector.shape_cast %324 : vector<1x8x128xf32> to vector<8x128xf32>
      %326 = arith.truncf %325 : vector<8x128xf32> to vector<8x128xbf16>
      %c7_212 = arith.constant 7 : index
      %c0_213 = arith.constant 0 : index
      %c0_214 = arith.constant 0 : index
      %327 = vector.load %arg6[%c7_212, %c0_213, %c0_214] : memref<9x128x128xbf16, #tpu.memory_space<vmem>>, vector<1x128x128xbf16>
      %328 = vector.shape_cast %327 : vector<1x128x128xbf16> to vector<128x128xbf16>
      %cst_215 = arith.constant dense<0.000000e+00> : vector<8x128xf32>
      %329 = tpu.matmul %326, %328, %cst_215 {dimension_numbers = #tpu.dot_dimension_numbers<[1], [0], [0], [1], [0, 0, 1, 1], [], []>} : vector<8x128xbf16>, vector<128x128xbf16>, vector<8x128xf32> -> vector<8x128xf32>
      %330 = arith.addf %321, %329 : vector<8x128xf32>
      %c2_i32_216 = arith.constant 2 : i32
      %331 = arith.addi %257, %c2_i32_216 : i32
      %332 = arith.index_cast %331 : i32 to index
      %c2_217 = arith.constant 2 : index
      %c0_218 = arith.constant 0 : index
      %333 = vector.load %arg12[%332, %c2_217, %c0_218] : memref<10x10x128xf32, #tpu.memory_space<vmem>>, vector<1x8x128xf32>
      %334 = vector.shape_cast %333 : vector<1x8x128xf32> to vector<8x128xf32>
      %335 = arith.truncf %334 : vector<8x128xf32> to vector<8x128xbf16>
      %c8_219 = arith.constant 8 : index
      %c0_220 = arith.constant 0 : index
      %c0_221 = arith.constant 0 : index
      %336 = vector.load %arg6[%c8_219, %c0_220, %c0_221] : memref<9x128x128xbf16, #tpu.memory_space<vmem>>, vector<1x128x128xbf16>
      %337 = vector.shape_cast %336 : vector<1x128x128xbf16> to vector<128x128xbf16>
      %cst_222 = arith.constant dense<0.000000e+00> : vector<8x128xf32>
      %338 = tpu.matmul %335, %337, %cst_222 {dimension_numbers = #tpu.dot_dimension_numbers<[1], [0], [0], [1], [0, 0, 1, 1], [], []>} : vector<8x128xbf16>, vector<128x128xbf16>, vector<8x128xf32> -> vector<8x128xf32>
      %339 = arith.addf %330, %338 : vector<8x128xf32>
      %c2_i32_223 = arith.constant 2 : i32
      %340 = arith.muli %c2_i32_223, %arg14 : i32
      %c1_i32_224 = arith.constant 1 : i32
      %341 = arith.addi %340, %c1_i32_224 : i32
      %cst_225 = arith.constant 0.000000e+00 : f32
      %342 = vector.broadcast %cst_225 : f32 to vector<8x128xf32>
      %c0_i32_226 = arith.constant 0 : i32
      %343 = arith.addi %341, %c0_i32_226 : i32
      %344 = arith.index_cast %343 : i32 to index
      %c0_227 = arith.constant 0 : index
      %c0_228 = arith.constant 0 : index
      %345 = vector.load %arg12[%344, %c0_227, %c0_228] : memref<10x10x128xf32, #tpu.memory_space<vmem>>, vector<1x8x128xf32>
      %346 = vector.shape_cast %345 : vector<1x8x128xf32> to vector<8x128xf32>
      %347 = arith.truncf %346 : vector<8x128xf32> to vector<8x128xbf16>
      %c0_229 = arith.constant 0 : index
      %c0_230 = arith.constant 0 : index
      %c0_231 = arith.constant 0 : index
      %348 = vector.load %arg6[%c0_229, %c0_230, %c0_231] : memref<9x128x128xbf16, #tpu.memory_space<vmem>>, vector<1x128x128xbf16>
      %349 = vector.shape_cast %348 : vector<1x128x128xbf16> to vector<128x128xbf16>
      %cst_232 = arith.constant dense<0.000000e+00> : vector<8x128xf32>
      %350 = tpu.matmul %347, %349, %cst_232 {dimension_numbers = #tpu.dot_dimension_numbers<[1], [0], [0], [1], [0, 0, 1, 1], [], []>} : vector<8x128xbf16>, vector<128x128xbf16>, vector<8x128xf32> -> vector<8x128xf32>
      %351 = arith.addf %342, %350 : vector<8x128xf32>
      %c0_i32_233 = arith.constant 0 : i32
      %352 = arith.addi %341, %c0_i32_233 : i32
      %353 = arith.index_cast %352 : i32 to index
      %c1_234 = arith.constant 1 : index
      %c0_235 = arith.constant 0 : index
      %354 = vector.load %arg12[%353, %c1_234, %c0_235] : memref<10x10x128xf32, #tpu.memory_space<vmem>>, vector<1x8x128xf32>
      %355 = vector.shape_cast %354 : vector<1x8x128xf32> to vector<8x128xf32>
      %356 = arith.truncf %355 : vector<8x128xf32> to vector<8x128xbf16>
      %c1_236 = arith.constant 1 : index
      %c0_237 = arith.constant 0 : index
      %c0_238 = arith.constant 0 : index
      %357 = vector.load %arg6[%c1_236, %c0_237, %c0_238] : memref<9x128x128xbf16, #tpu.memory_space<vmem>>, vector<1x128x128xbf16>
      %358 = vector.shape_cast %357 : vector<1x128x128xbf16> to vector<128x128xbf16>
      %cst_239 = arith.constant dense<0.000000e+00> : vector<8x128xf32>
      %359 = tpu.matmul %356, %358, %cst_239 {dimension_numbers = #tpu.dot_dimension_numbers<[1], [0], [0], [1], [0, 0, 1, 1], [], []>} : vector<8x128xbf16>, vector<128x128xbf16>, vector<8x128xf32> -> vector<8x128xf32>
      %360 = arith.addf %351, %359 : vector<8x128xf32>
      %c0_i32_240 = arith.constant 0 : i32
      %361 = arith.addi %341, %c0_i32_240 : i32
      %362 = arith.index_cast %361 : i32 to index
      %c2_241 = arith.constant 2 : index
      %c0_242 = arith.constant 0 : index
      %363 = vector.load %arg12[%362, %c2_241, %c0_242] : memref<10x10x128xf32, #tpu.memory_space<vmem>>, vector<1x8x128xf32>
      %364 = vector.shape_cast %363 : vector<1x8x128xf32> to vector<8x128xf32>
      %365 = arith.truncf %364 : vector<8x128xf32> to vector<8x128xbf16>
      %c2_243 = arith.constant 2 : index
      %c0_244 = arith.constant 0 : index
      %c0_245 = arith.constant 0 : index
      %366 = vector.load %arg6[%c2_243, %c0_244, %c0_245] : memref<9x128x128xbf16, #tpu.memory_space<vmem>>, vector<1x128x128xbf16>
      %367 = vector.shape_cast %366 : vector<1x128x128xbf16> to vector<128x128xbf16>
      %cst_246 = arith.constant dense<0.000000e+00> : vector<8x128xf32>
      %368 = tpu.matmul %365, %367, %cst_246 {dimension_numbers = #tpu.dot_dimension_numbers<[1], [0], [0], [1], [0, 0, 1, 1], [], []>} : vector<8x128xbf16>, vector<128x128xbf16>, vector<8x128xf32> -> vector<8x128xf32>
      %369 = arith.addf %360, %368 : vector<8x128xf32>
      %c1_i32_247 = arith.constant 1 : i32
      %370 = arith.addi %341, %c1_i32_247 : i32
      %371 = arith.index_cast %370 : i32 to index
      %c0_248 = arith.constant 0 : index
      %c0_249 = arith.constant 0 : index
      %372 = vector.load %arg12[%371, %c0_248, %c0_249] : memref<10x10x128xf32, #tpu.memory_space<vmem>>, vector<1x8x128xf32>
      %373 = vector.shape_cast %372 : vector<1x8x128xf32> to vector<8x128xf32>
      %374 = arith.truncf %373 : vector<8x128xf32> to vector<8x128xbf16>
      %c3_250 = arith.constant 3 : index
      %c0_251 = arith.constant 0 : index
      %c0_252 = arith.constant 0 : index
      %375 = vector.load %arg6[%c3_250, %c0_251, %c0_252] : memref<9x128x128xbf16, #tpu.memory_space<vmem>>, vector<1x128x128xbf16>
      %376 = vector.shape_cast %375 : vector<1x128x128xbf16> to vector<128x128xbf16>
      %cst_253 = arith.constant dense<0.000000e+00> : vector<8x128xf32>
      %377 = tpu.matmul %374, %376, %cst_253 {dimension_numbers = #tpu.dot_dimension_numbers<[1], [0], [0], [1], [0, 0, 1, 1], [], []>} : vector<8x128xbf16>, vector<128x128xbf16>, vector<8x128xf32> -> vector<8x128xf32>
      %378 = arith.addf %369, %377 : vector<8x128xf32>
      %c1_i32_254 = arith.constant 1 : i32
      %379 = arith.addi %341, %c1_i32_254 : i32
      %380 = arith.index_cast %379 : i32 to index
      %c1_255 = arith.constant 1 : index
      %c0_256 = arith.constant 0 : index
      %381 = vector.load %arg12[%380, %c1_255, %c0_256] : memref<10x10x128xf32, #tpu.memory_space<vmem>>, vector<1x8x128xf32>
      %382 = vector.shape_cast %381 : vector<1x8x128xf32> to vector<8x128xf32>
      %383 = arith.truncf %382 : vector<8x128xf32> to vector<8x128xbf16>
      %c4_257 = arith.constant 4 : index
      %c0_258 = arith.constant 0 : index
      %c0_259 = arith.constant 0 : index
      %384 = vector.load %arg6[%c4_257, %c0_258, %c0_259] : memref<9x128x128xbf16, #tpu.memory_space<vmem>>, vector<1x128x128xbf16>
      %385 = vector.shape_cast %384 : vector<1x128x128xbf16> to vector<128x128xbf16>
      %cst_260 = arith.constant dense<0.000000e+00> : vector<8x128xf32>
      %386 = tpu.matmul %383, %385, %cst_260 {dimension_numbers = #tpu.dot_dimension_numbers<[1], [0], [0], [1], [0, 0, 1, 1], [], []>} : vector<8x128xbf16>, vector<128x128xbf16>, vector<8x128xf32> -> vector<8x128xf32>
      %387 = arith.addf %378, %386 : vector<8x128xf32>
      %c1_i32_261 = arith.constant 1 : i32
      %388 = arith.addi %341, %c1_i32_261 : i32
      %389 = arith.index_cast %388 : i32 to index
      %c2_262 = arith.constant 2 : index
      %c0_263 = arith.constant 0 : index
      %390 = vector.load %arg12[%389, %c2_262, %c0_263] : memref<10x10x128xf32, #tpu.memory_space<vmem>>, vector<1x8x128xf32>
      %391 = vector.shape_cast %390 : vector<1x8x128xf32> to vector<8x128xf32>
      %392 = arith.truncf %391 : vector<8x128xf32> to vector<8x128xbf16>
      %c5_264 = arith.constant 5 : index
      %c0_265 = arith.constant 0 : index
      %c0_266 = arith.constant 0 : index
      %393 = vector.load %arg6[%c5_264, %c0_265, %c0_266] : memref<9x128x128xbf16, #tpu.memory_space<vmem>>, vector<1x128x128xbf16>
      %394 = vector.shape_cast %393 : vector<1x128x128xbf16> to vector<128x128xbf16>
      %cst_267 = arith.constant dense<0.000000e+00> : vector<8x128xf32>
      %395 = tpu.matmul %392, %394, %cst_267 {dimension_numbers = #tpu.dot_dimension_numbers<[1], [0], [0], [1], [0, 0, 1, 1], [], []>} : vector<8x128xbf16>, vector<128x128xbf16>, vector<8x128xf32> -> vector<8x128xf32>
      %396 = arith.addf %387, %395 : vector<8x128xf32>
      %c2_i32_268 = arith.constant 2 : i32
      %397 = arith.addi %341, %c2_i32_268 : i32
      %398 = arith.index_cast %397 : i32 to index
      %c0_269 = arith.constant 0 : index
      %c0_270 = arith.constant 0 : index
      %399 = vector.load %arg12[%398, %c0_269, %c0_270] : memref<10x10x128xf32, #tpu.memory_space<vmem>>, vector<1x8x128xf32>
      %400 = vector.shape_cast %399 : vector<1x8x128xf32> to vector<8x128xf32>
      %401 = arith.truncf %400 : vector<8x128xf32> to vector<8x128xbf16>
      %c6_271 = arith.constant 6 : index
      %c0_272 = arith.constant 0 : index
      %c0_273 = arith.constant 0 : index
      %402 = vector.load %arg6[%c6_271, %c0_272, %c0_273] : memref<9x128x128xbf16, #tpu.memory_space<vmem>>, vector<1x128x128xbf16>
      %403 = vector.shape_cast %402 : vector<1x128x128xbf16> to vector<128x128xbf16>
      %cst_274 = arith.constant dense<0.000000e+00> : vector<8x128xf32>
      %404 = tpu.matmul %401, %403, %cst_274 {dimension_numbers = #tpu.dot_dimension_numbers<[1], [0], [0], [1], [0, 0, 1, 1], [], []>} : vector<8x128xbf16>, vector<128x128xbf16>, vector<8x128xf32> -> vector<8x128xf32>
      %405 = arith.addf %396, %404 : vector<8x128xf32>
      %c2_i32_275 = arith.constant 2 : i32
      %406 = arith.addi %341, %c2_i32_275 : i32
      %407 = arith.index_cast %406 : i32 to index
      %c1_276 = arith.constant 1 : index
      %c0_277 = arith.constant 0 : index
      %408 = vector.load %arg12[%407, %c1_276, %c0_277] : memref<10x10x128xf32, #tpu.memory_space<vmem>>, vector<1x8x128xf32>
      %409 = vector.shape_cast %408 : vector<1x8x128xf32> to vector<8x128xf32>
      %410 = arith.truncf %409 : vector<8x128xf32> to vector<8x128xbf16>
      %c7_278 = arith.constant 7 : index
      %c0_279 = arith.constant 0 : index
      %c0_280 = arith.constant 0 : index
      %411 = vector.load %arg6[%c7_278, %c0_279, %c0_280] : memref<9x128x128xbf16, #tpu.memory_space<vmem>>, vector<1x128x128xbf16>
      %412 = vector.shape_cast %411 : vector<1x128x128xbf16> to vector<128x128xbf16>
      %cst_281 = arith.constant dense<0.000000e+00> : vector<8x128xf32>
      %413 = tpu.matmul %410, %412, %cst_281 {dimension_numbers = #tpu.dot_dimension_numbers<[1], [0], [0], [1], [0, 0, 1, 1], [], []>} : vector<8x128xbf16>, vector<128x128xbf16>, vector<8x128xf32> -> vector<8x128xf32>
      %414 = arith.addf %405, %413 : vector<8x128xf32>
      %c2_i32_282 = arith.constant 2 : i32
      %415 = arith.addi %341, %c2_i32_282 : i32
      %416 = arith.index_cast %415 : i32 to index
      %c2_283 = arith.constant 2 : index
      %c0_284 = arith.constant 0 : index
      %417 = vector.load %arg12[%416, %c2_283, %c0_284] : memref<10x10x128xf32, #tpu.memory_space<vmem>>, vector<1x8x128xf32>
      %418 = vector.shape_cast %417 : vector<1x8x128xf32> to vector<8x128xf32>
      %419 = arith.truncf %418 : vector<8x128xf32> to vector<8x128xbf16>
      %c8_285 = arith.constant 8 : index
      %c0_286 = arith.constant 0 : index
      %c0_287 = arith.constant 0 : index
      %420 = vector.load %arg6[%c8_285, %c0_286, %c0_287] : memref<9x128x128xbf16, #tpu.memory_space<vmem>>, vector<1x128x128xbf16>
      %421 = vector.shape_cast %420 : vector<1x128x128xbf16> to vector<128x128xbf16>
      %cst_288 = arith.constant dense<0.000000e+00> : vector<8x128xf32>
      %422 = tpu.matmul %419, %421, %cst_288 {dimension_numbers = #tpu.dot_dimension_numbers<[1], [0], [0], [1], [0, 0, 1, 1], [], []>} : vector<8x128xbf16>, vector<128x128xbf16>, vector<8x128xf32> -> vector<8x128xf32>
      %423 = arith.addf %414, %422 : vector<8x128xf32>
      %424 = arith.maximumf %339, %423 : vector<8x128xf32>
      %cst_289 = arith.constant dense<0.000000e+00> : vector<4x128xf32>
      %425 = tpu.matmul %38, %424, %cst_289 {dimension_numbers = #tpu.dot_dimension_numbers<[1], [0], [0], [1], [0, 0, 1, 1], [], []>} : vector<4x8xf32>, vector<8x128xf32>, vector<4x128xf32> -> vector<4x128xf32>
      %cst_290 = arith.constant dense<0.000000e+00> : vector<4x128xf32>
      %426 = tpu.matmul %45, %424, %cst_290 {dimension_numbers = #tpu.dot_dimension_numbers<[1], [0], [0], [1], [0, 0, 1, 1], [], []>} : vector<4x8xf32>, vector<8x128xf32>, vector<4x128xf32> -> vector<4x128xf32>
      %427 = arith.maximumf %425, %426 : vector<4x128xf32>
      %428 = vector.broadcast %46 : vector<1x128xf32> to vector<4x128xf32>
      %429 = arith.addf %427, %428 : vector<4x128xf32>
      %cst_291 = arith.constant 0.000000e+00 : f32
      %430 = vector.broadcast %cst_291 : f32 to vector<4x128xf32>
      %431 = arith.maximumf %429, %430 : vector<4x128xf32>
      %432 = arith.index_cast %arg14 : i32 to index
      %c0_292 = arith.constant 0 : index
      %c0_293 = arith.constant 0 : index
      %433 = vector.load %arg13[%432, %c0_292, %c0_293] : memref<4x4x128xf32, #tpu.memory_space<vmem>>, vector<1x4x128xf32>
      %434 = vector.shape_cast %433 : vector<1x4x128xf32> to vector<4x128xf32>
      %435 = vector.shape_cast %431 : vector<4x128xf32> to vector<1x4x128xf32>
      tpu.vector_store %arg13[%432, %c0_292, %c0_293], %435 {strides = array<i32>} : memref<4x4x128xf32, #tpu.memory_space<vmem>>, vector<1x4x128xf32>,
    }
    %c4_i32_19 = arith.constant 4 : i32
    %48 = tpu.iota {dimensions = array<i32: 0>} : vector<1x2xi32>
    %49 = tpu.iota {dimensions = array<i32: 1>} : vector<1x2xi32>
    %c2_i32_20 = arith.constant 2 : i32
    %50 = vector.broadcast %c2_i32_20 : i32 to vector<1x2xi32>
    %51 = arith.muli %50, %48 : vector<1x2xi32>
    %52 = arith.cmpi eq, %49, %51 : vector<1x2xi32>
    %53 = arith.extui %52 : vector<1x2xi1> to vector<1x2xi32>
    %54 = arith.sitofp %53 : vector<1x2xi32> to vector<1x2xf32>
    %c2_i32_21 = arith.constant 2 : i32
    %55 = vector.broadcast %c2_i32_21 : i32 to vector<1x2xi32>
    %56 = arith.muli %55, %48 : vector<1x2xi32>
    %c1_i32_22 = arith.constant 1 : i32
    %57 = vector.broadcast %c1_i32_22 : i32 to vector<1x2xi32>
    %58 = arith.addi %56, %57 : vector<1x2xi32>
    %59 = arith.cmpi eq, %49, %58 : vector<1x2xi32>
    %60 = arith.extui %59 : vector<1x2xi1> to vector<1x2xi32>
    %61 = arith.sitofp %60 : vector<1x2xi32> to vector<1x2xf32>
    %c0_23 = arith.constant 0 : index
    %c0_24 = arith.constant 0 : index
    %62 = vector.load %arg9[%c0_23, %c0_24] : memref<1x128xf32, #tpu.memory_space<vmem>>, vector<1x128xf32>
    %c0_i32_25 = arith.constant 0 : i32
    %c2_i32_26 = arith.constant 2 : i32
    %63 = arith.muli %c2_i32_26, %c0_i32_25 : i32
    %cst = arith.constant 0.000000e+00 : f32
    %64 = vector.broadcast %cst : f32 to vector<2x128xf32>
    %c0_i32_27 = arith.constant 0 : i32
    %65 = arith.addi %63, %c0_i32_27 : i32
    %66 = arith.index_cast %65 : i32 to index
    %c0_28 = arith.constant 0 : index
    %c0_29 = arith.constant 0 : index
    %67 = vector.load %arg13[%66, %c0_28, %c0_29] : memref<4x4x128xf32, #tpu.memory_space<vmem>>, vector<1x2x128xf32>
    %68 = vector.shape_cast %67 : vector<1x2x128xf32> to vector<2x128xf32>
    %69 = arith.truncf %68 : vector<2x128xf32> to vector<2x128xbf16>
    %c0_30 = arith.constant 0 : index
    %c0_31 = arith.constant 0 : index
    %c0_32 = arith.constant 0 : index
    %70 = vector.load %arg8[%c0_30, %c0_31, %c0_32] : memref<9x128x128xbf16, #tpu.memory_space<vmem>>, vector<1x128x128xbf16>
    %71 = vector.shape_cast %70 : vector<1x128x128xbf16> to vector<128x128xbf16>
    %cst_33 = arith.constant dense<0.000000e+00> : vector<2x128xf32>
    %72 = tpu.matmul %69, %71, %cst_33 {dimension_numbers = #tpu.dot_dimension_numbers<[1], [0], [0], [1], [0, 0, 1, 1], [], []>} : vector<2x128xbf16>, vector<128x128xbf16>, vector<2x128xf32> -> vector<2x128xf32>
    %73 = arith.addf %64, %72 : vector<2x128xf32>
    %c0_i32_34 = arith.constant 0 : i32
    %74 = arith.addi %63, %c0_i32_34 : i32
    %75 = arith.index_cast %74 : i32 to index
    %c1 = arith.constant 1 : index
    %c0_35 = arith.constant 0 : index
    %76 = vector.load %arg13[%75, %c1, %c0_35] : memref<4x4x128xf32, #tpu.memory_space<vmem>>, vector<1x2x128xf32>
    %77 = vector.shape_cast %76 : vector<1x2x128xf32> to vector<2x128xf32>
    %78 = arith.truncf %77 : vector<2x128xf32> to vector<2x128xbf16>
    %c1_36 = arith.constant 1 : index
    %c0_37 = arith.constant 0 : index
    %c0_38 = arith.constant 0 : index
    %79 = vector.load %arg8[%c1_36, %c0_37, %c0_38] : memref<9x128x128xbf16, #tpu.memory_space<vmem>>, vector<1x128x128xbf16>
    %80 = vector.shape_cast %79 : vector<1x128x128xbf16> to vector<128x128xbf16>
    %cst_39 = arith.constant dense<0.000000e+00> : vector<2x128xf32>
    %81 = tpu.matmul %78, %80, %cst_39 {dimension_numbers = #tpu.dot_dimension_numbers<[1], [0], [0], [1], [0, 0, 1, 1], [], []>} : vector<2x128xbf16>, vector<128x128xbf16>, vector<2x128xf32> -> vector<2x128xf32>
    %82 = arith.addf %73, %81 : vector<2x128xf32>
    %c0_i32_40 = arith.constant 0 : i32
    %83 = arith.addi %63, %c0_i32_40 : i32
    %84 = arith.index_cast %83 : i32 to index
    %c2 = arith.constant 2 : index
    %c0_41 = arith.constant 0 : index
    %85 = vector.load %arg13[%84, %c2, %c0_41] : memref<4x4x128xf32, #tpu.memory_space<vmem>>, vector<1x2x128xf32>
    %86 = vector.shape_cast %85 : vector<1x2x128xf32> to vector<2x128xf32>
    %87 = arith.truncf %86 : vector<2x128xf32> to vector<2x128xbf16>
    %c2_42 = arith.constant 2 : index
    %c0_43 = arith.constant 0 : index
    %c0_44 = arith.constant 0 : index
    %88 = vector.load %arg8[%c2_42, %c0_43, %c0_44] : memref<9x128x128xbf16, #tpu.memory_space<vmem>>, vector<1x128x128xbf16>
    %89 = vector.shape_cast %88 : vector<1x128x128xbf16> to vector<128x128xbf16>
    %cst_45 = arith.constant dense<0.000000e+00> : vector<2x128xf32>
    %90 = tpu.matmul %87, %89, %cst_45 {dimension_numbers = #tpu.dot_dimension_numbers<[1], [0], [0], [1], [0, 0, 1, 1], [], []>} : vector<2x128xbf16>, vector<128x128xbf16>, vector<2x128xf32> -> vector<2x128xf32>
    %91 = arith.addf %82, %90 : vector<2x128xf32>
    %c1_i32_46 = arith.constant 1 : i32
    %92 = arith.addi %63, %c1_i32_46 : i32
    %93 = arith.index_cast %92 : i32 to index
    %c0_47 = arith.constant 0 : index
    %c0_48 = arith.constant 0 : index
    %94 = vector.load %arg13[%93, %c0_47, %c0_48] : memref<4x4x128xf32, #tpu.memory_space<vmem>>, vector<1x2x128xf32>
    %95 = vector.shape_cast %94 : vector<1x2x128xf32> to vector<2x128xf32>
    %96 = arith.truncf %95 : vector<2x128xf32> to vector<2x128xbf16>
    %c3 = arith.constant 3 : index
    %c0_49 = arith.constant 0 : index
    %c0_50 = arith.constant 0 : index
    %97 = vector.load %arg8[%c3, %c0_49, %c0_50] : memref<9x128x128xbf16, #tpu.memory_space<vmem>>, vector<1x128x128xbf16>
    %98 = vector.shape_cast %97 : vector<1x128x128xbf16> to vector<128x128xbf16>
    %cst_51 = arith.constant dense<0.000000e+00> : vector<2x128xf32>
    %99 = tpu.matmul %96, %98, %cst_51 {dimension_numbers = #tpu.dot_dimension_numbers<[1], [0], [0], [1], [0, 0, 1, 1], [], []>} : vector<2x128xbf16>, vector<128x128xbf16>, vector<2x128xf32> -> vector<2x128xf32>
    %100 = arith.addf %91, %99 : vector<2x128xf32>
    %c1_i32_52 = arith.constant 1 : i32
    %101 = arith.addi %63, %c1_i32_52 : i32
    %102 = arith.index_cast %101 : i32 to index
    %c1_53 = arith.constant 1 : index
    %c0_54 = arith.constant 0 : index
    %103 = vector.load %arg13[%102, %c1_53, %c0_54] : memref<4x4x128xf32, #tpu.memory_space<vmem>>, vector<1x2x128xf32>
    %104 = vector.shape_cast %103 : vector<1x2x128xf32> to vector<2x128xf32>
    %105 = arith.truncf %104 : vector<2x128xf32> to vector<2x128xbf16>
    %c4 = arith.constant 4 : index
    %c0_55 = arith.constant 0 : index
    %c0_56 = arith.constant 0 : index
    %106 = vector.load %arg8[%c4, %c0_55, %c0_56] : memref<9x128x128xbf16, #tpu.memory_space<vmem>>, vector<1x128x128xbf16>
    %107 = vector.shape_cast %106 : vector<1x128x128xbf16> to vector<128x128xbf16>
    %cst_57 = arith.constant dense<0.000000e+00> : vector<2x128xf32>
    %108 = tpu.matmul %105, %107, %cst_57 {dimension_numbers = #tpu.dot_dimension_numbers<[1], [0], [0], [1], [0, 0, 1, 1], [], []>} : vector<2x128xbf16>, vector<128x128xbf16>, vector<2x128xf32> -> vector<2x128xf32>
    %109 = arith.addf %100, %108 : vector<2x128xf32>
    %c1_i32_58 = arith.constant 1 : i32
    %110 = arith.addi %63, %c1_i32_58 : i32
    %111 = arith.index_cast %110 : i32 to index
    %c2_59 = arith.constant 2 : index
    %c0_60 = arith.constant 0 : index
    %112 = vector.load %arg13[%111, %c2_59, %c0_60] : memref<4x4x128xf32, #tpu.memory_space<vmem>>, vector<1x2x128xf32>
    %113 = vector.shape_cast %112 : vector<1x2x128xf32> to vector<2x128xf32>
    %114 = arith.truncf %113 : vector<2x128xf32> to vector<2x128xbf16>
    %c5 = arith.constant 5 : index
    %c0_61 = arith.constant 0 : index
    %c0_62 = arith.constant 0 : index
    %115 = vector.load %arg8[%c5, %c0_61, %c0_62] : memref<9x128x128xbf16, #tpu.memory_space<vmem>>, vector<1x128x128xbf16>
    %116 = vector.shape_cast %115 : vector<1x128x128xbf16> to vector<128x128xbf16>
    %cst_63 = arith.constant dense<0.000000e+00> : vector<2x128xf32>
    %117 = tpu.matmul %114, %116, %cst_63 {dimension_numbers = #tpu.dot_dimension_numbers<[1], [0], [0], [1], [0, 0, 1, 1], [], []>} : vector<2x128xbf16>, vector<128x128xbf16>, vector<2x128xf32> -> vector<2x128xf32>
    %118 = arith.addf %109, %117 : vector<2x128xf32>
    %c2_i32_64 = arith.constant 2 : i32
    %119 = arith.addi %63, %c2_i32_64 : i32
    %120 = arith.index_cast %119 : i32 to index
    %c0_65 = arith.constant 0 : index
    %c0_66 = arith.constant 0 : index
    %121 = vector.load %arg13[%120, %c0_65, %c0_66] : memref<4x4x128xf32, #tpu.memory_space<vmem>>, vector<1x2x128xf32>
    %122 = vector.shape_cast %121 : vector<1x2x128xf32> to vector<2x128xf32>
    %123 = arith.truncf %122 : vector<2x128xf32> to vector<2x128xbf16>
    %c6 = arith.constant 6 : index
    %c0_67 = arith.constant 0 : index
    %c0_68 = arith.constant 0 : index
    %124 = vector.load %arg8[%c6, %c0_67, %c0_68] : memref<9x128x128xbf16, #tpu.memory_space<vmem>>, vector<1x128x128xbf16>
    %125 = vector.shape_cast %124 : vector<1x128x128xbf16> to vector<128x128xbf16>
    %cst_69 = arith.constant dense<0.000000e+00> : vector<2x128xf32>
    %126 = tpu.matmul %123, %125, %cst_69 {dimension_numbers = #tpu.dot_dimension_numbers<[1], [0], [0], [1], [0, 0, 1, 1], [], []>} : vector<2x128xbf16>, vector<128x128xbf16>, vector<2x128xf32> -> vector<2x128xf32>
    %127 = arith.addf %118, %126 : vector<2x128xf32>
    %c2_i32_70 = arith.constant 2 : i32
    %128 = arith.addi %63, %c2_i32_70 : i32
    %129 = arith.index_cast %128 : i32 to index
    %c1_71 = arith.constant 1 : index
    %c0_72 = arith.constant 0 : index
    %130 = vector.load %arg13[%129, %c1_71, %c0_72] : memref<4x4x128xf32, #tpu.memory_space<vmem>>, vector<1x2x128xf32>
    %131 = vector.shape_cast %130 : vector<1x2x128xf32> to vector<2x128xf32>
    %132 = arith.truncf %131 : vector<2x128xf32> to vector<2x128xbf16>
    %c7 = arith.constant 7 : index
    %c0_73 = arith.constant 0 : index
    %c0_74 = arith.constant 0 : index
    %133 = vector.load %arg8[%c7, %c0_73, %c0_74] : memref<9x128x128xbf16, #tpu.memory_space<vmem>>, vector<1x128x128xbf16>
    %134 = vector.shape_cast %133 : vector<1x128x128xbf16> to vector<128x128xbf16>
    %cst_75 = arith.constant dense<0.000000e+00> : vector<2x128xf32>
    %135 = tpu.matmul %132, %134, %cst_75 {dimension_numbers = #tpu.dot_dimension_numbers<[1], [0], [0], [1], [0, 0, 1, 1], [], []>} : vector<2x128xbf16>, vector<128x128xbf16>, vector<2x128xf32> -> vector<2x128xf32>
    %136 = arith.addf %127, %135 : vector<2x128xf32>
    %c2_i32_76 = arith.constant 2 : i32
    %137 = arith.addi %63, %c2_i32_76 : i32
    %138 = arith.index_cast %137 : i32 to index
    %c2_77 = arith.constant 2 : index
    %c0_78 = arith.constant 0 : index
    %139 = vector.load %arg13[%138, %c2_77, %c0_78] : memref<4x4x128xf32, #tpu.memory_space<vmem>>, vector<1x2x128xf32>
    %140 = vector.shape_cast %139 : vector<1x2x128xf32> to vector<2x128xf32>
    %141 = arith.truncf %140 : vector<2x128xf32> to vector<2x128xbf16>
    %c8 = arith.constant 8 : index
    %c0_79 = arith.constant 0 : index
    %c0_80 = arith.constant 0 : index
    %142 = vector.load %arg8[%c8, %c0_79, %c0_80] : memref<9x128x128xbf16, #tpu.memory_space<vmem>>, vector<1x128x128xbf16>
    %143 = vector.shape_cast %142 : vector<1x128x128xbf16> to vector<128x128xbf16>
    %cst_81 = arith.constant dense<0.000000e+00> : vector<2x128xf32>
    %144 = tpu.matmul %141, %143, %cst_81 {dimension_numbers = #tpu.dot_dimension_numbers<[1], [0], [0], [1], [0, 0, 1, 1], [], []>} : vector<2x128xbf16>, vector<128x128xbf16>, vector<2x128xf32> -> vector<2x128xf32>
    %145 = arith.addf %136, %144 : vector<2x128xf32>
    %c2_i32_82 = arith.constant 2 : i32
    %146 = arith.muli %c2_i32_82, %c0_i32_25 : i32
    %c1_i32_83 = arith.constant 1 : i32
    %147 = arith.addi %146, %c1_i32_83 : i32
    %cst_84 = arith.constant 0.000000e+00 : f32
    %148 = vector.broadcast %cst_84 : f32 to vector<2x128xf32>
    %c0_i32_85 = arith.constant 0 : i32
    %149 = arith.addi %147, %c0_i32_85 : i32
    %150 = arith.index_cast %149 : i32 to index
    %c0_86 = arith.constant 0 : index
    %c0_87 = arith.constant 0 : index
    %151 = vector.load %arg13[%150, %c0_86, %c0_87] : memref<4x4x128xf32, #tpu.memory_space<vmem>>, vector<1x2x128xf32>
    %152 = vector.shape_cast %151 : vector<1x2x128xf32> to vector<2x128xf32>
    %153 = arith.truncf %152 : vector<2x128xf32> to vector<2x128xbf16>
    %c0_88 = arith.constant 0 : index
    %c0_89 = arith.constant 0 : index
    %c0_90 = arith.constant 0 : index
    %154 = vector.load %arg8[%c0_88, %c0_89, %c0_90] : memref<9x128x128xbf16, #tpu.memory_space<vmem>>, vector<1x128x128xbf16>
    %155 = vector.shape_cast %154 : vector<1x128x128xbf16> to vector<128x128xbf16>
    %cst_91 = arith.constant dense<0.000000e+00> : vector<2x128xf32>
    %156 = tpu.matmul %153, %155, %cst_91 {dimension_numbers = #tpu.dot_dimension_numbers<[1], [0], [0], [1], [0, 0, 1, 1], [], []>} : vector<2x128xbf16>, vector<128x128xbf16>, vector<2x128xf32> -> vector<2x128xf32>
    %157 = arith.addf %148, %156 : vector<2x128xf32>
    %c0_i32_92 = arith.constant 0 : i32
    %158 = arith.addi %147, %c0_i32_92 : i32
    %159 = arith.index_cast %158 : i32 to index
    %c1_93 = arith.constant 1 : index
    %c0_94 = arith.constant 0 : index
    %160 = vector.load %arg13[%159, %c1_93, %c0_94] : memref<4x4x128xf32, #tpu.memory_space<vmem>>, vector<1x2x128xf32>
    %161 = vector.shape_cast %160 : vector<1x2x128xf32> to vector<2x128xf32>
    %162 = arith.truncf %161 : vector<2x128xf32> to vector<2x128xbf16>
    %c1_95 = arith.constant 1 : index
    %c0_96 = arith.constant 0 : index
    %c0_97 = arith.constant 0 : index
    %163 = vector.load %arg8[%c1_95, %c0_96, %c0_97] : memref<9x128x128xbf16, #tpu.memory_space<vmem>>, vector<1x128x128xbf16>
    %164 = vector.shape_cast %163 : vector<1x128x128xbf16> to vector<128x128xbf16>
    %cst_98 = arith.constant dense<0.000000e+00> : vector<2x128xf32>
    %165 = tpu.matmul %162, %164, %cst_98 {dimension_numbers = #tpu.dot_dimension_numbers<[1], [0], [0], [1], [0, 0, 1, 1], [], []>} : vector<2x128xbf16>, vector<128x128xbf16>, vector<2x128xf32> -> vector<2x128xf32>
    %166 = arith.addf %157, %165 : vector<2x128xf32>
    %c0_i32_99 = arith.constant 0 : i32
    %167 = arith.addi %147, %c0_i32_99 : i32
    %168 = arith.index_cast %167 : i32 to index
    %c2_100 = arith.constant 2 : index
    %c0_101 = arith.constant 0 : index
    %169 = vector.load %arg13[%168, %c2_100, %c0_101] : memref<4x4x128xf32, #tpu.memory_space<vmem>>, vector<1x2x128xf32>
    %170 = vector.shape_cast %169 : vector<1x2x128xf32> to vector<2x128xf32>
    %171 = arith.truncf %170 : vector<2x128xf32> to vector<2x128xbf16>
    %c2_102 = arith.constant 2 : index
    %c0_103 = arith.constant 0 : index
    %c0_104 = arith.constant 0 : index
    %172 = vector.load %arg8[%c2_102, %c0_103, %c0_104] : memref<9x128x128xbf16, #tpu.memory_space<vmem>>, vector<1x128x128xbf16>
    %173 = vector.shape_cast %172 : vector<1x128x128xbf16> to vector<128x128xbf16>
    %cst_105 = arith.constant dense<0.000000e+00> : vector<2x128xf32>
    %174 = tpu.matmul %171, %173, %cst_105 {dimension_numbers = #tpu.dot_dimension_numbers<[1], [0], [0], [1], [0, 0, 1, 1], [], []>} : vector<2x128xbf16>, vector<128x128xbf16>, vector<2x128xf32> -> vector<2x128xf32>
    %175 = arith.addf %166, %174 : vector<2x128xf32>
    %c1_i32_106 = arith.constant 1 : i32
    %176 = arith.addi %147, %c1_i32_106 : i32
    %177 = arith.index_cast %176 : i32 to index
    %c0_107 = arith.constant 0 : index
    %c0_108 = arith.constant 0 : index
    %178 = vector.load %arg13[%177, %c0_107, %c0_108] : memref<4x4x128xf32, #tpu.memory_space<vmem>>, vector<1x2x128xf32>
    %179 = vector.shape_cast %178 : vector<1x2x128xf32> to vector<2x128xf32>
    %180 = arith.truncf %179 : vector<2x128xf32> to vector<2x128xbf16>
    %c3_109 = arith.constant 3 : index
    %c0_110 = arith.constant 0 : index
    %c0_111 = arith.constant 0 : index
    %181 = vector.load %arg8[%c3_109, %c0_110, %c0_111] : memref<9x128x128xbf16, #tpu.memory_space<vmem>>, vector<1x128x128xbf16>
    %182 = vector.shape_cast %181 : vector<1x128x128xbf16> to vector<128x128xbf16>
    %cst_112 = arith.constant dense<0.000000e+00> : vector<2x128xf32>
    %183 = tpu.matmul %180, %182, %cst_112 {dimension_numbers = #tpu.dot_dimension_numbers<[1], [0], [0], [1], [0, 0, 1, 1], [], []>} : vector<2x128xbf16>, vector<128x128xbf16>, vector<2x128xf32> -> vector<2x128xf32>
    %184 = arith.addf %175, %183 : vector<2x128xf32>
    %c1_i32_113 = arith.constant 1 : i32
    %185 = arith.addi %147, %c1_i32_113 : i32
    %186 = arith.index_cast %185 : i32 to index
    %c1_114 = arith.constant 1 : index
    %c0_115 = arith.constant 0 : index
    %187 = vector.load %arg13[%186, %c1_114, %c0_115] : memref<4x4x128xf32, #tpu.memory_space<vmem>>, vector<1x2x128xf32>
    %188 = vector.shape_cast %187 : vector<1x2x128xf32> to vector<2x128xf32>
    %189 = arith.truncf %188 : vector<2x128xf32> to vector<2x128xbf16>
    %c4_116 = arith.constant 4 : index
    %c0_117 = arith.constant 0 : index
    %c0_118 = arith.constant 0 : index
    %190 = vector.load %arg8[%c4_116, %c0_117, %c0_118] : memref<9x128x128xbf16, #tpu.memory_space<vmem>>, vector<1x128x128xbf16>
    %191 = vector.shape_cast %190 : vector<1x128x128xbf16> to vector<128x128xbf16>
    %cst_119 = arith.constant dense<0.000000e+00> : vector<2x128xf32>
    %192 = tpu.matmul %189, %191, %cst_119 {dimension_numbers = #tpu.dot_dimension_numbers<[1], [0], [0], [1], [0, 0, 1, 1], [], []>} : vector<2x128xbf16>, vector<128x128xbf16>, vector<2x128xf32> -> vector<2x128xf32>
    %193 = arith.addf %184, %192 : vector<2x128xf32>
    %c1_i32_120 = arith.constant 1 : i32
    %194 = arith.addi %147, %c1_i32_120 : i32
    %195 = arith.index_cast %194 : i32 to index
    %c2_121 = arith.constant 2 : index
    %c0_122 = arith.constant 0 : index
    %196 = vector.load %arg13[%195, %c2_121, %c0_122] : memref<4x4x128xf32, #tpu.memory_space<vmem>>, vector<1x2x128xf32>
    %197 = vector.shape_cast %196 : vector<1x2x128xf32> to vector<2x128xf32>
    %198 = arith.truncf %197 : vector<2x128xf32> to vector<2x128xbf16>
    %c5_123 = arith.constant 5 : index
    %c0_124 = arith.constant 0 : index
    %c0_125 = arith.constant 0 : index
    %199 = vector.load %arg8[%c5_123, %c0_124, %c0_125] : memref<9x128x128xbf16, #tpu.memory_space<vmem>>, vector<1x128x128xbf16>
    %200 = vector.shape_cast %199 : vector<1x128x128xbf16> to vector<128x128xbf16>
    %cst_126 = arith.constant dense<0.000000e+00> : vector<2x128xf32>
    %201 = tpu.matmul %198, %200, %cst_126 {dimension_numbers = #tpu.dot_dimension_numbers<[1], [0], [0], [1], [0, 0, 1, 1], [], []>} : vector<2x128xbf16>, vector<128x128xbf16>, vector<2x128xf32> -> vector<2x128xf32>
    %202 = arith.addf %193, %201 : vector<2x128xf32>
    %c2_i32_127 = arith.constant 2 : i32
    %203 = arith.addi %147, %c2_i32_127 : i32
    %204 = arith.index_cast %203 : i32 to index
    %c0_128 = arith.constant 0 : index
    %c0_129 = arith.constant 0 : index
    %205 = vector.load %arg13[%204, %c0_128, %c0_129] : memref<4x4x128xf32, #tpu.memory_space<vmem>>, vector<1x2x128xf32>
    %206 = vector.shape_cast %205 : vector<1x2x128xf32> to vector<2x128xf32>
    %207 = arith.truncf %206 : vector<2x128xf32> to vector<2x128xbf16>
    %c6_130 = arith.constant 6 : index
    %c0_131 = arith.constant 0 : index
    %c0_132 = arith.constant 0 : index
    %208 = vector.load %arg8[%c6_130, %c0_131, %c0_132] : memref<9x128x128xbf16, #tpu.memory_space<vmem>>, vector<1x128x128xbf16>
    %209 = vector.shape_cast %208 : vector<1x128x128xbf16> to vector<128x128xbf16>
    %cst_133 = arith.constant dense<0.000000e+00> : vector<2x128xf32>
    %210 = tpu.matmul %207, %209, %cst_133 {dimension_numbers = #tpu.dot_dimension_numbers<[1], [0], [0], [1], [0, 0, 1, 1], [], []>} : vector<2x128xbf16>, vector<128x128xbf16>, vector<2x128xf32> -> vector<2x128xf32>
    %211 = arith.addf %202, %210 : vector<2x128xf32>
    %c2_i32_134 = arith.constant 2 : i32
    %212 = arith.addi %147, %c2_i32_134 : i32
    %213 = arith.index_cast %212 : i32 to index
    %c1_135 = arith.constant 1 : index
    %c0_136 = arith.constant 0 : index
    %214 = vector.load %arg13[%213, %c1_135, %c0_136] : memref<4x4x128xf32, #tpu.memory_space<vmem>>, vector<1x2x128xf32>
    %215 = vector.shape_cast %214 : vector<1x2x128xf32> to vector<2x128xf32>
    %216 = arith.truncf %215 : vector<2x128xf32> to vector<2x128xbf16>
    %c7_137 = arith.constant 7 : index
    %c0_138 = arith.constant 0 : index
    %c0_139 = arith.constant 0 : index
    %217 = vector.load %arg8[%c7_137, %c0_138, %c0_139] : memref<9x128x128xbf16, #tpu.memory_space<vmem>>, vector<1x128x128xbf16>
    %218 = vector.shape_cast %217 : vector<1x128x128xbf16> to vector<128x128xbf16>
    %cst_140 = arith.constant dense<0.000000e+00> : vector<2x128xf32>
    %219 = tpu.matmul %216, %218, %cst_140 {dimension_numbers = #tpu.dot_dimension_numbers<[1], [0], [0], [1], [0, 0, 1, 1], [], []>} : vector<2x128xbf16>, vector<128x128xbf16>, vector<2x128xf32> -> vector<2x128xf32>
    %220 = arith.addf %211, %219 : vector<2x128xf32>
    %c2_i32_141 = arith.constant 2 : i32
    %221 = arith.addi %147, %c2_i32_141 : i32
    %222 = arith.index_cast %221 : i32 to index
    %c2_142 = arith.constant 2 : index
    %c0_143 = arith.constant 0 : index
    %223 = vector.load %arg13[%222, %c2_142, %c0_143] : memref<4x4x128xf32, #tpu.memory_space<vmem>>, vector<1x2x128xf32>
    %224 = vector.shape_cast %223 : vector<1x2x128xf32> to vector<2x128xf32>
    %225 = arith.truncf %224 : vector<2x128xf32> to vector<2x128xbf16>
    %c8_144 = arith.constant 8 : index
    %c0_145 = arith.constant 0 : index
    %c0_146 = arith.constant 0 : index
    %226 = vector.load %arg8[%c8_144, %c0_145, %c0_146] : memref<9x128x128xbf16, #tpu.memory_space<vmem>>, vector<1x128x128xbf16>
    %227 = vector.shape_cast %226 : vector<1x128x128xbf16> to vector<128x128xbf16>
    %cst_147 = arith.constant dense<0.000000e+00> : vector<2x128xf32>
    %228 = tpu.matmul %225, %227, %cst_147 {dimension_numbers = #tpu.dot_dimension_numbers<[1], [0], [0], [1], [0, 0, 1, 1], [], []>} : vector<2x128xbf16>, vector<128x128xbf16>, vector<2x128xf32> -> vector<2x128xf32>
    %229 = arith.addf %220, %228 : vector<2x128xf32>
    %230 = arith.maximumf %145, %229 : vector<2x128xf32>
    %cst_148 = arith.constant dense<0.000000e+00> : vector<1x128xf32>
    %231 = tpu.matmul %54, %230, %cst_148 {dimension_numbers = #tpu.dot_dimension_numbers<[1], [0], [0], [1], [0, 0, 1, 1], [], []>} : vector<1x2xf32>, vector<2x128xf32>, vector<1x128xf32> -> vector<1x128xf32>
    %cst_149 = arith.constant dense<0.000000e+00> : vector<1x128xf32>
    %232 = tpu.matmul %61, %230, %cst_149 {dimension_numbers = #tpu.dot_dimension_numbers<[1], [0], [0], [1], [0, 0, 1, 1], [], []>} : vector<1x2xf32>, vector<2x128xf32>, vector<1x128xf32> -> vector<1x128xf32>
    %233 = arith.maximumf %231, %232 : vector<1x128xf32>
    %234 = arith.addf %233, %62 : vector<1x128xf32>
    %cst_150 = arith.constant 0.000000e+00 : f32
    %235 = vector.broadcast %cst_150 : f32 to vector<1x128xf32>
    %236 = arith.maximumf %234, %235 : vector<1x128xf32>
    %237 = tpu.iota {dimensions = array<i32: 1>} : vector<1x128xi32>
    %c66_i32 = arith.constant 66 : i32
    %238 = vector.broadcast %c66_i32 : i32 to vector<1x128xi32>
    %239 = arith.cmpi slt, %237, %238 : vector<1x128xi32>
    %cst_151 = arith.constant -1.000000e+30 : f32
    %240 = vector.broadcast %cst_151 : f32 to vector<1x128xf32>
    %241 = arith.select %239, %236, %240 : vector<1x128xi1>, vector<1x128xf32>
    %cst_152 = arith.constant dense<0xFF800000> : vector<1xf32>
    %242 = vector.multi_reduction <maximumf>, %241, %cst_152 [1] : vector<1x128xf32> to vector<1xf32>
    %243 = vector.shape_cast %242 : vector<1xf32> to vector<1x1xf32>
    %244 = vector.broadcast %243 : vector<1x1xf32> to vector<1x128xf32>
    %245 = arith.subf %241, %244 : vector<1x128xf32>
    %246 = math.exp %245 : vector<1x128xf32>
    %cst_153 = arith.constant dense<0.000000e+00> : vector<1xf32>
    %247 = vector.multi_reduction <add>, %246, %cst_153 [1] : vector<1x128xf32> to vector<1xf32>
    %248 = vector.shape_cast %247 : vector<1xf32> to vector<1x1xf32>
    %249 = math.log %248 : vector<1x1xf32>
    %250 = arith.addf %243, %249 : vector<1x1xf32>
    %251 = vector.broadcast %250 : vector<1x1xf32> to vector<1x128xf32>
    %252 = arith.subf %236, %251 : vector<1x128xf32>
    %c0_154 = arith.constant 0 : index
    %253 = arith.index_cast %c0_i32_25 : i32 to index
    %c0_155 = arith.constant 0 : index
    %c0_156 = arith.constant 0 : index
    %254 = vector.load %arg10[%c0_154, %253, %c0_155, %c0_156] : memref<1x1x1x128xf32, #tpu.memory_space<vmem>>, vector<1x1x1x128xf32>
    %255 = vector.shape_cast %254 : vector<1x1x1x128xf32> to vector<1x128xf32>
    %256 = vector.shape_cast %252 : vector<1x128xf32> to vector<1x1x1x128xf32>
    tpu.vector_store %arg10[%c0_154, %253, %c0_155, %c0_156], %256 {strides = array<i32>} : memref<1x1x1x128xf32, #tpu.memory_space<vmem>>, vector<1x1x1x128xf32>,
    %c1_i32_157 = arith.constant 1 : i32
    return
  }
  func.func @transform_0(%arg0: i32) -> (i32, i32, i32, i32) {
    %c0_i32 = arith.constant 0 : i32
    %c0_i32_0 = arith.constant 0 : i32
    %c0_i32_1 = arith.constant 0 : i32
    %c0_i32_2 = arith.constant 0 : i32
    return %arg0, %c0_i32, %c0_i32_0, %c0_i32_1 : i32, i32, i32, i32
  }
  func.func @transform_1(%arg0: i32) -> (i32, i32, i32) {
    %c0_i32 = arith.constant 0 : i32
    %c0_i32_0 = arith.constant 0 : i32
    %c0_i32_1 = arith.constant 0 : i32
    %c0_i32_2 = arith.constant 0 : i32
    return %c0_i32, %c0_i32_0, %c0_i32_1 : i32, i32, i32
  }
  func.func @transform_2(%arg0: i32) -> (i32, i32) {
    %c0_i32 = arith.constant 0 : i32
    %c0_i32_0 = arith.constant 0 : i32
    %c0_i32_1 = arith.constant 0 : i32
    return %c0_i32, %c0_i32_0 : i32, i32
  }
  func.func @transform_3(%arg0: i32) -> (i32, i32, i32) {
    %c0_i32 = arith.constant 0 : i32
    %c0_i32_0 = arith.constant 0 : i32
    %c0_i32_1 = arith.constant 0 : i32
    %c0_i32_2 = arith.constant 0 : i32
    return %c0_i32, %c0_i32_0, %c0_i32_1 : i32, i32, i32
  }
  func.func @transform_4(%arg0: i32) -> (i32, i32) {
    %c0_i32 = arith.constant 0 : i32
    %c0_i32_0 = arith.constant 0 : i32
    %c0_i32_1 = arith.constant 0 : i32
    return %c0_i32, %c0_i32_0 : i32, i32
  }
  func.func @transform_5(%arg0: i32) -> (i32, i32, i32) {
    %c0_i32 = arith.constant 0 : i32
    %c0_i32_0 = arith.constant 0 : i32
    %c0_i32_1 = arith.constant 0 : i32
    %c0_i32_2 = arith.constant 0 : i32
    return %c0_i32, %c0_i32_0, %c0_i32_1 : i32, i32, i32
  }
  func.func @transform_6(%arg0: i32) -> (i32, i32) {
    %c0_i32 = arith.constant 0 : i32
    %c0_i32_0 = arith.constant 0 : i32
    %c0_i32_1 = arith.constant 0 : i32
    return %c0_i32, %c0_i32_0 : i32, i32
  }
  func.func @transform_7(%arg0: i32) -> (i32, i32, i32) {
    %c0_i32 = arith.constant 0 : i32
    %c0_i32_0 = arith.constant 0 : i32
    %c0_i32_1 = arith.constant 0 : i32
    %c0_i32_2 = arith.constant 0 : i32
    return %c0_i32, %c0_i32_0, %c0_i32_1 : i32, i32, i32
  }
  func.func @transform_8(%arg0: i32) -> (i32, i32) {
    %c0_i32 = arith.constant 0 : i32
    %c0_i32_0 = arith.constant 0 : i32
    %c0_i32_1 = arith.constant 0 : i32
    return %c0_i32, %c0_i32_0 : i32, i32
  }
  func.func @transform_9(%arg0: i32) -> (i32, i32, i32, i32) {
    %c0_i32 = arith.constant 0 : i32
    %c0_i32_0 = arith.constant 0 : i32
    %c0_i32_1 = arith.constant 0 : i32
    %c0_i32_2 = arith.constant 0 : i32
    return %arg0, %c0_i32, %c0_i32_0, %c0_i32_1 : i32, i32, i32, i32
  }
}

</mosaic_0001>

<bundles_post_ra>
// kernel: net_forward.1
= control target key start
LH: loop header
LB: loop body
LE: loop exit
PB: predicated region body
PF: predicated region fallthrough
CT: control target
= control target key end

     0   :  { %s9260_s30 = smov 0   ;;  %s10908_s0 = inlined_call_operand.vmem [shape: f32[2,46,46,1], index: 0, kind: input, shape index: {}]   ;;  %s10909_s1 = inlined_call_operand.vmem [shape: f32[9,1,128], index: 1, kind: input, shape index: {}]   ;;  %s10910_s2 = inlined_call_operand.vmem [shape: f32[1,128], index: 2, kind: input, shape index: {}]   ;;  %s10911_s3 = inlined_call_operand.vmem [shape: bf16[9,128,128], index: 3, kind: input, shape index: {}]   ;;  %s10912_s4 = inlined_call_operand.vmem [shape: f32[1,128], index: 4, kind: input, shape index: {}]   ;;  %s10913_s5 = inlined_call_operand.vmem [shape: bf16[9,128,128], index: 5, kind: input, shape index: {}]   ;;  %s10914_s6 = inlined_call_operand.vmem [shape: f32[1,128], index: 6, kind: input, shape index: {}]   ;;  %s10915_s7 = inlined_call_operand.vmem [shape: bf16[9,128,128], index: 7, kind: input, shape index: {}]   ;;  %s10916_s8 = inlined_call_operand.vmem [shape: f32[1,128], index: 8, kind: input, shape index: {}]   ;;  %s10917_s9 = inlined_call_operand.vmem [shape: f32[2,1,1,128], index: 9, kind: output, shape index: {}]  }
   0x1 LB: > { %s6211_s10 = sadd.s32 4294967295, %s9187_s30   ;;  %p6215_p0 = scmp.ge.s32.totalorder %s9187_s30, 1  ;;  %s9187_s30 = sphi %s9260_s30, %s19_s30  }
   0x2   : > { %p287_p1 = scmp.lt.s32.totalorder %s9187_s30, 3 }
   0x4   : > { %p288_p2 = pnand %p6215_p0, %p287_p1 }
   0x6   : > { %291 = sbr.rel (%p288_p2) target bundleno = 3026 (0xbd2), region = 56 }
   0xd   : > { %p321_p3 = scmp.lt.s32.totalorder %s6211_s10, 1  ;;  %v330_v0 = vlaneseq  ;;  %v9271_v1 = vld [vmem:[%s10910_s2] ss:$0 sm:$0xff]  ;;  %v10918_v10 = vmov 0.0   ;;  %s9311_s20 = smov 0  }
   0xe   : > { %10926 = vst [vmem:[#allocation5_spill] sm:$0xff] %v9271_v1 }
   0xf   : > { %s10936_s10 = smov (!%p321_p3, %s6211_s10), 1  ;;  %v331_v2 = vshrl.u32 %v330_v0, 7  ;;  %v9275_v3 = vand.u32 127, %v330_v0 }
  0x10   : > { %s8905_s13 = smul.u32 2208, %s10936_s10  ;;  %s328_s16 = scalar_lea.vmem %s10917_s9, %s10936_s10 }
  0x11   : > { %10927 = vst [vmem:[#allocation6_spill] sm:$0xff] %v9275_v3  ;;  %v332_v4 = vadd.s32 8, %v331_v2  ;;  %v333_v5 = vadd.s32 16, %v331_v2  ;;  %v336_v6 = vmul.u32 2, %v331_v2 }
  0x12   : > { %s9285_s19 = scalar_lea.vmem %s10908_s0, %s8905_s13 }
  0x13   : > { %v337_v7 = vmul.u32 2, %v332_v4  ;;  %v338_v8 = vmul.u32 2, %v333_v5  ;;  %vm339_vm0 = vcmp.eq.s32.totalorder %v9275_v3, %v336_v6  ;;  %v348_v9 = vadd.s32 1, %v336_v6 }
  0x14   : > { %v9289_v11 = vsel %vm339_vm0, 1.0, %v10918_v10 }
  0x15   : > { %vm340_vm1 = vcmp.eq.s32.totalorder %v9275_v3, %v337_v7  ;;  %vm341_vm2 = vcmp.eq.s32.totalorder %v9275_v3, %v338_v8  ;;  %v349_v12 = vadd.s32 1, %v337_v7  ;;  %v350_v13 = vadd.s32 1, %v338_v8 }
  0x16   : > { %v9294_v14 = vsel %vm340_vm1, 1.0, %v10918_v10  ;;  %v9297_v15 = vsel %vm341_vm2, 1.0, %v10918_v10  ;;  %vm351_vm3 = vcmp.eq.s32.totalorder %v9275_v3, %v348_v9 }
  0x17   : > { %vm352_vm4 = vcmp.eq.s32.totalorder %v9275_v3, %v349_v12  ;;  %vm353_vm5 = vcmp.eq.s32.totalorder %v9275_v3, %v350_v13  ;;  %v9303_v16 = vsel %vm351_vm3, 1.0, %v10918_v10 }
  0x18   : > { %v9306_v17 = vsel %vm352_vm4, 1.0, %v10918_v10  ;;  %v9309_v18 = vsel %vm353_vm5, 1.0, %v10918_v10 }
  0x19   : > { %10928 = vst [vmem:[#allocation7_spill] sm:$0xff] %v9309_v18 }
  0x1a LB: >> { %v9202_v19 = vmov 0   ;;  %s6224_s21 = smul.u32 96, %s9191_s20  ;;  %vm9204_vm6 = vmmov 0   ;;  %v9556_v10 = vld [vmem:[%s10909_s1 + $0x8] ss:$0 sm:$0xff]  ;;  %vm1114_vm7 = vcmask 1043456   ;;  %s9191_s20 = sphi %s9311_s20, %s366_s20  }
  0x1b   : >> { %8948 = vset.pattern.permute.xlu1 %v9202_v19  ;;  %8947 = vset.pattern.permute.xlu0 %v9202_v19  ;;  %vm9206_vm8 = vmmov 1   ;;  %vm1104_vm10 = vcmask 359424   ;;  %s1302_s25 = smul.u32 24, %s9191_s20  ;;  %s366_s20 = sadd.s32 1, %s9191_s20  }
  0x1c   : >> { %s9318_s22 = scalar_lea.vmem %s9285_s19, %s6224_s21  ;;  %vm8693_vm9 = vmpackc.low %vm1114_vm7, %vm9206_vm8  ;;  %p363_p4 = scmp.ge.s32.totalorder %s366_s20, 22  }
  0x1d   : >> { %v425_v20 = vld [vmem:[%s9318_s22 + $0x1] sm:$0xff]  ;;  %v426_v22 = vld [vmem:[%s9318_s22 + $0x9] sm:$0xff]  ;;  %v6233_v24 = vld [vmem:[%s9318_s22 + $0x38] sm:$0xff]  ;;  %s1303_s26 = scalar_lea.vmem [#allocation2], %s1302_s25  ;;  %s9684_s29 = smov (%p363_p4), 0  }
  0x1e   : >> { %v370_v21 = vld [vmem:[%s9318_s22] sm:$0xff]  ;;  %435 = vperm.xlu1 %8948, %v425_v20   ;;  %v371_v23 = vld [vmem:[%s9318_s22 + $0x8] sm:$0xff]  ;;  %v6232_v25 = vld [vmem:[%s9318_s22 + $0x30] sm:$0xff] }
  0x1f   : >> { %379 = vperm.xlu0 %8947, %v370_v21   ;;  %v6241_v26 = vld [vmem:[%s9318_s22 + $0x39] sm:$0xff]  ;;  %v6240_v27 = vld [vmem:[%s9318_s22 + $0x31] sm:$0xff]  ;;  %v481_v29 = vld [vmem:[%s9318_s22 + $0x2] sm:$0xff] }
  0x20   : >> { %v482_v28 = vld [vmem:[%s9318_s22 + $0xa] sm:$0xff]  ;;  %v6249_v30 = vld [vmem:[%s9318_s22 + $0x3a] sm:$0xff]  ;;  %v6248_v31 = vld [vmem:[%s9318_s22 + $0x32] sm:$0xff] }
  0x21   : >> { %v373_v32 = vld [vmem:[%s9318_s22 + $0x18] sm:$0xff]  ;;  %v372_v33 = vld [vmem:[%s9318_s22 + $0x10] sm:$0xff]  ;;  %v6235_v36 = vld [vmem:[%s9318_s22 + $0x48] sm:$0xff] }
  0x22   : >> { %440 = vperm.xlu1 %8948, %v426_v22   ;;  %v428_v34 = vld [vmem:[%s9318_s22 + $0x19] sm:$0xff]  ;;  %v427_v35 = vld [vmem:[%s9318_s22 + $0x11] sm:$0xff]  ;;  %v6243_v38 = vld [vmem:[%s9318_s22 + $0x49] sm:$0xff] }
  0x23   : >> { %384 = vperm.xlu0 %8947, %v371_v23   ;;  %v6234_v37 = vld [vmem:[%s9318_s22 + $0x40] sm:$0xff]  ;;  %v6259_v40 = vld [vmem:[%s9318_s22 + $0x68] sm:$0xff]  ;;  %v483_v43 = vld [vmem:[%s9318_s22 + $0x12] sm:$0xff] }
  0x24   : >> { %v6242_v39 = vld [vmem:[%s9318_s22 + $0x41] sm:$0xff]  ;;  %v6251_v44 = vld [vmem:[%s9318_s22 + $0x4a] sm:$0xff]  ;;  %v6237_v52 = vld [vmem:[%s9318_s22 + $0x58] sm:$0xf] }
  0x25   : >> { %v6258_v41 = vld [vmem:[%s9318_s22 + $0x60] sm:$0xff]  ;;  %v6267_v46 = vld [vmem:[%s9318_s22 + $0x69] sm:$0xff]  ;;  %v6245_v54 = vld [vmem:[%s9318_s22 + $0x59] sm:$0xf] }
  0x26   : >> { %555 = vperm.xlu1 %8948, %v6233_v24   ;;  %v484_v42 = vld [vmem:[%s9318_s22 + $0x1a] sm:$0xff]  ;;  %v6250_v45 = vld [vmem:[%s9318_s22 + $0x42] sm:$0xff]  ;;  %v6236_v53 = vld [vmem:[%s9318_s22 + $0x50] sm:$0xff] }
  0x27   : >> { %550 = vperm.xlu0 %8947, %v6232_v25   ;;  %v6266_v47 = vld [vmem:[%s9318_s22 + $0x61] sm:$0xff]  ;;  %v430_v50 = vld [vmem:[%s9318_s22 + $0x29] sm:$0xf]  ;;  %v6244_v55 = vld [vmem:[%s9318_s22 + $0x51] sm:$0xff] }
  0x28   : >> { %v375_v48 = vld [vmem:[%s9318_s22 + $0x28] sm:$0xf]  ;;  %v374_v49 = vld [vmem:[%s9318_s22 + $0x20] sm:$0xff]  ;;  %v6261_v56 = vld [vmem:[%s9318_s22 + $0x78] sm:$0xff] }
  0x29   : >> { %v429_v51 = vld [vmem:[%s9318_s22 + $0x21] sm:$0xff]  ;;  %v6260_v57 = vld [vmem:[%s9318_s22 + $0x70] sm:$0xff]  ;;  %v486_v60 = vld [vmem:[%s9318_s22 + $0x2a] sm:$0xf] }
  0x2a   : >> { %611 = vperm.xlu1 %8948, %v6241_v26   ;;  %v6275_v58 = vld [vmem:[%s9318_s22 + $0x6a] sm:$0xff]  ;;  %v6274_v59 = vld [vmem:[%s9318_s22 + $0x62] sm:$0xff]  ;;  %v6253_v62 = vld [vmem:[%s9318_s22 + $0x5a] sm:$0xf] }
  0x2b   : >> { %606 = vperm.xlu0 %8947, %v6240_v27   ;;  %v485_v61 = vld [vmem:[%s9318_s22 + $0x22] sm:$0xff]  ;;  %v6252_v63 = vld [vmem:[%s9318_s22 + $0x52] sm:$0xff]  ;;  %v6277_v8 = vld [vmem:[%s9318_s22 + $0x7a] sm:$0xff] }
  0x2c   : >> { %v6269_v0 = vld [vmem:[%s9318_s22 + $0x79] sm:$0xff]  ;;  %v6268_v2 = vld [vmem:[%s9318_s22 + $0x71] sm:$0xff]  ;;  %v6263_v6 = vld [vmem:[%s9318_s22 + $0x88] sm:$0xf] }
  0x2d   : >> { %v6285_v4 = vld [vmem:[%s9318_s22 + $0x98] sm:$0xff]  ;;  %v6284_v5 = vld [vmem:[%s9318_s22 + $0x90] sm:$0xff]  ;;  %v6262_v7 = vld [vmem:[%s9318_s22 + $0x80] sm:$0xff] }
  0x2e   : >> { %496 = vperm.xlu1 %8948, %v482_v28   ;;  %v6276_v9 = vld [vmem:[%s9318_s22 + $0x72] sm:$0xff]  ;;  %v6271_v19 = vld [vmem:[%s9318_s22 + $0x89] sm:$0xf]  ;;  %v6270_v20 = vld [vmem:[%s9318_s22 + $0x81] sm:$0xff] }
  0x2f   : >> { %491 = vperm.xlu0 %8947, %v481_v29   ;;  %v6291_v12 = vld [vmem:[%s9318_s22 + $0x99] sm:$0xff]  ;;  %v6290_v13 = vld [vmem:[%s9318_s22 + $0x91] sm:$0xff]  ;;  %v6287_v21 = vld [vmem:[%s9318_s22 + $0xa8] sm:$0xff]  ;;  %v10922_v29 = vmov 0.0|0.0  }
  0x30   : >> { %v6286_v22 = vld [vmem:[%s9318_s22 + $0xa0] sm:$0xff]  ;;  %v6296_v24 = vld [vmem:[%s9318_s22 + $0x92] sm:$0xff]  ;;  %v6279_v25 = vld [vmem:[%s9318_s22 + $0x8a] sm:$0xf]  ;;  %8685 = vmatprep.subr.bf16.mxu0 %v10922_v29  ;;  %8695 = vmatprep.subr.bf16.mxu1 %v10922_v29 }
  0x31   : >> { %v6297_v23 = vld [vmem:[%s9318_s22 + $0x9a] sm:$0xff]  ;;  %v6278_v26 = vld [vmem:[%s9318_s22 + $0x82] sm:$0xff] }
  0x32   : >> { %667 = vperm.xlu1 %8948, %v6249_v30   ;;  %v6293_v27 = vld [vmem:[%s9318_s22 + $0xa9] sm:$0xff]  ;;  %v6292_v28 = vld [vmem:[%s9318_s22 + $0xa1] sm:$0xff] }
  0x33   : >> { %662 = vperm.xlu0 %8947, %v6248_v31   ;;  %v9389_v30 = vld [vmem:[%s10909_s1 + $0x1] ss:$0 sm:$0xff]  ;;  %v9394_v31 = vld [vmem:[%s10909_s1] ss:$0 sm:$0xff] }
  0x36   : >> { %394 = vperm.xlu1 %8948, %v373_v32   ;;  %v6289_v32 = vld [vmem:[%s9318_s22 + $0xb8] sm:$0xf] }
  0x37   : >> { %389 = vperm.xlu0 %8947, %v372_v33   ;;  %v6288_v33 = vld [vmem:[%s9318_s22 + $0xb0] sm:$0xff] }
  0x3a   : >> { %450 = vperm.xlu1 %8948, %v428_v34  }
  0x3b   : >> { %445 = vperm.xlu0 %8947, %v427_v35  }
  0x3e   : >> { %565 = vperm.xlu1 %8948, %v6235_v36  }
  0x3f   : >> { %560 = vperm.xlu0 %8947, %v6234_v37  }
  0x42   : >> { %621 = vperm.xlu1 %8948, %v6243_v38   ;;  %v6299_v38 = vld [vmem:[%s9318_s22 + $0xaa] sm:$0xff] }
  0x43   : >> { %616 = vperm.xlu0 %8947, %v6242_v39   ;;  %v6298_v39 = vld [vmem:[%s9318_s22 + $0xa2] sm:$0xff] }
  0x46   : >> { %726 = vperm.xlu1 %8948, %v6259_v40  }
  0x47   : >> { %721 = vperm.xlu0 %8947, %v6258_v41  }
  0x4a   : >> { %506 = vperm.xlu1 %8948, %v484_v42  }
  0x4b   : >> { %501 = vperm.xlu0 %8947, %v483_v43  }
  0x4e   : >> { %677 = vperm.xlu1 %8948, %v6251_v44  }
  0x4f   : >> { %672 = vperm.xlu0 %8947, %v6250_v45   ;;  %v6295_v45 = vld [vmem:[%s9318_s22 + $0xb9] sm:$0xf] }
  0x52   : >> { %782 = vperm.xlu1 %8948, %v6267_v46  }
  0x53   : >> { %777 = vperm.xlu0 %8947, %v6266_v47   ;;  %v6294_v47 = vld [vmem:[%s9318_s22 + $0xb1] sm:$0xff] }
  0x56   : >> { %404 = vperm.xlu1 %8948, %v375_v48  }
  0x57   : >> { %399 = vperm.xlu0 %8947, %v374_v49  }
  0x5a   : >> { %460 = vperm.xlu1 %8948, %v430_v50   ;;  %v6301_v50 = vld [vmem:[%s9318_s22 + $0xba] sm:$0xf] }
  0x5b   : >> { %455 = vperm.xlu0 %8947, %v429_v51   ;;  %v6300_v51 = vld [vmem:[%s9318_s22 + $0xb2] sm:$0xff] }
  0x5e   : >> { %575 = vperm.xlu1 %8948, %v6237_v52  }
  0x5f   : >> { %570 = vperm.xlu0 %8947, %v6236_v53  }
  0x62   : >> { %631 = vperm.xlu1 %8948, %v6245_v54  }
  0x63   : >> { %626 = vperm.xlu0 %8947, %v6244_v55  }
  0x66   : >> { %736 = vperm.xlu1 %8948, %v6261_v56  }
  0x67   : >> { %731 = vperm.xlu0 %8947, %v6260_v57  }
  0x6a   : >> { %838 = vperm.xlu1 %8948, %v6275_v58   ;;  %v9415_v58 = vld [vmem:[%s10909_s1 + $0x2] ss:$0 sm:$0xff] }
  0x6b   : >> { %833 = vperm.xlu0 %8947, %v6274_v59  }
  0x6e   : >> { %516 = vperm.xlu1 %8948, %v486_v60  }
  0x6f   : >> { %511 = vperm.xlu0 %8947, %v485_v61   ;;  %v9420_v61 = vld [vmem:[%s10909_s1 + $0x3] ss:$0 sm:$0xff] }
  0x72   : >> { %687 = vperm.xlu1 %8948, %v6253_v62  }
  0x73   : >> { %682 = vperm.xlu0 %8947, %v6252_v63  }
  0x76   : >> { %792 = vperm.xlu1 %8948, %v6269_v0   ;;  %v9425_v0 = vld [vmem:[%s10909_s1 + $0x4] ss:$0 sm:$0xff] }
  0x77   : >> { %787 = vperm.xlu0 %8947, %v6268_v2  }
  0x7a   : >> { %967 = vperm.xlu1 %8948, %v6285_v4  }
  0x7b   : >> { %962 = vperm.xlu0 %8947, %v6284_v5   ;;  %v9432_v5 = vld [vmem:[%s10909_s1 + $0x5] ss:$0 sm:$0xff] }
  0x7e   : >> { %746 = vperm.xlu1 %8948, %v6263_v6  }
  0x7f   : >> { %741 = vperm.xlu0 %8947, %v6262_v7  }
  0x82   : >> { %848 = vperm.xlu1 %8948, %v6277_v8  }
  0x83   : >> { %843 = vperm.xlu0 %8947, %v6276_v9  }
  0x86   : >> { %1015 = vperm.xlu1 %8948, %v6291_v12  }
  0x87   : >> { %1010 = vperm.xlu0 %8947, %v6290_v13  }
  0x8a   : >> { %802 = vperm.xlu1 %8948, %v6271_v19  }
  0x8b   : >> { %797 = vperm.xlu0 %8947, %v6270_v20  }
  0x8e   : >> { %977 = vperm.xlu1 %8948, %v6287_v21  }
  0x8f   : >> { %972 = vperm.xlu0 %8947, %v6286_v22  }
  0x92   : >> { %1063 = vperm.xlu1 %8948, %v6297_v23  }
  0x93   : >> { %1058 = vperm.xlu0 %8947, %v6296_v24  }
  0x96   : >> { %858 = vperm.xlu1 %8948, %v6279_v25  }
  0x97   : >> { %853 = vperm.xlu0 %8947, %v6278_v26  }
  0x9a   : >> { %1025 = vperm.xlu1 %8948, %v6293_v27  }
  0x9b   : >> { %1020 = vperm.xlu0 %8947, %v6292_v28  }
  0x9d   : >> { %v436_v34 = vpop.permute.xlu1 %435 }
  0x9e   : >> { %v380_v35 = vpop.permute.xlu0 %379  ;;  %v469_v36 = vmul.f32 %v9389_v30, %v436_v34  ;;  %987 = vperm.xlu1 %8948, %v6289_v32  }
  0x9f   : >> { %v413_v37 = vmul.f32 %v9394_v31, %v380_v35  ;;  %982 = vperm.xlu0 %8947, %v6288_v33   ;;  %v10920_v33 = vmov 0.0  }
  0xa0   : >> { %7537 = vmatprep.mubr.msk.f32.mxu0 %vm9204_vm6, %v10920_v33  ;;  %7558 = vmatprep.mubr.msk.f32.mxu1 %vm9204_vm6, %v10920_v33 }
  0xa1   : >> { %v475_v40 = vadd.f32 %v469_v36, %v413_v37  ;;  %v441_v41 = vpop.permute.xlu1 %440 }
  0xa2   : >> { %v385_v42 = vpop.permute.xlu0 %384  ;;  %v470_v43 = vmul.f32 %v9389_v30, %v441_v41  ;;  %1073 = vperm.xlu1 %8948, %v6299_v38  }
  0xa3   : >> { %v414_v44 = vmul.f32 %v9394_v31, %v385_v42  ;;  %1068 = vperm.xlu0 %8947, %v6298_v39  }
  0xa5   : >> { %v476_v46 = vadd.f32 %v470_v43, %v414_v44  ;;  %v556_v48 = vpop.permute.xlu1 %555 }
  0xa6   : >> { %v551_v49 = vpop.permute.xlu0 %550  ;;  %1035 = vperm.xlu1 %8948, %v6295_v45   ;;  %v880_v54 = vmul.f32 %v9394_v31, %v556_v48  ;;  %v585_v6 = vmul.f32 %v9420_v61, %v556_v48 }
  0xa7   : >> { %1030 = vperm.xlu0 %8947, %v6294_v47   ;;  %v879_v55 = vmul.f32 %v9394_v31, %v551_v49  ;;  %v584_v7 = vmul.f32 %v9420_v61, %v551_v49 }
  0xa9   : >> { %v612_v52 = vpop.permute.xlu1 %611 }
  0xaa   : >> { %v607_v53 = vpop.permute.xlu0 %606  ;;  %v892_v56 = vmul.f32 %v9389_v30, %v612_v52  ;;  %1083 = vperm.xlu1 %8948, %v6301_v50   ;;  %v641_v12 = vmul.f32 %v9425_v0, %v612_v52 }
  0xab   : >> { %v891_v57 = vmul.f32 %v9389_v30, %v607_v53  ;;  %1078 = vperm.xlu0 %8947, %v6300_v51   ;;  %v640_v13 = vmul.f32 %v9425_v0, %v607_v53 }
  0xac   : >> { %v898_v59 = vadd.f32 %v892_v56, %v880_v54 }
  0xad   : >> { %v897_v60 = vadd.f32 %v891_v57, %v879_v55  ;;  %v497_v62 = vpop.permute.xlu1 %496  ;;  %v9457_v55 = vld [vmem:[%s10909_s1 + $0x6] ss:$0 sm:$0xff] }
  0xae   : >> { %v492_v63 = vpop.permute.xlu0 %491  ;;  %v526_v2 = vmul.f32 %v9415_v58, %v497_v62 }
  0xaf   : >> { %v525_v4 = vmul.f32 %v9415_v58, %v492_v63 }
  0xb0   : >> { %v532_v8 = vadd.f32 %v526_v2, %v476_v46 }
  0xb1   : >> { %v531_v9 = vadd.f32 %v525_v4, %v475_v40  ;;  %v668_v19 = vpop.permute.xlu1 %667 }
  0xb2   : >> { %v663_v20 = vpop.permute.xlu0 %662  ;;  %v591_v21 = vadd.f32 %v585_v6, %v532_v8  ;;  %v697_v23 = vmul.f32 %v9432_v5, %v668_v19  ;;  %v904_v24 = vmul.f32 %v9415_v58, %v668_v19 }
  0xb3   : >> { %v590_v22 = vadd.f32 %v584_v7, %v531_v9  ;;  %v696_v25 = vmul.f32 %v9432_v5, %v663_v20  ;;  %v903_v26 = vmul.f32 %v9415_v58, %v663_v20 }
  0xb4   : >> { %v647_v27 = vadd.f32 %v641_v12, %v591_v21  ;;  %v910_v28 = vadd.f32 %v904_v24, %v898_v59 }
  0xb5   : >> { %v646_v32 = vadd.f32 %v640_v13, %v590_v22  ;;  %v909_v34 = vadd.f32 %v903_v26, %v897_v60  ;;  %v395_v35 = vpop.permute.xlu1 %394 }
  0xb6   : >> { %v390_v36 = vpop.permute.xlu0 %389  ;;  %v703_v37 = vadd.f32 %v697_v23, %v647_v27  ;;  %v416_v41 = vmul.f32 %v9394_v31, %v395_v35 }
  0xb7   : >> { %v702_v38 = vadd.f32 %v696_v25, %v646_v32  ;;  %v415_v42 = vmul.f32 %v9394_v31, %v390_v36 }
  0xb9   : >> { %v451_v39 = vpop.permute.xlu1 %450 }
  0xba   : >> { %v446_v40 = vpop.permute.xlu0 %445  ;;  %v472_v43 = vmul.f32 %v9389_v30, %v451_v39 }
  0xbb   : >> { %v471_v44 = vmul.f32 %v9389_v30, %v446_v40 }
  0xbc   : >> { %v478_v45 = vadd.f32 %v472_v43, %v416_v41 }
  0xbd   : >> { %v477_v46 = vadd.f32 %v471_v44, %v415_v42  ;;  %v566_v47 = vpop.permute.xlu1 %565 }
  0xbe   : >> { %v561_v48 = vpop.permute.xlu0 %560  ;;  %v882_v51 = vmul.f32 %v9394_v31, %v566_v47  ;;  %v587_v21 = vmul.f32 %v9420_v61, %v566_v47 }
  0xbf   : >> { %v881_v52 = vmul.f32 %v9394_v31, %v561_v48  ;;  %v586_v22 = vmul.f32 %v9420_v61, %v561_v48 }
  0xc1   : >> { %v622_v49 = vpop.permute.xlu1 %621 }
  0xc2   : >> { %v617_v50 = vpop.permute.xlu0 %616  ;;  %v894_v53 = vmul.f32 %v9389_v30, %v622_v49  ;;  %v643_v25 = vmul.f32 %v9425_v0, %v622_v49 }
  0xc3   : >> { %v893_v54 = vmul.f32 %v9389_v30, %v617_v50 }
  0xc4   : >> { %v900_v56 = vadd.f32 %v894_v53, %v882_v51 }
  0xc5   : >> { %v899_v57 = vadd.f32 %v893_v54, %v881_v52  ;;  %v727_v59 = vpop.permute.xlu1 %726 }
  0xc6   : >> { %v722_v60 = vpop.permute.xlu0 %721  ;;  %v756_v62 = vmul.f32 %v9457_v55, %v727_v59  ;;  %v916_v63 = vmul.f32 %v9420_v61, %v727_v59 }
  0xc7   : >> { %v755_v2 = vmul.f32 %v9457_v55, %v722_v60  ;;  %v915_v4 = vmul.f32 %v9420_v61, %v722_v60 }
  0xc8   : >> { %v9463_v6 = vadd.f32 %v756_v62, %v703_v37  ;;  %v9465_v7 = vadd.f32 %v916_v63, %v910_v28  ;;  %v642_v28 = vmul.f32 %v9425_v0, %v617_v50 }
  0xc9   : >> { %v9467_v8 = vadd.f32 %v755_v2, %v702_v38  ;;  %v9469_v9 = vadd.f32 %v915_v4, %v909_v34  ;;  %v507_v12 = vpop.permute.xlu1 %506 }
  0xca   : >> { %v502_v13 = vpop.permute.xlu0 %501  ;;  %v528_v19 = vmul.f32 %v9415_v58, %v507_v12 }
  0xcb   : >> { %v527_v20 = vmul.f32 %v9415_v58, %v502_v13 }
  0xcc   : >> { %v534_v23 = vadd.f32 %v528_v19, %v478_v45 }
  0xcd   : >> { %v533_v24 = vadd.f32 %v527_v20, %v477_v46  ;;  %v678_v26 = vpop.permute.xlu1 %677 }
  0xce   : >> { %v673_v27 = vpop.permute.xlu0 %672  ;;  %v593_v32 = vadd.f32 %v587_v21, %v534_v23  ;;  %v906_v35 = vmul.f32 %v9415_v58, %v678_v26  ;;  %v699_v36 = vmul.f32 %v9432_v5, %v678_v26 }
  0xcf   : >> { %v592_v34 = vadd.f32 %v586_v22, %v533_v24  ;;  %v905_v37 = vmul.f32 %v9415_v58, %v673_v27  ;;  %v698_v41 = vmul.f32 %v9432_v5, %v673_v27 }
  0xd0   : >> { %v649_v38 = vadd.f32 %v643_v25, %v593_v32  ;;  %v9480_v39 = vadd.f32 %v906_v35, %v900_v56 }
  0xd1   : >> { %v648_v40 = vadd.f32 %v642_v28, %v592_v34  ;;  %v9483_v42 = vadd.f32 %v905_v37, %v899_v57  ;;  %v783_v43 = vpop.permute.xlu1 %782 }
  0xd2   : >> { %v9485_v44 = vpop.permute.xlu0 %777  ;;  %v9487_v45 = vadd.f32 %v699_v36, %v649_v38 }
  0xd3   : >> { %v9489_v46 = vadd.f32 %v698_v41, %v648_v40 }
  0xd5   : >> { %v405_v47 = vpop.permute.xlu1 %404 }
  0xd6   : >> { %v400_v48 = vpop.permute.xlu0 %399  ;;  %v418_v51 = vmul.f32 %v9394_v31, %v405_v47 }
  0xd7   : >> { %v417_v52 = vmul.f32 %v9394_v31, %v400_v48 }
  0xd9   : >> { %v461_v49 = vpop.permute.xlu1 %460 }
  0xda   : >> { %v456_v50 = vpop.permute.xlu0 %455  ;;  %v474_v53 = vmul.f32 %v9389_v30, %v461_v49 }
  0xdb   : >> { %v473_v54 = vmul.f32 %v9389_v30, %v456_v50 }
  0xdc   : >> { %v480_v56 = vadd.f32 %v474_v53, %v418_v51 }
  0xdd   : >> { %v479_v57 = vadd.f32 %v473_v54, %v417_v52  ;;  %v9495_v59 = vpop.permute.xlu1 %575 }
  0xde   : >> { %v9497_v60 = vpop.permute.xlu0 %570  ;;  %v589_v23 = vmul.f32 %v9420_v61, %v9495_v59 }
  0xdf   : >> { %v588_v24 = vmul.f32 %v9420_v61, %v9497_v60 }
  0xe1   : >> { %v632_v62 = vpop.permute.xlu1 %631 }
  0xe2   : >> { %v9499_v63 = vpop.permute.xlu0 %626  ;;  %v645_v32 = vmul.f32 %v9425_v0, %v632_v62 }
  0xe3   : >> { %v644_v34 = vmul.f32 %v9425_v0, %v9499_v63 }
  0xe5   : >> { %v9501_v2 = vpop.permute.xlu1 %736 }
  0xe6   : >> { %v9503_v4 = vpop.permute.xlu0 %731 }
  0xe9   : >> { %v839_v12 = vpop.permute.xlu1 %838 }
  0xea   : >> { %v834_v13 = vpop.permute.xlu0 %833 }
  0xeb   : >> { %v867_v1 = vmul.f32 %v9556_v10, %v834_v13 }
  0xed   : >> { %v517_v19 = vpop.permute.xlu1 %516 }
  0xee   : >> { %v512_v20 = vpop.permute.xlu0 %511  ;;  %v530_v21 = vmul.f32 %v9415_v58, %v517_v19 }
  0xef   : >> { %v529_v22 = vmul.f32 %v9415_v58, %v512_v20 }
  0xf0   : >> { %v536_v25 = vadd.f32 %v530_v21, %v480_v56  ;;  %v928_v56 = vmul.f32 %v9425_v0, %v783_v43  ;;  %v9544_v21 = vld [vmem:[%s10909_s1 + $0x7] ss:$0 sm:$0xff] }
  0xf1   : >> { %v535_v26 = vadd.f32 %v529_v22, %v479_v57  ;;  %v9511_v27 = vpop.permute.xlu1 %687  ;;  %v927_v57 = vmul.f32 %v9425_v0, %v9485_v44  ;;  %v940_v22 = vmul.f32 %v9432_v5, %v839_v12 }
  0xf2   : >> { %v9513_v28 = vpop.permute.xlu0 %682  ;;  %v595_v35 = vadd.f32 %v589_v23, %v536_v25  ;;  %v939_v23 = vmul.f32 %v9432_v5, %v834_v13 }
  0xf3   : >> { %v594_v36 = vadd.f32 %v588_v24, %v535_v26  ;;  %v934_v24 = vadd.f32 %v928_v56, %v9465_v7  ;;  %v933_v25 = vadd.f32 %v927_v57, %v9469_v9  ;;  %v811_v9 = vmul.f32 %v9544_v21, %v9485_v44 }
  0xf4   : >> { %v9518_v37 = vadd.f32 %v645_v32, %v595_v35  ;;  %v896_v56 = vmul.f32 %v9389_v30, %v632_v62  ;;  %v868_v57 = vmul.f32 %v9556_v10, %v839_v12  ;;  %v918_v62 = vmul.f32 %v9420_v61, %v9501_v2 }
  0xf5   : >> { %v9520_v38 = vadd.f32 %v644_v34, %v594_v36  ;;  %v9522_v40 = vpop.permute.xlu1 %792  ;;  %v812_v34 = vmul.f32 %v9544_v21, %v783_v43  ;;  %v946_v33 = vadd.f32 %v940_v22, %v934_v24  ;;  %v945_v29 = vadd.f32 %v939_v23, %v933_v25 }
  0xf6   : >> { %v9524_v41 = vpop.permute.xlu0 %787  ;;  %v817_v44 = vadd.f32 %v811_v9, %v9467_v8  ;;  %v883_v8 = vmul.f32 %v9394_v31, %v9497_v60 }
  0xf7   : >> { %v818_v43 = vadd.f32 %v812_v34, %v9463_v6  ;;  %v758_v6 = vmul.f32 %v9457_v55, %v9501_v2  ;;  %v930_v2 = vmul.f32 %v9425_v0, %v9522_v40 }
  0xf8   : >> { %v873_v25 = vadd.f32 %v867_v1, %v817_v44  ;;  %v929_v1 = vmul.f32 %v9425_v0, %v9524_v41 }
  0xf9   : >> { %v968_v47 = vpop.permute.xlu1 %967  ;;  %v874_v13 = vadd.f32 %v868_v57, %v818_v43  ;;  %v764_v9 = vadd.f32 %v758_v6, %v9487_v45  ;;  %v701_v45 = vmul.f32 %v9432_v5, %v9511_v27 }
  0xfa   : >> { %v963_v48 = vpop.permute.xlu0 %962  ;;  %v991_v26 = vmul.f32 %v9457_v55, %v968_v47 }
  0xfb   : >> { %v990_v32 = vmul.f32 %v9457_v55, %v963_v48 }
  0xfc   : >> { %v997_v47 = vadd.f32 %v991_v26, %v946_v33  ;;  %v895_v33 = vmul.f32 %v9389_v30, %v9499_v63 }
  0xfd   : >> { %v9526_v49 = vpop.permute.xlu1 %746  ;;  %v996_v48 = vadd.f32 %v990_v32, %v945_v29  ;;  %v884_v29 = vmul.f32 %v9394_v31, %v9495_v59  ;;  %v917_v59 = vmul.f32 %v9420_v61, %v9503_v4  ;;  %v924_v31 = vadd.f32 %v918_v62, %v9480_v39 }
  0xfe   : >> { %v9528_v50 = vpop.permute.xlu0 %741  ;;  %v901_v32 = vadd.f32 %v895_v33, %v883_v8  ;;  %v700_v39 = vmul.f32 %v9432_v5, %v9513_v28 }
  0xff   : >> { %v902_v26 = vadd.f32 %v896_v56, %v884_v29 }
 0x101   : >> { %v9530_v51 = vpop.permute.xlu1 %848 }
 0x102   : >> { %v9532_v52 = vpop.permute.xlu0 %843 }
 0x105   : >> { %v1016_v53 = vpop.permute.xlu1 %1015 }
 0x106   : >> { %v1011_v54 = vpop.permute.xlu0 %1010  ;;  %v1039_v3 = vmul.f32 %v9544_v21, %v1016_v53 }
 0x107   : >> { %v1038_v7 = vmul.f32 %v9544_v21, %v1011_v54 }
 0x108   : >> { %v1045_v23 = vadd.f32 %v1039_v3, %v997_v47  ;;  %v757_v3 = vmul.f32 %v9457_v55, %v9503_v4  ;;  %v923_v4 = vadd.f32 %v917_v59, %v9483_v42  ;;  %v908_v47 = vmul.f32 %v9415_v58, %v9511_v27 }
 0x109   : >> { %v9537_v19 = vpop.permute.xlu1 %802  ;;  %v1044_v24 = vadd.f32 %v1038_v7, %v996_v48  ;;  %v907_v48 = vmul.f32 %v9415_v58, %v9513_v28  ;;  %v941_v42 = vmul.f32 %v9432_v5, %v9532_v52  ;;  %v813_v58 = vmul.f32 %v9544_v21, %v9524_v41 }
 0x10a   : >> { %v9539_v20 = vpop.permute.xlu0 %797  ;;  %v763_v60 = vadd.f32 %v757_v3, %v9489_v46  ;;  %v942_v46 = vmul.f32 %v9432_v5, %v9530_v51  ;;  %v914_v44 = vadd.f32 %v908_v47, %v902_v26  ;;  %v932_v59 = vmul.f32 %v9425_v0, %v9537_v19 }
 0x10b   : >> { %v913_v29 = vadd.f32 %v907_v48, %v901_v32  ;;  %v760_v26 = vmul.f32 %v9457_v55, %v9526_v49 }
 0x10c   : >> { %v819_v8 = vadd.f32 %v813_v58, %v763_v60 }
 0x10d   : >> { %v978_v35 = vpop.permute.xlu1 %977 }
 0x10e   : >> { %v973_v36 = vpop.permute.xlu0 %972  ;;  %v993_v27 = vmul.f32 %v9457_v55, %v978_v35 }
 0x10f   : >> { %v992_v28 = vmul.f32 %v9457_v55, %v973_v36 }
 0x111   : >> { %v1064_v18 = vpop.permute.xlu1 %1063 }
 0x112   : >> { %v1059_v22 = vpop.permute.xlu0 %1058  ;;  %v1087_v53 = vmul.f32 %v9556_v10, %v1064_v18 }
 0x113   : >> { %v1086_v54 = vmul.f32 %v9556_v10, %v1059_v22  ;;  %v814_v22 = vmul.f32 %v9544_v21, %v9522_v40  ;;  %v920_v40 = vmul.f32 %v9420_v61, %v9526_v49 }
 0x114   : >> { %v1093_v18 = vadd.f32 %v1087_v53, %v1045_v23  ;;  %v936_v23 = vadd.f32 %v930_v2, %v924_v31  ;;  %v10929_v53 = vmov 0.0|0.0   ;;  %v931_v2 = vmul.f32 %v9425_v0, %v9539_v20 }
 0x115   : >> { %v1092_v12 = vadd.f32 %v1086_v54, %v1044_v24  ;;  %v9583_v30 = vpop.permute.xlu1 %858  ;;  %v935_v24 = vadd.f32 %v929_v1, %v923_v4  ;;  %v707_v54 = vadd.f32 %v701_v45, %v9518_v37  ;;  %v820_v36 = vadd.f32 %v814_v22, %v764_v9 }
 0x116   : >> { %v9585_v63 = vpop.permute.xlu0 %853  ;;  %v1099_v7 = vmax.f32 %v874_v13, %v1093_v18  ;;  %v948_v6 = vadd.f32 %v942_v46, %v936_v23  ;;  %v919_v18 = vmul.f32 %v9420_v61, %v9528_v50  ;;  %v870_v37 = vmul.f32 %v9556_v10, %v9530_v51 }
 0x117   : >> { %v1098_v34 = vmax.f32 %v873_v25, %v1092_v12  ;;  %v947_v62 = vadd.f32 %v941_v42, %v935_v24  ;;  %v869_v12 = vmul.f32 %v9556_v10, %v9532_v52  ;;  %v926_v32 = vadd.f32 %v920_v40, %v914_v44 }
 0x118   : >> { %v999_v13 = vadd.f32 %v993_v27, %v948_v6  ;;  %v944_v61 = vmul.f32 %v9432_v5, %v9583_v30  ;;  %v925_v60 = vadd.f32 %v919_v18, %v913_v29  ;;  %v876_v1 = vadd.f32 %v870_v37, %v820_v36 }
 0x119   : >> { %v1026_v43 = vpop.permute.xlu1 %1025  ;;  %v8686_v57 = vpack.c.bf16 %v1099_v7, %v1098_v34  ;;  %v998_v25 = vadd.f32 %v992_v28, %v947_v62  ;;  %v875_v4 = vadd.f32 %v869_v12, %v819_v8  ;;  %v943_v49 = vmul.f32 %v9432_v5, %v9585_v63 }
 0x11a   : >> { %v1021_v56 = vpop.permute.xlu0 %1020  ;;  %v1041_v3 = vmul.f32 %v9544_v21, %v1026_v43  ;;  %v938_v47 = vadd.f32 %v932_v59, %v926_v32  ;;  %v937_v45 = vadd.f32 %v931_v2, %v925_v60  ;;  %v706_v27 = vadd.f32 %v700_v39, %v9520_v38  ;;  %v10932_v2 = vld [vmem:[#allocation5_spill] sm:$0xff] }
 0x11b   : >> { %8687 = vmatpush3.bf16.msra.mxu0 %v8686_v57  ;;  %8697 = vmatpush3.bf16.msra.mxu1 %v8686_v57  ;;  %v1040_v35 = vmul.f32 %v9544_v21, %v1021_v56  ;;  %v759_v56 = vmul.f32 %v9457_v55, %v9528_v50  ;;  %v816_v57 = vmul.f32 %v9544_v21, %v9537_v19 }
 0x11c   : >> { %8688 = vmatprep.subr.bf16.mxu0 %v10929_v53  ;;  %8698 = vmatprep.subr.bf16.mxu1 %v10929_v53  ;;  %v1047_v7 = vadd.f32 %v1041_v3, %v999_v13  ;;  %v950_v22 = vadd.f32 %v944_v61, %v938_v47  ;;  %v815_v28 = vmul.f32 %v9544_v21, %v9539_v20 }
 0x11d   : >> { %v988_v33 = vpop.permute.xlu1 %987  ;;  %v1046_v52 = vadd.f32 %v1040_v35, %v998_v25  ;;  %v949_v44 = vadd.f32 %v943_v49, %v937_v45  ;;  %v766_v29 = vadd.f32 %v760_v26, %v707_v54  ;;  %v872_v19 = vmul.f32 %v9556_v10, %v9583_v30 }
 0x11e   : >> { %v983_v41 = vpop.permute.xlu0 %982  ;;  %v995_v0 = vmul.f32 %v9457_v55, %v988_v33  ;;  %v765_v33 = vadd.f32 %v759_v56, %v706_v27 }
 0x11f   : >> { %v994_v46 = vmul.f32 %v9457_v55, %v983_v41  ;;  %v871_v41 = vmul.f32 %v9556_v10, %v9585_v63  ;;  %v822_v3 = vadd.f32 %v816_v57, %v766_v29  ;;  %v9682_v57 = vld [vmem:[%s10912_s4] ss:$0 sm:$0xff] (%p363_p4) }
 0x120   : >> { %v1001_v55 = vadd.f32 %v995_v0, %v950_v22 }
 0x121   : >> { %v1074_v51 = vpop.permute.xlu1 %1073  ;;  %v1000_v6 = vadd.f32 %v994_v46, %v949_v44  ;;  %v878_v30 = vadd.f32 %v872_v19, %v822_v3 }
 0x122   : >> { %v1069_v34 = vpop.permute.xlu0 %1068  ;;  %v1089_v9 = vmul.f32 %v9556_v10, %v1074_v51 }
 0x123   : >> { %v1088_v31 = vmul.f32 %v9556_v10, %v1069_v34 }
 0x124   : >> { %v1095_v48 = vadd.f32 %v1089_v9, %v1047_v7 }
 0x125   : >> { %v1094_v43 = vadd.f32 %v1088_v31, %v1046_v52  ;;  %v1036_v42 = vpop.permute.xlu1 %1035 }
 0x126   : >> { %v1101_v23 = vmax.f32 %v876_v1, %v1095_v48  ;;  %v1043_v5 = vmul.f32 %v9544_v21, %v1036_v42  ;;  %v1031_v24 = vpop.permute.xlu0 %1030 }
 0x127   : >> { %v1100_v58 = vmax.f32 %v875_v4, %v1094_v43  ;;  %v1042_v50 = vmul.f32 %v9544_v21, %v1031_v24  ;;  %v821_v21 = vadd.f32 %v815_v28, %v765_v33 }
 0x128   : >> { %v1049_v38 = vadd.f32 %v1043_v5, %v1001_v55 }
 0x129   : >> { %v8689_v40 = vpack.c.bf16 %v1101_v23, %v1100_v58  ;;  %v1084_v62 = vpop.permute.xlu1 %1083  ;;  %v1048_v54 = vadd.f32 %v1042_v50, %v1000_v6  ;;  %v877_v63 = vadd.f32 %v871_v41, %v821_v21 }
 0x12a   : >> { %v1091_v39 = vmul.f32 %v9556_v10, %v1084_v62  ;;  %v1079_v20 = vpop.permute.xlu0 %1078 }
 0x12b   : >> { %8690 = vmatpush3.bf16.msra.mxu0 %v8689_v40  ;;  %8700 = vmatpush3.bf16.msra.mxu1 %v8689_v40  ;;  %v1090_v35 = vmul.f32 %v9556_v10, %v1079_v20  ;;  %v10930_v10 = vmov 0.0  }
 0x12c   : >> { %8691 = vmatprep.subr.bf16.mxu0 %v10929_v53  ;;  %8701 = vmatprep.subr.bf16.mxu1 %v10929_v53  ;;  %v1097_v36 = vadd.f32 %v1091_v39, %v1049_v38  ;;  %v10931_v53 = vld [vmem:[#allocation7_spill] sm:$0xff] }
 0x12d   : >> { %v1096_v18 = vadd.f32 %v1090_v35, %v1048_v54 }
 0x12e   : >> { %v1103_v37 = vmax.f32 %v878_v30, %v1097_v36 }
 0x12f   : >> { %v1102_v12 = vmax.f32 %v877_v63, %v1096_v18 }
 0x131   : >> { %v8692_v8 = vpack.c.bf16 %v1103_v37, %v1102_v12 }
 0x133   : >> { %8694 = vmatpush3.bf16.msk.msra.mxu0 %vm8693_vm9, %v8692_v8  ;;  %8704 = vmatpush3.bf16.msk.msra.mxu1 %vm8693_vm9, %v8692_v8 }
 0x136   : >> { %7538 = vmatmul.mubr.msk.f32.vlgmr.msra.gmra.mrb[0].mxu0 %vm1104_vm10, %v9289_v11  ;;  %7559 = vmatmul.mubr.msk.f32.vlgmr.msra.gmra.mrb[0].mxu1 %vm1104_vm10, %v9303_v16 }
 0x137   : >> { %7540 = vmatprep.mubr.msk.f32.mxu0 %vm9204_vm6, %v10930_v10  ;;  %7561 = vmatprep.mubr.msk.f32.mxu1 %vm9204_vm6, %v10930_v10 }
 0x13a   : >> { %7541 = vmatmul.mubr.msk.f32.gmra.mrb[2].mxu0 %vm1104_vm10, %v9294_v14  ;;  %7562 = vmatmul.mubr.msk.f32.gmra.mrb[2].mxu1 %vm1104_vm10, %v9306_v17 }
 0x13b   : >> { %7543 = vmatprep.mubr.msk.f32.mxu0 %vm9204_vm6, %v10930_v10  ;;  %7564 = vmatprep.mubr.msk.f32.mxu1 %vm9204_vm6, %v10930_v10 }
 0x13e   : >> { %7544 = vmatmul.mubr.msk.f32.gmra.mrb[4].mxu0 %vm1104_vm10, %v9297_v15  ;;  %7565 = vmatmul.mubr.msk.f32.gmra.mrb[4].mxu1 %vm1104_vm10, %v10931_v53 }
 0x209   : >> { %v1184_v59 = vpop.f32.mrb[0].mxu0  ;;  %v1273_v13 = vpop.f32.mrb[0].mxu1 }
 0x20a   : >> { %v1287_v25 = vmax.f32 %v1184_v59, %v1273_v13  ;;  %v7539_v26 = vpop.f32.mrb[1].mxu0  ;;  %v7560_v32 = vpop.f32.mrb[1].mxu1 }
 0x20c   : >> { %v1296_v61 = vadd.f32 %v10932_v2, %v1287_v25 }
 0x20d   : >> { %v1189_v51 = vpop.f32.mrb[2].mxu0  ;;  %v1278_v34 = vpop.f32.mrb[2].mxu1 }
 0x20e   : >> { %v1299_v7 = vmax.f32 %v1296_v61, 0.0  ;;  %v1288_v52 = vmax.f32 %v1189_v51, %v1278_v34  ;;  %v7542_v9 = vpop.f32.mrb[3].mxu0  ;;  %v7563_v31 = vpop.f32.mrb[3].mxu1 }
 0x210   : >> { %1304 = vst [vmem:[%s1303_s26] sm:$0xff] %v1299_v7  ;;  %v1297_v60 = vadd.f32 %v10932_v2, %v1288_v52 }
 0x211   : >> { %v1194_v1 = vpop.f32.mrb[4].mxu0  ;;  %v1283_v4 = vpop.f32.mrb[4].mxu1 }
 0x212   : >> { %v1300_v49 = vmax.f32 %v1297_v60, 0.0  ;;  %v1289_v47 = vmax.f32 %v1194_v1, %v1283_v4  ;;  %v7545_v0 = vpop.f32.mrb[5].mxu0  ;;  %v7566_v48 = vpop.f32.mrb[5].mxu1  ;;  %365 = sbr.rel (!%p363_p4) target bundleno = 26 (0x1a), region = 157 }
 0x214   : >> { %1305 = vst [vmem:[%s1303_s26 + $0x8] sm:$0xff] %v1300_v49  ;;  %v1298_v43 = vadd.f32 %v10932_v2, %v1289_v47 }
 0x216   : >> { %v1301_v56 = vmax.f32 %v1298_v43, 0.0 }
 0x218   : >> { %1306 = vst [vmem:[%s1303_s26 + $0x10] sm:$0x3f] %v1301_v56 }
 0x219 LB: >> { %v8949_v45 = vld [vmem:[%s10911_s3 + $0x40] sm:$0xff]   ;;  %v8950_v15 = vld [vmem:[%s10911_s3 + $0x48] sm:$0xff]   ;;  %s6312_s19 = smul.u32 48, %s9195_s29  ;;  %v8951_v46 = vld [vmem:[%s10911_s3 + $0x50] sm:$0xff]   ;;  %vm2879_vm11 = vcmask 162816   ;;  %s9195_s29 = sphi %s9684_s29, %s1313_s29  }
 0x21a   : >> { %7567 = vmatprep.subr.bf16.mxu0 %v8949_v45  ;;  %7747 = vmatprep.subr.bf16.mxu1 %v8949_v45  ;;  %v8952_v42 = vld [vmem:[%s10911_s3 + $0x58] sm:$0xff]   ;;  %v8953_v28 = vld [vmem:[%s10911_s3 + $0x60] sm:$0xff]   ;;  %v8954_v44 = vld [vmem:[%s10911_s3 + $0x68] sm:$0xff]  }
 0x21b   : >> { %7568 = vmatpush3.bf16.msra.mxu0 %v8949_v45  ;;  %7748 = vmatpush3.bf16.msra.mxu1 %v8949_v45  ;;  %s9702_s21 = scalar_lea.vmem [#allocation2], %s6312_s19  ;;  %v8955_v50 = vld [vmem:[%s10911_s3 + $0x70] sm:$0xff]   ;;  %v8956_v29 = vld [vmem:[%s10911_s3 + $0x78] sm:$0xff]   ;;  %v8957_v40 = vld [vmem:[%s10911_s3] sm:$0xff]  }
 0x21c   : >> { %7569 = vmatprep.subr.bf16.mxu0 %v8950_v15  ;;  %7749 = vmatprep.subr.bf16.mxu1 %v8950_v15  ;;  %v8958_v39 = vld [vmem:[%s10911_s3 + $0x8] sm:$0xff]   ;;  %v8959_v54 = vld [vmem:[%s10911_s3 + $0x10] sm:$0xff]   ;;  %v8960_v35 = vld [vmem:[%s10911_s3 + $0x18] sm:$0xff]  }
 0x21d   : >> { %v8961_v30 = vld [vmem:[%s10911_s3 + $0x20] sm:$0xff]   ;;  %v8962_v36 = vld [vmem:[%s10911_s3 + $0x28] sm:$0xff]   ;;  %v8963_v63 = vld [vmem:[%s10911_s3 + $0x30] sm:$0xff]  }
 0x21e   : >> { %v8964_v18 = vld [vmem:[%s10911_s3 + $0x38] sm:$0xff]   ;;  %v8965_v12 = vld [vmem:[%s10911_s3 + $0x80] sm:$0xff]   ;;  %v8966_v32 = vld [vmem:[%s10911_s3 + $0x88] sm:$0xff]  }
 0x21f   : >> { %7570 = vmatpush3.bf16.msra.mxu0 %v8950_v15  ;;  %7750 = vmatpush3.bf16.msra.mxu1 %v8950_v15  ;;  %v1338_v22 = vld [vmem:[%s9702_s21 + $0x1] sm:$0xff]  ;;  %v1339_v23 = vld [vmem:[%s9702_s21 + $0x9] sm:$0xff]  ;;  %v6398_v5 = vld [vmem:[%s9702_s21 + $0x19] sm:$0xff] }
 0x220   : >> { %7571 = vmatprep.subr.bf16.mxu0 %v8951_v46  ;;  %7751 = vmatprep.subr.bf16.mxu1 %v8951_v46  ;;  %v1341_v58 = vpack.c.bf16 %v1339_v23, %v1338_v22  ;;  %v6399_v24 = vld [vmem:[%s9702_s21 + $0x21] sm:$0xff]  ;;  %v1340_v19 = vld [vmem:[%s9702_s21 + $0x11] sm:$0xf]  ;;  %v6400_v55 = vld [vmem:[%s9702_s21 + $0x29] sm:$0xf] }
 0x221   : >> { %v9708_v27 = vpack.c.bf16 %v6399_v24, %v6398_v5  ;;  %v1317_v33 = vld [vmem:[%s9702_s21] sm:$0xff]  ;;  %v1342_v41 = vpack.c.bf16 %v1340_v19, %v1340_v19  ;;  %v9729_v6 = vpack.c.bf16 %v6400_v55, %v6400_v55  ;;  %v1318_v62 = vld [vmem:[%s9702_s21 + $0x8] sm:$0xff]  ;;  %v6371_v3 = vld [vmem:[%s9702_s21 + $0x18] sm:$0xff] }
 0x222   : >> { %7583 = vmatprep.mubr.bf16.mxu0 %v1341_v58  ;;  %v6372_v38 = vld [vmem:[%s9702_s21 + $0x20] sm:$0xff]  ;;  %v1320_v20 = vpack.c.bf16 %v1318_v62, %v1317_v33  ;;  %v1319_v37 = vld [vmem:[%s9702_s21 + $0x10] sm:$0xf]  ;;  %v6373_v8 = vld [vmem:[%s9702_s21 + $0x28] sm:$0xf] }
 0x223   : >> { %7572 = vmatpush3.bf16.msra.mxu0 %v8951_v46  ;;  %7752 = vmatpush3.bf16.msra.mxu1 %v8951_v46  ;;  %v9737_v21 = vpack.c.bf16 %v6372_v38, %v6371_v3  ;;  %v1552_v10 = vld [vmem:[%s9702_s21 + $0x2] sm:$0xff]  ;;  %v1553_v53 = vld [vmem:[%s9702_s21 + $0xa] sm:$0xff]  ;;  %v6425_v59 = vld [vmem:[%s9702_s21 + $0x1a] sm:$0xff]  ;;  %v1321_v25 = vpack.c.bf16 %v1319_v37, %v1319_v37  ;;  %v9768_v26 = vpack.c.bf16 %v6373_v8, %v6373_v8 }
 0x224   : >> { %7573 = vmatprep.subr.bf16.mxu0 %v8952_v42  ;;  %7753 = vmatprep.subr.bf16.mxu1 %v8952_v42  ;;  %v6426_v13 = vld [vmem:[%s9702_s21 + $0x22] sm:$0xff]  ;;  %v1555_v2 = vpack.c.bf16 %v1553_v53, %v1552_v10  ;;  %v8967_v51 = vld [vmem:[%s10911_s3 + $0x90] sm:$0xff]   ;;  %v8968_v34 = vld [vmem:[%s10911_s3 + $0x98] sm:$0xff]  }
 0x225   : >> { %7763 = vmatprep.mubr.bf16.mxu1 %v9708_v27  ;;  %v9773_v61 = vpack.c.bf16 %v6426_v13, %v6425_v59  ;;  %v8969_v7 = vld [vmem:[%s10911_s3 + $0xa0] sm:$0xff]   ;;  %v8970_v52 = vld [vmem:[%s10911_s3 + $0xa8] sm:$0xff]   ;;  %v8971_v9 = vld [vmem:[%s10911_s3 + $0xb0] sm:$0xff]  }
 0x226   : >> { %v8972_v31 = vld [vmem:[%s10911_s3 + $0xb8] sm:$0xff]   ;;  %v1554_v60 = vld [vmem:[%s9702_s21 + $0x12] sm:$0xf]  ;;  %v6427_v1 = vld [vmem:[%s9702_s21 + $0x2a] sm:$0xf] }
 0x227   : >> { %7574 = vmatpush3.bf16.msra.mxu0 %v8952_v42  ;;  %7754 = vmatpush3.bf16.msra.mxu1 %v8952_v42  ;;  %v8973_v4 = vld [vmem:[%s10911_s3 + $0xc0] sm:$0xff]   ;;  %v1556_v49 = vpack.c.bf16 %v1554_v60, %v1554_v60  ;;  %v9800_v47 = vpack.c.bf16 %v6427_v1, %v6427_v1  ;;  %v6454_v0 = vld [vmem:[%s9702_s21 + $0x30] sm:$0xff]  ;;  %v6455_v48 = vld [vmem:[%s9702_s21 + $0x38] sm:$0xff] }
 0x228   : >> { %7575 = vmatprep.subr.bf16.mxu0 %v8953_v28  ;;  %7755 = vmatprep.subr.bf16.mxu1 %v8953_v28  ;;  %v8974_v43 = vld [vmem:[%s10911_s3 + $0xc8] sm:$0xff]   ;;  %v9807_v56 = vpack.c.bf16 %v6455_v48, %v6454_v0  ;;  %v8975_v45 = vld [vmem:[%s10911_s3 + $0xd0] sm:$0xff]   ;;  %v8976_v15 = vld [vmem:[%s10911_s3 + $0xd8] sm:$0xff]  }
 0x229   : >> { %v8977_v46 = vld [vmem:[%s10911_s3 + $0xe0] sm:$0xff]   ;;  %v8978_v42 = vld [vmem:[%s10911_s3 + $0xe8] sm:$0xff]   ;;  %v8979_v22 = vld [vmem:[%s10911_s3 + $0xf0] sm:$0xff]  }
 0x22a   : >> { %v8980_v23 = vld [vmem:[%s10911_s3 + $0xf8] sm:$0xff]   ;;  %v6456_v58 = vld [vmem:[%s9702_s21 + $0x40] sm:$0xf]  ;;  %v8983_v19 = vld [vmem:[%s10911_s3 + $0x110] sm:$0xff]  }
 0x22b   : >> { %7576 = vmatpush3.bf16.msra.mxu0 %v8953_v28  ;;  %7756 = vmatpush3.bf16.msra.mxu1 %v8953_v28  ;;  %v8981_v5 = vld [vmem:[%s10911_s3 + $0x100] sm:$0xff]   ;;  %v9834_v24 = vpack.c.bf16 %v6456_v58, %v6456_v58  ;;  %v6481_v28 = vld [vmem:[%s9702_s21 + $0x31] sm:$0xff]  ;;  %v6537_v10 = vld [vmem:[%s9702_s21 + $0x48] sm:$0xff] }
 0x22c   : >> { %7577 = vmatprep.subr.bf16.mxu0 %v8954_v44  ;;  %7757 = vmatprep.subr.bf16.mxu1 %v8954_v44  ;;  %v8984_v55 = vld [vmem:[%s10911_s3 + $0x118] sm:$0xff]   ;;  %v8987_v33 = vld [vmem:[%s10911_s3 + $0x130] sm:$0xff]   ;;  %v6483_v62 = vld [vmem:[%s9702_s21 + $0x41] sm:$0xf] }
 0x22d   : >> { %v8989_v3 = vld [vmem:[%s10911_s3 + $0x140] sm:$0xff]   ;;  %v9869_v38 = vpack.c.bf16 %v6483_v62, %v6483_v62  ;;  %v6538_v53 = vld [vmem:[%s9702_s21 + $0x50] sm:$0xff]  ;;  %v8998_v59 = vld [vmem:[%s10911_s3 + $0x188] sm:$0xff]  }
 0x22e   : >> { %v6510_v37 = vld [vmem:[%s9702_s21 + $0x42] sm:$0xf]  ;;  %v2711_v13 = vpack.c.bf16 %v6538_v53, %v6537_v10  ;;  %v9006_v60 = vld [vmem:[%s10911_s3 + $0x1c8] sm:$0xff]   ;;  %v9011_v48 = vld [vmem:[%s10911_s3 + $0x1f0] sm:$0xff]  }
 0x22f   : >> { %7578 = vmatpush3.bf16.msra.mxu0 %v8954_v44  ;;  %7758 = vmatpush3.bf16.msra.mxu1 %v8954_v44  ;;  %v6482_v44 = vld [vmem:[%s9702_s21 + $0x39] sm:$0xff]  ;;  %v9904_v8 = vpack.c.bf16 %v6510_v37, %v6510_v37  ;;  %v9010_v0 = vld [vmem:[%s10911_s3 + $0x1e8] sm:$0xff]   ;;  %v9015_v58 = vld [vmem:[%s10911_s3 + $0x210] sm:$0xff]  }
 0x230   : >> { %7579 = vmatprep.subr.bf16.mxu0 %v8955_v50  ;;  %7759 = vmatprep.subr.bf16.mxu1 %v8955_v50 }
 0x233   : >> { %7580 = vmatpush3.bf16.msra.mxu0 %v8955_v50  ;;  %7760 = vmatpush3.bf16.msra.mxu1 %v8955_v50  ;;  %v8982_v50 = vld [vmem:[%s10911_s3 + $0x108] sm:$0xff]  }
 0x234   : >> { %7581 = vmatprep.subr.bf16.mxu0 %v8956_v29  ;;  %7761 = vmatprep.subr.bf16.mxu1 %v8956_v29 }
 0x237   : >> { %7582 = vmatpush3.bf16.msra.mxu0 %v8956_v29  ;;  %7762 = vmatpush3.bf16.msra.mxu1 %v8956_v29  ;;  %v9841_v29 = vpack.c.bf16 %v6482_v44, %v6481_v28  ;;  %v9018_v28 = vld [vmem:[%s10911_s3 + $0x228] sm:$0xff]   ;;  %v9019_v44 = vld [vmem:[%s10911_s3 + $0x230] sm:$0xff]  }
 0x238   : >> { %7587 = vmatprep.subr.bf16.mxu0 %v8957_v40  ;;  %7767 = vmatprep.subr.bf16.mxu1 %v8957_v40 }
 0x23a   : >> { %7584 = vmatmul.mubr.bf16.vlgmr.msra.gmra.mrb[0].mxu0 %v1342_v41  ;;  %7764 = vmatmul.mubr.bf16.vlgmr.msra.gmra.mrb[0].mxu1 %v9729_v6  ;;  %v8988_v41 = vld [vmem:[%s10911_s3 + $0x138] sm:$0xff]  }
 0x23b   : >> { %7588 = vmatpush3.bf16.msra.mxu0 %v8957_v40  ;;  %7768 = vmatpush3.bf16.msra.mxu1 %v8957_v40  ;;  %v8985_v40 = vld [vmem:[%s10911_s3 + $0x120] sm:$0xff]  }
 0x23c   : >> { %7589 = vmatprep.subr.bf16.mxu0 %v8958_v39  ;;  %7769 = vmatprep.subr.bf16.mxu1 %v8958_v39 }
 0x23d   : >> { %7603 = vmatprep.mubr.bf16.mxu0 %v1320_v20  ;;  %7783 = vmatprep.mubr.bf16.mxu1 %v9737_v21  ;;  %v6509_v20 = vld [vmem:[%s9702_s21 + $0x3a] sm:$0xff] }
 0x23f   : >> { %7590 = vmatpush3.bf16.msra.mxu0 %v8958_v39  ;;  %7770 = vmatpush3.bf16.msra.mxu1 %v8958_v39  ;;  %v6508_v39 = vld [vmem:[%s9702_s21 + $0x32] sm:$0xff] }
 0x240   : >> { %7591 = vmatprep.subr.bf16.mxu0 %v8959_v54  ;;  %7771 = vmatprep.subr.bf16.mxu1 %v8959_v54 }
 0x243   : >> { %7592 = vmatpush3.bf16.msra.mxu0 %v8959_v54  ;;  %7772 = vmatpush3.bf16.msra.mxu1 %v8959_v54  ;;  %v9876_v54 = vpack.c.bf16 %v6509_v20, %v6508_v39 }
 0x244   : >> { %7593 = vmatprep.subr.bf16.mxu0 %v8960_v35  ;;  %7773 = vmatprep.subr.bf16.mxu1 %v8960_v35 }
 0x247   : >> { %7594 = vmatpush3.bf16.msra.mxu0 %v8960_v35  ;;  %7774 = vmatpush3.bf16.msra.mxu1 %v8960_v35  ;;  %v8991_v35 = vld [vmem:[%s10911_s3 + $0x150] sm:$0xff]  }
 0x248   : >> { %7595 = vmatprep.subr.bf16.mxu0 %v8961_v30  ;;  %7775 = vmatprep.subr.bf16.mxu1 %v8961_v30 }
 0x24b   : >> { %7596 = vmatpush3.bf16.msra.mxu0 %v8961_v30  ;;  %7776 = vmatpush3.bf16.msra.mxu1 %v8961_v30  ;;  %v8993_v30 = vld [vmem:[%s10911_s3 + $0x160] sm:$0xff]  }
 0x24c   : >> { %7597 = vmatprep.subr.bf16.mxu0 %v8962_v36  ;;  %7777 = vmatprep.subr.bf16.mxu1 %v8962_v36 }
 0x24f   : >> { %7598 = vmatpush3.bf16.msra.mxu0 %v8962_v36  ;;  %7778 = vmatpush3.bf16.msra.mxu1 %v8962_v36  ;;  %v8994_v36 = vld [vmem:[%s10911_s3 + $0x168] sm:$0xff]  }
 0x250   : >> { %7599 = vmatprep.subr.bf16.mxu0 %v8963_v63  ;;  %7779 = vmatprep.subr.bf16.mxu1 %v8963_v63 }
 0x253   : >> { %7600 = vmatpush3.bf16.msra.mxu0 %v8963_v63  ;;  %7780 = vmatpush3.bf16.msra.mxu1 %v8963_v63  ;;  %v8995_v63 = vld [vmem:[%s10911_s3 + $0x170] sm:$0xff]  }
 0x254   : >> { %7601 = vmatprep.subr.bf16.mxu0 %v8964_v18  ;;  %7781 = vmatprep.subr.bf16.mxu1 %v8964_v18 }
 0x257   : >> { %7602 = vmatpush3.bf16.msra.mxu0 %v8964_v18  ;;  %7782 = vmatpush3.bf16.msra.mxu1 %v8964_v18  ;;  %v8996_v18 = vld [vmem:[%s10911_s3 + $0x178] sm:$0xff]  }
 0x258   : >> { %7607 = vmatprep.subr.bf16.mxu0 %v8965_v12  ;;  %7787 = vmatprep.subr.bf16.mxu1 %v8965_v12 }
 0x25a   : >> { %7604 = vmatmul.mubr.bf16.vlgmr.msra.gmra.mrb[0].mxu0 %v1321_v25  ;;  %7784 = vmatmul.mubr.bf16.vlgmr.msra.gmra.mrb[0].mxu1 %v9768_v26  ;;  %v8999_v25 = vld [vmem:[%s10911_s3 + $0x190] sm:$0xff]  }
 0x25b   : >> { %7608 = vmatpush3.bf16.msra.mxu0 %v8965_v12  ;;  %7788 = vmatpush3.bf16.msra.mxu1 %v8965_v12  ;;  %v8997_v12 = vld [vmem:[%s10911_s3 + $0x180] sm:$0xff]  }
 0x25c   : >> { %7609 = vmatprep.subr.bf16.mxu0 %v8966_v32  ;;  %7789 = vmatprep.subr.bf16.mxu1 %v8966_v32 }
 0x25d   : >> { %7623 = vmatprep.mubr.bf16.mxu0 %v1555_v2  ;;  %7803 = vmatprep.mubr.bf16.mxu1 %v9773_v61  ;;  %v9002_v2 = vld [vmem:[%s10911_s3 + $0x1a8] sm:$0xff]  }
 0x25f   : >> { %7610 = vmatpush3.bf16.msra.mxu0 %v8966_v32  ;;  %7790 = vmatpush3.bf16.msra.mxu1 %v8966_v32  ;;  %v9001_v32 = vld [vmem:[%s10911_s3 + $0x1a0] sm:$0xff]  }
 0x260   : >> { %7611 = vmatprep.subr.bf16.mxu0 %v8967_v51  ;;  %7791 = vmatprep.subr.bf16.mxu1 %v8967_v51 }
 0x263   : >> { %7612 = vmatpush3.bf16.msra.mxu0 %v8967_v51  ;;  %7792 = vmatpush3.bf16.msra.mxu1 %v8967_v51  ;;  %v9004_v51 = vld [vmem:[%s10911_s3 + $0x1b8] sm:$0xff]  }
 0x264   : >> { %7613 = vmatprep.subr.bf16.mxu0 %v8968_v34  ;;  %7793 = vmatprep.subr.bf16.mxu1 %v8968_v34 }
 0x267   : >> { %7614 = vmatpush3.bf16.msra.mxu0 %v8968_v34  ;;  %7794 = vmatpush3.bf16.msra.mxu1 %v8968_v34  ;;  %v6539_v34 = vld [vmem:[%s9702_s21 + $0x58] sm:$0xf] }
 0x268   : >> { %7615 = vmatprep.subr.bf16.mxu0 %v8969_v7  ;;  %7795 = vmatprep.subr.bf16.mxu1 %v8969_v7 }
 0x26b   : >> { %7616 = vmatpush3.bf16.msra.mxu0 %v8969_v7  ;;  %7796 = vmatpush3.bf16.msra.mxu1 %v8969_v7  ;;  %v9005_v7 = vld [vmem:[%s10911_s3 + $0x1c0] sm:$0xff]  }
 0x26c   : >> { %7617 = vmatprep.subr.bf16.mxu0 %v8970_v52  ;;  %7797 = vmatprep.subr.bf16.mxu1 %v8970_v52 }
 0x26f   : >> { %7618 = vmatpush3.bf16.msra.mxu0 %v8970_v52  ;;  %7798 = vmatpush3.bf16.msra.mxu1 %v8970_v52  ;;  %v2712_v52 = vpack.c.bf16 %v6539_v34, %v6539_v34 }
 0x270   : >> { %7619 = vmatprep.subr.bf16.mxu0 %v8971_v9  ;;  %7799 = vmatprep.subr.bf16.mxu1 %v8971_v9 }
 0x273   : >> { %7620 = vmatpush3.bf16.msra.mxu0 %v8971_v9  ;;  %7800 = vmatpush3.bf16.msra.mxu1 %v8971_v9  ;;  %v6540_v9 = vld [vmem:[%s9702_s21 + $0x49] sm:$0xff] }
 0x274   : >> { %7621 = vmatprep.subr.bf16.mxu0 %v8972_v31  ;;  %7801 = vmatprep.subr.bf16.mxu1 %v8972_v31 }
 0x277   : >> { %7622 = vmatpush3.bf16.msra.mxu0 %v8972_v31  ;;  %7802 = vmatpush3.bf16.msra.mxu1 %v8972_v31  ;;  %v6541_v31 = vld [vmem:[%s9702_s21 + $0x51] sm:$0xff] }
 0x278   : >> { %7627 = vmatprep.subr.bf16.mxu0 %v8973_v4  ;;  %7807 = vmatprep.subr.bf16.mxu1 %v8973_v4  ;;  %v2767_v1 = vpack.c.bf16 %v6541_v31, %v6540_v9 }
 0x27a   : >> { %7624 = vmatmul.mubr.bf16.vlgmr.msra.gmra.mrb[0].mxu0 %v1556_v49  ;;  %7804 = vmatmul.mubr.bf16.vlgmr.msra.gmra.mrb[0].mxu1 %v9800_v47  ;;  %v9008_v49 = vld [vmem:[%s10911_s3 + $0x1d8] sm:$0xff]  }
 0x27b   : >> { %7628 = vmatpush3.bf16.msra.mxu0 %v8973_v4  ;;  %7808 = vmatpush3.bf16.msra.mxu1 %v8973_v4  ;;  %v9007_v4 = vld [vmem:[%s10911_s3 + $0x1d0] sm:$0xff]  }
 0x27c   : >> { %7629 = vmatprep.subr.bf16.mxu0 %v8974_v43  ;;  %7809 = vmatprep.subr.bf16.mxu1 %v8974_v43 }
 0x27d   : >> { %7643 = vmatprep.mubr.bf16.mxu0 %v9737_v21  ;;  %7823 = vmatprep.mubr.bf16.mxu1 %v9807_v56  ;;  %v8990_v21 = vld [vmem:[%s10911_s3 + $0x148] sm:$0xff]  }
 0x27f   : >> { %7630 = vmatpush3.bf16.msra.mxu0 %v8974_v43  ;;  %7810 = vmatpush3.bf16.msra.mxu1 %v8974_v43  ;;  %v9012_v43 = vld [vmem:[%s10911_s3 + $0x1f8] sm:$0xff]  }
 0x280   : >> { %7631 = vmatprep.subr.bf16.mxu0 %v8975_v45  ;;  %7811 = vmatprep.subr.bf16.mxu1 %v8975_v45 }
 0x283   : >> { %7632 = vmatpush3.bf16.msra.mxu0 %v8975_v45  ;;  %7812 = vmatpush3.bf16.msra.mxu1 %v8975_v45  ;;  %v9013_v45 = vld [vmem:[%s10911_s3 + $0x200] sm:$0xff]  }
 0x284   : >> { %7633 = vmatprep.subr.bf16.mxu0 %v8976_v15  ;;  %7813 = vmatprep.subr.bf16.mxu1 %v8976_v15 }
 0x287   : >> { %7634 = vmatpush3.bf16.msra.mxu0 %v8976_v15  ;;  %7814 = vmatpush3.bf16.msra.mxu1 %v8976_v15 }
 0x288   : >> { %7635 = vmatprep.subr.bf16.mxu0 %v8977_v46  ;;  %7815 = vmatprep.subr.bf16.mxu1 %v8977_v46 }
 0x28b   : >> { %7636 = vmatpush3.bf16.msra.mxu0 %v8977_v46  ;;  %7816 = vmatpush3.bf16.msra.mxu1 %v8977_v46  ;;  %v6543_v46 = vld [vmem:[%s9702_s21 + $0x4a] sm:$0xff] }
 0x28c   : >> { %7637 = vmatprep.subr.bf16.mxu0 %v8978_v42  ;;  %7817 = vmatprep.subr.bf16.mxu1 %v8978_v42 }
 0x28f   : >> { %7638 = vmatpush3.bf16.msra.mxu0 %v8978_v42  ;;  %7818 = vmatpush3.bf16.msra.mxu1 %v8978_v42  ;;  %v6544_v42 = vld [vmem:[%s9702_s21 + $0x52] sm:$0xff] }
 0x290   : >> { %7639 = vmatprep.subr.bf16.mxu0 %v8979_v22  ;;  %7819 = vmatprep.subr.bf16.mxu1 %v8979_v22 }
 0x293   : >> { %7640 = vmatpush3.bf16.msra.mxu0 %v8979_v22  ;;  %7820 = vmatpush3.bf16.msra.mxu1 %v8979_v22  ;;  %v9014_v22 = vld [vmem:[%s10911_s3 + $0x208] sm:$0xff]  }
 0x294   : >> { %7641 = vmatprep.subr.bf16.mxu0 %v8980_v23  ;;  %7821 = vmatprep.subr.bf16.mxu1 %v8980_v23 }
 0x297   : >> { %7642 = vmatpush3.bf16.msra.mxu0 %v8980_v23  ;;  %7822 = vmatpush3.bf16.msra.mxu1 %v8980_v23  ;;  %v2823_v23 = vpack.c.bf16 %v6544_v42, %v6543_v46 }
 0x298   : >> { %7647 = vmatprep.subr.bf16.mxu0 %v8981_v5  ;;  %7827 = vmatprep.subr.bf16.mxu1 %v8981_v5 }
 0x29a   : >> { %7644 = vmatmul.mubr.bf16.vlgmr.msra.gmra.mrb[0].mxu0 %v9768_v26  ;;  %7824 = vmatmul.mubr.bf16.vlgmr.msra.gmra.mrb[0].mxu1 %v9834_v24  ;;  %v9000_v26 = vld [vmem:[%s10911_s3 + $0x198] sm:$0xff]  }
 0x29b   : >> { %7648 = vmatpush3.bf16.msra.mxu0 %v8981_v5  ;;  %7828 = vmatpush3.bf16.msra.mxu1 %v8981_v5  ;;  %v9016_v5 = vld [vmem:[%s10911_s3 + $0x218] sm:$0xff]  }
 0x29c   : >> { %7649 = vmatprep.subr.bf16.mxu0 %v8982_v50  ;;  %7829 = vmatprep.subr.bf16.mxu1 %v8982_v50 }
 0x29d   : >> { %7663 = vmatprep.mubr.bf16.mxu0 %v9708_v27  ;;  %7843 = vmatprep.mubr.bf16.mxu1 %v9841_v29  ;;  %v8986_v27 = vld [vmem:[%s10911_s3 + $0x128] sm:$0xff]  }
 0x29f   : >> { %7650 = vmatpush3.bf16.msra.mxu0 %v8982_v50  ;;  %7830 = vmatpush3.bf16.msra.mxu1 %v8982_v50  ;;  %v9020_v50 = vld [vmem:[%s10911_s3 + $0x238] sm:$0xff]  }
 0x2a0   : >> { %7651 = vmatprep.subr.bf16.mxu0 %v8983_v19  ;;  %7831 = vmatprep.subr.bf16.mxu1 %v8983_v19 }
 0x2a3   : >> { %7652 = vmatpush3.bf16.msra.mxu0 %v8983_v19  ;;  %7832 = vmatpush3.bf16.msra.mxu1 %v8983_v19 }
 0x2a4   : >> { %7653 = vmatprep.subr.bf16.mxu0 %v8984_v55  ;;  %7833 = vmatprep.subr.bf16.mxu1 %v8984_v55 }
 0x2a7   : >> { %7654 = vmatpush3.bf16.msra.mxu0 %v8984_v55  ;;  %7834 = vmatpush3.bf16.msra.mxu1 %v8984_v55 }
 0x2a8   : >> { %7655 = vmatprep.subr.bf16.mxu0 %v8985_v40  ;;  %7835 = vmatprep.subr.bf16.mxu1 %v8985_v40 }
 0x2ab   : >> { %7656 = vmatpush3.bf16.msra.mxu0 %v8985_v40  ;;  %7836 = vmatpush3.bf16.msra.mxu1 %v8985_v40 }
 0x2ac   : >> { %7657 = vmatprep.subr.bf16.mxu0 %v8986_v27  ;;  %7837 = vmatprep.subr.bf16.mxu1 %v8986_v27 }
 0x2af   : >> { %7658 = vmatpush3.bf16.msra.mxu0 %v8986_v27  ;;  %7838 = vmatpush3.bf16.msra.mxu1 %v8986_v27 }
 0x2b0   : >> { %7659 = vmatprep.subr.bf16.mxu0 %v8987_v33  ;;  %7839 = vmatprep.subr.bf16.mxu1 %v8987_v33 }
 0x2b3   : >> { %7660 = vmatpush3.bf16.msra.mxu0 %v8987_v33  ;;  %7840 = vmatpush3.bf16.msra.mxu1 %v8987_v33 }
 0x2b4   : >> { %7661 = vmatprep.subr.bf16.mxu0 %v8988_v41  ;;  %7841 = vmatprep.subr.bf16.mxu1 %v8988_v41 }
 0x2b7   : >> { %7662 = vmatpush3.bf16.msra.mxu0 %v8988_v41  ;;  %7842 = vmatpush3.bf16.msra.mxu1 %v8988_v41 }
 0x2b8   : >> { %7667 = vmatprep.subr.bf16.mxu0 %v8989_v3  ;;  %7847 = vmatprep.subr.bf16.mxu1 %v8989_v3 }
 0x2ba   : >> { %7664 = vmatmul.mubr.bf16.vlgmr.msra.gmra.mrb[0].mxu0 %v9729_v6  ;;  %7844 = vmatmul.mubr.bf16.vlgmr.msra.gmra.mrb[0].mxu1 %v9869_v38  ;;  %v8992_v6 = vld [vmem:[%s10911_s3 + $0x158] sm:$0xff]  }
 0x2bb   : >> { %7668 = vmatpush3.bf16.msra.mxu0 %v8989_v3  ;;  %7848 = vmatpush3.bf16.msra.mxu1 %v8989_v3 }
 0x2bc   : >> { %7669 = vmatprep.subr.bf16.mxu0 %v8990_v21  ;;  %7849 = vmatprep.subr.bf16.mxu1 %v8990_v21 }
 0x2bd   : >> { %7683 = vmatprep.mubr.bf16.mxu0 %v9773_v61  ;;  %7863 = vmatprep.mubr.bf16.mxu1 %v9876_v54  ;;  %v9003_v61 = vld [vmem:[%s10911_s3 + $0x1b0] sm:$0xff]  }
 0x2bf   : >> { %7670 = vmatpush3.bf16.msra.mxu0 %v8990_v21  ;;  %7850 = vmatpush3.bf16.msra.mxu1 %v8990_v21 }
 0x2c0   : >> { %7671 = vmatprep.subr.bf16.mxu0 %v8991_v35  ;;  %7851 = vmatprep.subr.bf16.mxu1 %v8991_v35 }
 0x2c3   : >> { %7672 = vmatpush3.bf16.msra.mxu0 %v8991_v35  ;;  %7852 = vmatpush3.bf16.msra.mxu1 %v8991_v35 }
 0x2c4   : >> { %7673 = vmatprep.subr.bf16.mxu0 %v8992_v6  ;;  %7853 = vmatprep.subr.bf16.mxu1 %v8992_v6 }
 0x2c7   : >> { %7674 = vmatpush3.bf16.msra.mxu0 %v8992_v6  ;;  %7854 = vmatpush3.bf16.msra.mxu1 %v8992_v6 }
 0x2c8   : >> { %7675 = vmatprep.subr.bf16.mxu0 %v8993_v30  ;;  %7855 = vmatprep.subr.bf16.mxu1 %v8993_v30 }
 0x2cb   : >> { %7676 = vmatpush3.bf16.msra.mxu0 %v8993_v30  ;;  %7856 = vmatpush3.bf16.msra.mxu1 %v8993_v30 }
 0x2cc   : >> { %7677 = vmatprep.subr.bf16.mxu0 %v8994_v36  ;;  %7857 = vmatprep.subr.bf16.mxu1 %v8994_v36 }
 0x2cf   : >> { %7678 = vmatpush3.bf16.msra.mxu0 %v8994_v36  ;;  %7858 = vmatpush3.bf16.msra.mxu1 %v8994_v36 }
 0x2d0   : >> { %7679 = vmatprep.subr.bf16.mxu0 %v8995_v63  ;;  %7859 = vmatprep.subr.bf16.mxu1 %v8995_v63 }
 0x2d3   : >> { %7680 = vmatpush3.bf16.msra.mxu0 %v8995_v63  ;;  %7860 = vmatpush3.bf16.msra.mxu1 %v8995_v63 }
 0x2d4   : >> { %7681 = vmatprep.subr.bf16.mxu0 %v8996_v18  ;;  %7861 = vmatprep.subr.bf16.mxu1 %v8996_v18 }
 0x2d7   : >> { %7682 = vmatpush3.bf16.msra.mxu0 %v8996_v18  ;;  %7862 = vmatpush3.bf16.msra.mxu1 %v8996_v18 }
 0x2d8   : >> { %7687 = vmatprep.subr.bf16.mxu0 %v8997_v12  ;;  %7867 = vmatprep.subr.bf16.mxu1 %v8997_v12 }
 0x2da   : >> { %7684 = vmatmul.mubr.bf16.vlgmr.msra.gmra.mrb[0].mxu0 %v9800_v47  ;;  %7864 = vmatmul.mubr.bf16.vlgmr.msra.gmra.mrb[0].mxu1 %v9904_v8  ;;  %v9009_v47 = vld [vmem:[%s10911_s3 + $0x1e0] sm:$0xff]  }
 0x2db   : >> { %7688 = vmatpush3.bf16.msra.mxu0 %v8997_v12  ;;  %7868 = vmatpush3.bf16.msra.mxu1 %v8997_v12 }
 0x2dc   : >> { %7689 = vmatprep.subr.bf16.mxu0 %v8998_v59  ;;  %7869 = vmatprep.subr.bf16.mxu1 %v8998_v59 }
 0x2dd   : >> { %7703 = vmatprep.mubr.bf16.mxu0 %v9807_v56  ;;  %7883 = vmatprep.mubr.bf16.mxu1 %v2711_v13  ;;  %v6542_v56 = vld [vmem:[%s9702_s21 + $0x59] sm:$0xf] }
 0x2de   : >> { %v2768_v15 = vpack.c.bf16 %v6542_v56, %v6542_v56 }
 0x2df   : >> { %7690 = vmatpush3.bf16.msra.mxu0 %v8998_v59  ;;  %7870 = vmatpush3.bf16.msra.mxu1 %v8998_v59 }
 0x2e0   : >> { %7691 = vmatprep.subr.bf16.mxu0 %v8999_v25  ;;  %7871 = vmatprep.subr.bf16.mxu1 %v8999_v25 }
 0x2e3   : >> { %7692 = vmatpush3.bf16.msra.mxu0 %v8999_v25  ;;  %7872 = vmatpush3.bf16.msra.mxu1 %v8999_v25 }
 0x2e4   : >> { %7693 = vmatprep.subr.bf16.mxu0 %v9000_v26  ;;  %7873 = vmatprep.subr.bf16.mxu1 %v9000_v26 }
 0x2e7   : >> { %7694 = vmatpush3.bf16.msra.mxu0 %v9000_v26  ;;  %7874 = vmatpush3.bf16.msra.mxu1 %v9000_v26 }
 0x2e8   : >> { %7695 = vmatprep.subr.bf16.mxu0 %v9001_v32  ;;  %7875 = vmatprep.subr.bf16.mxu1 %v9001_v32 }
 0x2eb   : >> { %7696 = vmatpush3.bf16.msra.mxu0 %v9001_v32  ;;  %7876 = vmatpush3.bf16.msra.mxu1 %v9001_v32 }
 0x2ec   : >> { %7697 = vmatprep.subr.bf16.mxu0 %v9002_v2  ;;  %7877 = vmatprep.subr.bf16.mxu1 %v9002_v2 }
 0x2ef   : >> { %7698 = vmatpush3.bf16.msra.mxu0 %v9002_v2  ;;  %7878 = vmatpush3.bf16.msra.mxu1 %v9002_v2 }
 0x2f0   : >> { %7699 = vmatprep.subr.bf16.mxu0 %v9003_v61  ;;  %7879 = vmatprep.subr.bf16.mxu1 %v9003_v61 }
 0x2f3   : >> { %7700 = vmatpush3.bf16.msra.mxu0 %v9003_v61  ;;  %7880 = vmatpush3.bf16.msra.mxu1 %v9003_v61 }
 0x2f4   : >> { %7701 = vmatprep.subr.bf16.mxu0 %v9004_v51  ;;  %7881 = vmatprep.subr.bf16.mxu1 %v9004_v51 }
 0x2f7   : >> { %7702 = vmatpush3.bf16.msra.mxu0 %v9004_v51  ;;  %7882 = vmatpush3.bf16.msra.mxu1 %v9004_v51 }
 0x2f8   : >> { %7707 = vmatprep.subr.bf16.mxu0 %v9005_v7  ;;  %7887 = vmatprep.subr.bf16.mxu1 %v9005_v7 }
 0x2fa   : >> { %7704 = vmatmul.mubr.bf16.vlgmr.msra.gmra.mrb[0].mxu0 %v9834_v24  ;;  %7884 = vmatmul.mubr.bf16.vlgmr.msra.gmra.mrb[0].mxu1 %v2712_v52  ;;  %v9017_v24 = vld [vmem:[%s10911_s3 + $0x220] sm:$0xff]  }
 0x2fb   : >> { %7708 = vmatpush3.bf16.msra.mxu0 %v9005_v7  ;;  %7888 = vmatpush3.bf16.msra.mxu1 %v9005_v7 }
 0x2fc   : >> { %7709 = vmatprep.subr.bf16.mxu0 %v9006_v60  ;;  %7889 = vmatprep.subr.bf16.mxu1 %v9006_v60 }
 0x2fd   : >> { %7723 = vmatprep.mubr.bf16.mxu0 %v9841_v29  ;;  %7903 = vmatprep.mubr.bf16.mxu1 %v2767_v1  ;;  %v6545_v29 = vld [vmem:[%s9702_s21 + $0x5a] sm:$0xf]  ;;  %s6553_s21 = sshll.u32 %s9195_s29, 4  ;;  %s1313_s29 = sadd.s32 1, %s9195_s29  }
 0x2fe   : >> { %v2824_v19 = vpack.c.bf16 %v6545_v29, %v6545_v29  ;;  %s3059_s12 = scalar_lea.vmem [#allocation3], %s6553_s21  ;;  %p1310_p5 = scmp.ge.s32.totalorder %s1313_s29, 10  }
 0x2ff   : >> { %7710 = vmatpush3.bf16.msra.mxu0 %v9006_v60  ;;  %7890 = vmatpush3.bf16.msra.mxu1 %v9006_v60  ;;  %v10013_v53 = vld [vmem:[%s10914_s6] ss:$0 sm:$0xff] (%p1310_p5)  ;;  %s10015_s19 = smov (%p1310_p5), 0  }
 0x300   : >> { %7711 = vmatprep.subr.bf16.mxu0 %v9007_v4  ;;  %7891 = vmatprep.subr.bf16.mxu1 %v9007_v4 }
 0x303   : >> { %7712 = vmatpush3.bf16.msra.mxu0 %v9007_v4  ;;  %7892 = vmatpush3.bf16.msra.mxu1 %v9007_v4 }
 0x304   : >> { %7713 = vmatprep.subr.bf16.mxu0 %v9008_v49  ;;  %7893 = vmatprep.subr.bf16.mxu1 %v9008_v49 }
 0x307   : >> { %7714 = vmatpush3.bf16.msra.mxu0 %v9008_v49  ;;  %7894 = vmatpush3.bf16.msra.mxu1 %v9008_v49 }
 0x308   : >> { %7715 = vmatprep.subr.bf16.mxu0 %v9009_v47  ;;  %7895 = vmatprep.subr.bf16.mxu1 %v9009_v47 }
 0x30b   : >> { %7716 = vmatpush3.bf16.msra.mxu0 %v9009_v47  ;;  %7896 = vmatpush3.bf16.msra.mxu1 %v9009_v47 }
 0x30c   : >> { %7717 = vmatprep.subr.bf16.mxu0 %v9010_v0  ;;  %7897 = vmatprep.subr.bf16.mxu1 %v9010_v0 }
 0x30f   : >> { %7718 = vmatpush3.bf16.msra.mxu0 %v9010_v0  ;;  %7898 = vmatpush3.bf16.msra.mxu1 %v9010_v0 }
 0x310   : >> { %7719 = vmatprep.subr.bf16.mxu0 %v9011_v48  ;;  %7899 = vmatprep.subr.bf16.mxu1 %v9011_v48 }
 0x313   : >> { %7720 = vmatpush3.bf16.msra.mxu0 %v9011_v48  ;;  %7900 = vmatpush3.bf16.msra.mxu1 %v9011_v48 }
 0x314   : >> { %7721 = vmatprep.subr.bf16.mxu0 %v9012_v43  ;;  %7901 = vmatprep.subr.bf16.mxu1 %v9012_v43 }
 0x317   : >> { %7722 = vmatpush3.bf16.msra.mxu0 %v9012_v43  ;;  %7902 = vmatpush3.bf16.msra.mxu1 %v9012_v43 }
 0x318   : >> { %7727 = vmatprep.subr.bf16.mxu0 %v9013_v45  ;;  %7907 = vmatprep.subr.bf16.mxu1 %v9013_v45 }
 0x31a   : >> { %7724 = vmatmul.mubr.bf16.vlgmr.msra.gmra.mrb[0].mxu0 %v9869_v38  ;;  %7904 = vmatmul.mubr.bf16.vlgmr.msra.gmra.mrb[0].mxu1 %v2768_v15 }
 0x31b   : >> { %7728 = vmatpush3.bf16.msra.mxu0 %v9013_v45  ;;  %7908 = vmatpush3.bf16.msra.mxu1 %v9013_v45 }
 0x31c   : >> { %7729 = vmatprep.subr.bf16.mxu0 %v9014_v22  ;;  %7909 = vmatprep.subr.bf16.mxu1 %v9014_v22 }
 0x31d   : >> { %7743 = vmatprep.mubr.bf16.mxu0 %v9876_v54  ;;  %7923 = vmatprep.mubr.bf16.mxu1 %v2823_v23 }
 0x31f   : >> { %7730 = vmatpush3.bf16.msra.mxu0 %v9014_v22  ;;  %7910 = vmatpush3.bf16.msra.mxu1 %v9014_v22 }
 0x320   : >> { %7731 = vmatprep.subr.bf16.mxu0 %v9015_v58  ;;  %7911 = vmatprep.subr.bf16.mxu1 %v9015_v58 }
 0x323   : >> { %7732 = vmatpush3.bf16.msra.mxu0 %v9015_v58  ;;  %7912 = vmatpush3.bf16.msra.mxu1 %v9015_v58 }
 0x324   : >> { %7733 = vmatprep.subr.bf16.mxu0 %v9016_v5  ;;  %7913 = vmatprep.subr.bf16.mxu1 %v9016_v5 }
 0x327   : >> { %7734 = vmatpush3.bf16.msra.mxu0 %v9016_v5  ;;  %7914 = vmatpush3.bf16.msra.mxu1 %v9016_v5 }
 0x328   : >> { %7735 = vmatprep.subr.bf16.mxu0 %v9017_v24  ;;  %7915 = vmatprep.subr.bf16.mxu1 %v9017_v24 }
 0x32b   : >> { %7736 = vmatpush3.bf16.msra.mxu0 %v9017_v24  ;;  %7916 = vmatpush3.bf16.msra.mxu1 %v9017_v24 }
 0x32c   : >> { %7737 = vmatprep.subr.bf16.mxu0 %v9018_v28  ;;  %7917 = vmatprep.subr.bf16.mxu1 %v9018_v28 }
 0x32f   : >> { %7738 = vmatpush3.bf16.msra.mxu0 %v9018_v28  ;;  %7918 = vmatpush3.bf16.msra.mxu1 %v9018_v28 }
 0x330   : >> { %7739 = vmatprep.subr.bf16.mxu0 %v9019_v44  ;;  %7919 = vmatprep.subr.bf16.mxu1 %v9019_v44 }
 0x333   : >> { %7740 = vmatpush3.bf16.msra.mxu0 %v9019_v44  ;;  %7920 = vmatpush3.bf16.msra.mxu1 %v9019_v44 }
 0x334   : >> { %7741 = vmatprep.subr.bf16.mxu0 %v9020_v50  ;;  %7921 = vmatprep.subr.bf16.mxu1 %v9020_v50 }
 0x337   : >> { %7742 = vmatpush3.bf16.msra.mxu0 %v9020_v50  ;;  %7922 = vmatpush3.bf16.msra.mxu1 %v9020_v50 }
 0x33a   : >> { %7744 = vmatmul.mubr.bf16.vlgmr.msra.gmra.mrb[0].mxu0 %v9904_v8  ;;  %7924 = vmatmul.mubr.bf16.vlgmr.msra.gmra.mrb[0].mxu1 %v2824_v19 }
 0x33b   : >> { %7933 = vmatprep.mubr.msk.f32.mxu0 %vm2879_vm11, %v9289_v11  ;;  %7942 = vmatprep.mubr.msk.f32.mxu1 %vm2879_vm11, %v9303_v16 }
 0x40d   : >> { %v7745_v55 = vpop.f32.mrb[0].mxu0  ;;  %v7925_v40 = vpop.f32.mrb[0].mxu1 }
 0x40e   : >> { %v2878_v27 = vmax.f32 %v7745_v55, %v7925_v40  ;;  %v2388_v33 = vpop.f32.mrb[1].mxu0  ;;  %v2859_v41 = vpop.f32.mrb[1].mxu1 }
 0x40f   : >> { %v2876_v62 = vmax.f32 %v2388_v33, %v2859_v41  ;;  %v7746_v3 = vpop.f32.mrb[2].mxu0  ;;  %v7926_v38 = vpop.f32.mrb[2].mxu1 }
 0x410   : >> { %v2391_v39 = vpop.f32.mrb[3].mxu0  ;;  %v2862_v20 = vpop.f32.mrb[3].mxu1 }
 0x411   : >> { %v2877_v21 = vmax.f32 %v2391_v39, %v2862_v20 }
 0x413   : >> { %v8705_v54 = vpack.c.bf16 %v2877_v21, %v2876_v62 }
 0x415   : >> { %8706 = vmatprep.subr.bf16.mxu0 %v8705_v54  ;;  %8710 = vmatprep.subr.bf16.mxu1 %v8705_v54 }
 0x416   : >> { %8708 = vmatpush3.bf16.msra.mxu0 %v8705_v54  ;;  %8712 = vmatpush3.bf16.msra.mxu1 %v8705_v54 }
 0x417   : >> { %7931 = vmatprep.subr.msk.mxu0 %vm1114_vm7, %v2878_v27  ;;  %7940 = vmatprep.subr.msk.mxu1 %vm1114_vm7, %v2878_v27 }
 0x41a   : >> { %7932 = vmatpush3.msk.msra.mxu0 %vm1114_vm7, %v2878_v27  ;;  %7941 = vmatpush3.msk.msra.mxu1 %vm1114_vm7, %v2878_v27 }
 0x41b   : >> { %7934 = vmatmul.mubr.msk.f32.vlgmr.msra.gmra.mrb[4].mxu0 %vm2879_vm11, %v9294_v14  ;;  %7943 = vmatmul.mubr.msk.f32.vlgmr.msra.gmra.mrb[4].mxu1 %vm2879_vm11, %v9306_v17 }
 0x4ee   : >> { %v7935_v35 = vpop.f32.mrb[4].mxu0  ;;  %v7944_v6 = vpop.f32.mrb[4].mxu1 }
 0x4ef   : >> { %v3047_v30 = vmax.f32 %v7935_v35, %v7944_v6  ;;  %v2956_v36 = vpop.f32.mrb[5].mxu0  ;;  %v3037_v63 = vpop.f32.mrb[5].mxu1 }
 0x4f0   : >> { %v3046_v18 = vmax.f32 %v2956_v36, %v3037_v63  ;;  %1312 = sbr.rel (!%p1310_p5) target bundleno = 537 (0x219), region = 168 }
 0x4f1   : >> { %v3055_v37 = vadd.f32 %v9682_v57, %v3047_v30 }
 0x4f2   : >> { %v3054_v12 = vadd.f32 %v9682_v57, %v3046_v18 }
 0x4f3   : >> { %v3057_v8 = vmax.f32 %v3055_v37, 0.0 }
 0x4f4   : >> { %v3056_v10 = vmax.f32 %v3054_v12, 0.0 }
 0x4f5   : >> { %3061 = vst [vmem:[%s3059_s12 + $0x8] sm:$0x3] %v3057_v8 }
 0x4f6   : >> { %3060 = vst [vmem:[%s3059_s12] sm:$0xff] %v3056_v10 }
 0x4f7 LB: >> { %v9021_v59 = vld [vmem:[%s10913_s5 + $0x40] sm:$0xff]   ;;  %v9207_v13 = vmov 0.0   ;;  %v9022_v14 = vld [vmem:[%s10913_s5 + $0x48] sm:$0xff]   ;;  %vm9208_vm12 = vmmov 0   ;;  %v9023_v17 = vld [vmem:[%s10913_s5 + $0x50] sm:$0xff]   ;;  %s6981_s11 = sshll.u32 %s9199_s19, 5  ;;  %s9199_s19 = sphi %s10015_s19, %s3068_s19  }
 0x4f8   : >> { %7945 = vmatprep.subr.bf16.mxu0 %v9207_v13  ;;  %8125 = vmatprep.subr.bf16.mxu1 %v9207_v13  ;;  %v9024_v57 = vld [vmem:[%s10913_s5 + $0x58] sm:$0xff]   ;;  %v9025_v25 = vld [vmem:[%s10913_s5 + $0x60] sm:$0xff]   ;;  %v9026_v26 = vld [vmem:[%s10913_s5 + $0x68] sm:$0xff]   ;;  %s10063_s14 = scalar_lea.vmem [#allocation3], %s6981_s11  ;;  %vm4424_vm13 = vcmask 64512  }
 0x4f9   : >> { %7946 = vmatpush3.bf16.msra.mxu0 %v9021_v59  ;;  %8126 = vmatpush3.bf16.msra.mxu1 %v9021_v59  ;;  %v9027_v32 = vld [vmem:[%s10913_s5 + $0x70] sm:$0xff]   ;;  %v9028_v2 = vld [vmem:[%s10913_s5 + $0x78] sm:$0xff]   ;;  %v9029_v52 = vld [vmem:[%s10913_s5] sm:$0xff]  }
 0x4fa   : >> { %7947 = vmatprep.subr.bf16.mxu0 %v9207_v13  ;;  %8127 = vmatprep.subr.bf16.mxu1 %v9207_v13  ;;  %v9030_v9 = vld [vmem:[%s10913_s5 + $0x8] sm:$0xff]   ;;  %v9031_v31 = vld [vmem:[%s10913_s5 + $0x10] sm:$0xff]   ;;  %v9032_v60 = vld [vmem:[%s10913_s5 + $0x18] sm:$0xff]  }
 0x4fb   : >> { %7961 = vmatprep.mubr.msk.bf16.mxu0 %vm9208_vm12, %v9207_v13  ;;  %8141 = vmatprep.mubr.msk.bf16.mxu1 %vm9208_vm12, %v9207_v13  ;;  %v9033_v1 = vld [vmem:[%s10913_s5 + $0x20] sm:$0xff]   ;;  %v9034_v4 = vld [vmem:[%s10913_s5 + $0x28] sm:$0xff]   ;;  %v9035_v49 = vld [vmem:[%s10913_s5 + $0x30] sm:$0xff]  }
 0x4fc   : >> { %v9036_v47 = vld [vmem:[%s10913_s5 + $0x38] sm:$0xff]   ;;  %v9037_v43 = vld [vmem:[%s10913_s5 + $0x80] sm:$0xff]   ;;  %v9038_v15 = vld [vmem:[%s10913_s5 + $0x88] sm:$0xff]  }
 0x4fd   : >> { %7948 = vmatpush3.bf16.msra.mxu0 %v9022_v14  ;;  %8128 = vmatpush3.bf16.msra.mxu1 %v9022_v14  ;;  %v3090_v61 = vld [vmem:[%s10063_s14 + $0x1] sm:$0xff]  ;;  %v6639_v51 = vld [vmem:[%s10063_s14 + $0x11] sm:$0xff] }
 0x4fe   : >> { %7949 = vmatprep.subr.bf16.mxu0 %v9207_v13  ;;  %8129 = vmatprep.subr.bf16.mxu1 %v9207_v13  ;;  %v3091_v34 = vpack.c.bf16 %v3090_v61, %v3090_v61  ;;  %v10069_v7 = vpack.c.bf16 %v6639_v51, %v6639_v51  ;;  %v3072_v0 = vld [vmem:[%s10063_s14] sm:$0xff]  ;;  %v6614_v48 = vld [vmem:[%s10063_s14 + $0x10] sm:$0xff]  ;;  %v9040_v42 = vld [vmem:[%s10913_s5 + $0x98] sm:$0xff]  }
 0x4ff   : >> { %v3073_v56 = vpack.c.bf16 %v3072_v0, %v3072_v0  ;;  %v10121_v45 = vpack.c.bf16 %v6614_v48, %v6614_v48  ;;  %v9039_v46 = vld [vmem:[%s10913_s5 + $0x90] sm:$0xff]   ;;  %v9041_v22 = vld [vmem:[%s10913_s5 + $0xa0] sm:$0xff]   ;;  %v9042_v23 = vld [vmem:[%s10913_s5 + $0xa8] sm:$0xff]  }
 0x500   : >> { %v9043_v58 = vld [vmem:[%s10913_s5 + $0xb0] sm:$0xff]   ;;  %v9044_v5 = vld [vmem:[%s10913_s5 + $0xb8] sm:$0xff]   ;;  %v3285_v24 = vld [vmem:[%s10063_s14 + $0x2] sm:$0xff] }
 0x501   : >> { %7950 = vmatpush3.bf16.msra.mxu0 %v9023_v17  ;;  %8130 = vmatpush3.bf16.msra.mxu1 %v9023_v17  ;;  %v6664_v28 = vld [vmem:[%s10063_s14 + $0x12] sm:$0xff]  ;;  %v3286_v44 = vpack.c.bf16 %v3285_v24, %v3285_v24  ;;  %v9045_v29 = vld [vmem:[%s10913_s5 + $0xc0] sm:$0xff]   ;;  %v9046_v19 = vld [vmem:[%s10913_s5 + $0xc8] sm:$0xff]  }
 0x502   : >> { %7951 = vmatprep.subr.bf16.mxu0 %v9207_v13  ;;  %8131 = vmatprep.subr.bf16.mxu1 %v9207_v13  ;;  %v10167_v50 = vpack.c.bf16 %v6664_v28, %v6664_v28  ;;  %v9047_v55 = vld [vmem:[%s10913_s5 + $0xd0] sm:$0xff]   ;;  %v9048_v40 = vld [vmem:[%s10913_s5 + $0xd8] sm:$0xff]   ;;  %v9049_v27 = vld [vmem:[%s10913_s5 + $0xe0] sm:$0xff]  }
 0x503   : >> { %v9050_v33 = vld [vmem:[%s10913_s5 + $0xe8] sm:$0xff]   ;;  %v9051_v41 = vld [vmem:[%s10913_s5 + $0xf0] sm:$0xff]   ;;  %v9052_v62 = vld [vmem:[%s10913_s5 + $0xf8] sm:$0xff]  }
 0x504   : >> { %v6691_v3 = vld [vmem:[%s10063_s14 + $0x20] sm:$0xff]  ;;  %v9054_v20 = vld [vmem:[%s10913_s5 + $0x108] sm:$0xff]   ;;  %v9055_v21 = vld [vmem:[%s10913_s5 + $0x110] sm:$0xff]  }
 0x505   : >> { %7952 = vmatpush3.bf16.msra.mxu0 %v9024_v57  ;;  %8132 = vmatpush3.bf16.msra.mxu1 %v9024_v57  ;;  %v10215_v38 = vpack.c.bf16 %v6691_v3, %v6691_v3  ;;  %v9053_v39 = vld [vmem:[%s10913_s5 + $0x100] sm:$0xff]   ;;  %v9056_v54 = vld [vmem:[%s10913_s5 + $0x118] sm:$0xff]   ;;  %v9058_v6 = vld [vmem:[%s10913_s5 + $0x128] sm:$0xff]  }
 0x506   : >> { %7953 = vmatprep.subr.bf16.mxu0 %v9207_v13  ;;  %8133 = vmatprep.subr.bf16.mxu1 %v9207_v13  ;;  %v9057_v35 = vld [vmem:[%s10913_s5 + $0x120] sm:$0xff]   ;;  %v9059_v30 = vld [vmem:[%s10913_s5 + $0x130] sm:$0xff]   ;;  %v9060_v36 = vld [vmem:[%s10913_s5 + $0x138] sm:$0xff]  }
 0x507   : >> { %v6716_v63 = vld [vmem:[%s10063_s14 + $0x21] sm:$0xff]  ;;  %v9063_v8 = vld [vmem:[%s10913_s5 + $0x150] sm:$0xff]   ;;  %v9064_v10 = vld [vmem:[%s10913_s5 + $0x158] sm:$0xff]  }
 0x508   : >> { %v10264_v18 = vpack.c.bf16 %v6716_v63, %v6716_v63  ;;  %v9061_v37 = vld [vmem:[%s10913_s5 + $0x140] sm:$0xff]   ;;  %v9062_v12 = vld [vmem:[%s10913_s5 + $0x148] sm:$0xff]   ;;  %v9067_v17 = vld [vmem:[%s10913_s5 + $0x170] sm:$0xff]  }
 0x509   : >> { %7954 = vmatpush3.bf16.msra.mxu0 %v9025_v25  ;;  %8134 = vmatpush3.bf16.msra.mxu1 %v9025_v25  ;;  %v9065_v59 = vld [vmem:[%s10913_s5 + $0x160] sm:$0xff]   ;;  %v9066_v14 = vld [vmem:[%s10913_s5 + $0x168] sm:$0xff]   ;;  %v9068_v57 = vld [vmem:[%s10913_s5 + $0x178] sm:$0xff]  }
 0x50a   : >> { %7955 = vmatprep.subr.bf16.mxu0 %v9207_v13  ;;  %8135 = vmatprep.subr.bf16.mxu1 %v9207_v13  ;;  %v6741_v25 = vld [vmem:[%s10063_s14 + $0x22] sm:$0xff]  ;;  %v9071_v61 = vld [vmem:[%s10913_s5 + $0x190] sm:$0xff]   ;;  %v9072_v51 = vld [vmem:[%s10913_s5 + $0x198] sm:$0xff]  }
 0x50b   : >> { %v9081_v0 = vld [vmem:[%s10913_s5 + $0x1e0] sm:$0xff]   ;;  %v9082_v48 = vld [vmem:[%s10913_s5 + $0x1e8] sm:$0xff]   ;;  %v9091_v24 = vld [vmem:[%s10913_s5 + $0x230] sm:$0xff]  }
 0x50c   : >> { %v9092_v28 = vld [vmem:[%s10913_s5 + $0x238] sm:$0xff]  }
 0x50d   : >> { %7956 = vmatpush3.bf16.msra.mxu0 %v9026_v26  ;;  %8136 = vmatpush3.bf16.msra.mxu1 %v9026_v26  ;;  %v10313_v26 = vpack.c.bf16 %v6741_v25, %v6741_v25 }
 0x50e   : >> { %7957 = vmatprep.subr.bf16.mxu0 %v9207_v13  ;;  %8137 = vmatprep.subr.bf16.mxu1 %v9207_v13 }
 0x511   : >> { %7958 = vmatpush3.bf16.msra.mxu0 %v9027_v32  ;;  %8138 = vmatpush3.bf16.msra.mxu1 %v9027_v32  ;;  %v9069_v32 = vld [vmem:[%s10913_s5 + $0x180] sm:$0xff]  }
 0x512   : >> { %7959 = vmatprep.subr.bf16.mxu0 %v9207_v13  ;;  %8139 = vmatprep.subr.bf16.mxu1 %v9207_v13 }
 0x515   : >> { %7960 = vmatpush3.bf16.msra.mxu0 %v9028_v2  ;;  %8140 = vmatpush3.bf16.msra.mxu1 %v9028_v2  ;;  %v9070_v2 = vld [vmem:[%s10913_s5 + $0x188] sm:$0xff]  }
 0x516   : >> { %7965 = vmatprep.subr.bf16.mxu0 %v9207_v13  ;;  %8145 = vmatprep.subr.bf16.mxu1 %v9207_v13 }
 0x518   : >> { %7962 = vmatmul.mubr.bf16.vlgmr.msra.gmra.mrb[0].mxu0 %v3091_v34  ;;  %8142 = vmatmul.mubr.bf16.vlgmr.msra.gmra.mrb[0].mxu1 %v10069_v7  ;;  %v9073_v34 = vld [vmem:[%s10913_s5 + $0x1a0] sm:$0xff]  }
 0x519   : >> { %7966 = vmatpush3.bf16.msra.mxu0 %v9029_v52  ;;  %8146 = vmatpush3.bf16.msra.mxu1 %v9029_v52  ;;  %v9075_v52 = vld [vmem:[%s10913_s5 + $0x1b0] sm:$0xff]  }
 0x51a   : >> { %7967 = vmatprep.subr.bf16.mxu0 %v9207_v13  ;;  %8147 = vmatprep.subr.bf16.mxu1 %v9207_v13 }
 0x51b   : >> { %7981 = vmatprep.mubr.msk.bf16.mxu0 %vm9208_vm12, %v9207_v13  ;;  %8161 = vmatprep.mubr.msk.bf16.mxu1 %vm9208_vm12, %v9207_v13 }
 0x51d   : >> { %7968 = vmatpush3.bf16.msra.mxu0 %v9030_v9  ;;  %8148 = vmatpush3.bf16.msra.mxu1 %v9030_v9  ;;  %v9076_v9 = vld [vmem:[%s10913_s5 + $0x1b8] sm:$0xff]  }
 0x51e   : >> { %7969 = vmatprep.subr.bf16.mxu0 %v9207_v13  ;;  %8149 = vmatprep.subr.bf16.mxu1 %v9207_v13 }
 0x521   : >> { %7970 = vmatpush3.bf16.msra.mxu0 %v9031_v31  ;;  %8150 = vmatpush3.bf16.msra.mxu1 %v9031_v31  ;;  %v6768_v31 = vld [vmem:[%s10063_s14 + $0x30] sm:$0xff] }
 0x522   : >> { %7971 = vmatprep.subr.bf16.mxu0 %v9207_v13  ;;  %8151 = vmatprep.subr.bf16.mxu1 %v9207_v13 }
 0x525   : >> { %7972 = vmatpush3.bf16.msra.mxu0 %v9032_v60  ;;  %8152 = vmatpush3.bf16.msra.mxu1 %v9032_v60  ;;  %v4295_v60 = vpack.c.bf16 %v6768_v31, %v6768_v31 }
 0x526   : >> { %7973 = vmatprep.subr.bf16.mxu0 %v9207_v13  ;;  %8153 = vmatprep.subr.bf16.mxu1 %v9207_v13 }
 0x529   : >> { %7974 = vmatpush3.bf16.msra.mxu0 %v9033_v1  ;;  %8154 = vmatpush3.bf16.msra.mxu1 %v9033_v1  ;;  %v9077_v1 = vld [vmem:[%s10913_s5 + $0x1c0] sm:$0xff]  }
 0x52a   : >> { %7975 = vmatprep.subr.bf16.mxu0 %v9207_v13  ;;  %8155 = vmatprep.subr.bf16.mxu1 %v9207_v13 }
 0x52d   : >> { %7976 = vmatpush3.bf16.msra.mxu0 %v9034_v4  ;;  %8156 = vmatpush3.bf16.msra.mxu1 %v9034_v4  ;;  %v9078_v4 = vld [vmem:[%s10913_s5 + $0x1c8] sm:$0xff]  }
 0x52e   : >> { %7977 = vmatprep.subr.bf16.mxu0 %v9207_v13  ;;  %8157 = vmatprep.subr.bf16.mxu1 %v9207_v13 }
 0x531   : >> { %7978 = vmatpush3.bf16.msra.mxu0 %v9035_v49  ;;  %8158 = vmatpush3.bf16.msra.mxu1 %v9035_v49  ;;  %v9079_v49 = vld [vmem:[%s10913_s5 + $0x1d0] sm:$0xff]  }
 0x532   : >> { %7979 = vmatprep.subr.bf16.mxu0 %v9207_v13  ;;  %8159 = vmatprep.subr.bf16.mxu1 %v9207_v13 }
 0x535   : >> { %7980 = vmatpush3.bf16.msra.mxu0 %v9036_v47  ;;  %8160 = vmatpush3.bf16.msra.mxu1 %v9036_v47  ;;  %v9080_v47 = vld [vmem:[%s10913_s5 + $0x1d8] sm:$0xff]  }
 0x536   : >> { %7985 = vmatprep.subr.bf16.mxu0 %v9207_v13  ;;  %8165 = vmatprep.subr.bf16.mxu1 %v9207_v13 }
 0x538   : >> { %7982 = vmatmul.mubr.bf16.vlgmr.msra.gmra.mrb[0].mxu0 %v3073_v56  ;;  %8162 = vmatmul.mubr.bf16.vlgmr.msra.gmra.mrb[0].mxu1 %v10121_v45  ;;  %v9084_v56 = vld [vmem:[%s10913_s5 + $0x1f8] sm:$0xff]  }
 0x539   : >> { %7986 = vmatpush3.bf16.msra.mxu0 %v9037_v43  ;;  %8166 = vmatpush3.bf16.msra.mxu1 %v9037_v43  ;;  %v9083_v43 = vld [vmem:[%s10913_s5 + $0x1f0] sm:$0xff]  }
 0x53a   : >> { %7987 = vmatprep.subr.bf16.mxu0 %v9207_v13  ;;  %8167 = vmatprep.subr.bf16.mxu1 %v9207_v13 }
 0x53b   : >> { %8001 = vmatprep.mubr.msk.bf16.mxu0 %vm9208_vm12, %v9207_v13  ;;  %8181 = vmatprep.mubr.msk.bf16.mxu1 %vm9208_vm12, %v9207_v13 }
 0x53d   : >> { %7988 = vmatpush3.bf16.msra.mxu0 %v9038_v15  ;;  %8168 = vmatpush3.bf16.msra.mxu1 %v9038_v15 }
 0x53e   : >> { %7989 = vmatprep.subr.bf16.mxu0 %v9207_v13  ;;  %8169 = vmatprep.subr.bf16.mxu1 %v9207_v13 }
 0x541   : >> { %7990 = vmatpush3.bf16.msra.mxu0 %v9039_v46  ;;  %8170 = vmatpush3.bf16.msra.mxu1 %v9039_v46  ;;  %v9085_v46 = vld [vmem:[%s10913_s5 + $0x200] sm:$0xff]  }
 0x542   : >> { %7991 = vmatprep.subr.bf16.mxu0 %v9207_v13  ;;  %8171 = vmatprep.subr.bf16.mxu1 %v9207_v13 }
 0x545   : >> { %7992 = vmatpush3.bf16.msra.mxu0 %v9040_v42  ;;  %8172 = vmatpush3.bf16.msra.mxu1 %v9040_v42  ;;  %v9086_v42 = vld [vmem:[%s10913_s5 + $0x208] sm:$0xff]  }
 0x546   : >> { %7993 = vmatprep.subr.bf16.mxu0 %v9207_v13  ;;  %8173 = vmatprep.subr.bf16.mxu1 %v9207_v13 }
 0x549   : >> { %7994 = vmatpush3.bf16.msra.mxu0 %v9041_v22  ;;  %8174 = vmatpush3.bf16.msra.mxu1 %v9041_v22  ;;  %v9087_v22 = vld [vmem:[%s10913_s5 + $0x210] sm:$0xff]  }
 0x54a   : >> { %7995 = vmatprep.subr.bf16.mxu0 %v9207_v13  ;;  %8175 = vmatprep.subr.bf16.mxu1 %v9207_v13 }
 0x54d   : >> { %7996 = vmatpush3.bf16.msra.mxu0 %v9042_v23  ;;  %8176 = vmatpush3.bf16.msra.mxu1 %v9042_v23  ;;  %v9088_v23 = vld [vmem:[%s10913_s5 + $0x218] sm:$0xff]  }
 0x54e   : >> { %7997 = vmatprep.subr.bf16.mxu0 %v9207_v13  ;;  %8177 = vmatprep.subr.bf16.mxu1 %v9207_v13 }
 0x551   : >> { %7998 = vmatpush3.bf16.msra.mxu0 %v9043_v58  ;;  %8178 = vmatpush3.bf16.msra.mxu1 %v9043_v58  ;;  %v9089_v58 = vld [vmem:[%s10913_s5 + $0x220] sm:$0xff]  }
 0x552   : >> { %7999 = vmatprep.subr.bf16.mxu0 %v9207_v13  ;;  %8179 = vmatprep.subr.bf16.mxu1 %v9207_v13 }
 0x555   : >> { %8000 = vmatpush3.bf16.msra.mxu0 %v9044_v5  ;;  %8180 = vmatpush3.bf16.msra.mxu1 %v9044_v5  ;;  %v9090_v5 = vld [vmem:[%s10913_s5 + $0x228] sm:$0xff]  }
 0x556   : >> { %8005 = vmatprep.subr.bf16.mxu0 %v9207_v13  ;;  %8185 = vmatprep.subr.bf16.mxu1 %v9207_v13 }
 0x558   : >> { %8002 = vmatmul.mubr.bf16.vlgmr.msra.gmra.mrb[0].mxu0 %v3286_v44  ;;  %8182 = vmatmul.mubr.bf16.vlgmr.msra.gmra.mrb[0].mxu1 %v10167_v50  ;;  %v6770_v44 = vld [vmem:[%s10063_s14 + $0x32] sm:$0xff] }
 0x559   : >> { %8006 = vmatpush3.bf16.msra.mxu0 %v9045_v29  ;;  %8186 = vmatpush3.bf16.msra.mxu1 %v9045_v29 }
 0x55a   : >> { %8007 = vmatprep.subr.bf16.mxu0 %v9207_v13  ;;  %8187 = vmatprep.subr.bf16.mxu1 %v9207_v13 }
 0x55b   : >> { %8021 = vmatprep.mubr.msk.bf16.mxu0 %vm9208_vm12, %v9207_v13  ;;  %8201 = vmatprep.mubr.msk.bf16.mxu1 %vm9208_vm12, %v9207_v13 }
 0x55d   : >> { %8008 = vmatpush3.bf16.msra.mxu0 %v9046_v19  ;;  %8188 = vmatpush3.bf16.msra.mxu1 %v9046_v19 }
 0x55e   : >> { %8009 = vmatprep.subr.bf16.mxu0 %v9207_v13  ;;  %8189 = vmatprep.subr.bf16.mxu1 %v9207_v13 }
 0x561   : >> { %8010 = vmatpush3.bf16.msra.mxu0 %v9047_v55  ;;  %8190 = vmatpush3.bf16.msra.mxu1 %v9047_v55 }
 0x562   : >> { %8011 = vmatprep.subr.bf16.mxu0 %v9207_v13  ;;  %8191 = vmatprep.subr.bf16.mxu1 %v9207_v13 }
 0x565   : >> { %8012 = vmatpush3.bf16.msra.mxu0 %v9048_v40  ;;  %8192 = vmatpush3.bf16.msra.mxu1 %v9048_v40 }
 0x566   : >> { %8013 = vmatprep.subr.bf16.mxu0 %v9207_v13  ;;  %8193 = vmatprep.subr.bf16.mxu1 %v9207_v13 }
 0x569   : >> { %8014 = vmatpush3.bf16.msra.mxu0 %v9049_v27  ;;  %8194 = vmatpush3.bf16.msra.mxu1 %v9049_v27 }
 0x56a   : >> { %8015 = vmatprep.subr.bf16.mxu0 %v9207_v13  ;;  %8195 = vmatprep.subr.bf16.mxu1 %v9207_v13 }
 0x56d   : >> { %8016 = vmatpush3.bf16.msra.mxu0 %v9050_v33  ;;  %8196 = vmatpush3.bf16.msra.mxu1 %v9050_v33 }
 0x56e   : >> { %8017 = vmatprep.subr.bf16.mxu0 %v9207_v13  ;;  %8197 = vmatprep.subr.bf16.mxu1 %v9207_v13 }
 0x571   : >> { %8018 = vmatpush3.bf16.msra.mxu0 %v9051_v41  ;;  %8198 = vmatpush3.bf16.msra.mxu1 %v9051_v41 }
 0x572   : >> { %8019 = vmatprep.subr.bf16.mxu0 %v9207_v13  ;;  %8199 = vmatprep.subr.bf16.mxu1 %v9207_v13 }
 0x575   : >> { %8020 = vmatpush3.bf16.msra.mxu0 %v9052_v62  ;;  %8200 = vmatpush3.bf16.msra.mxu1 %v9052_v62 }
 0x576   : >> { %8025 = vmatprep.subr.bf16.mxu0 %v9207_v13  ;;  %8205 = vmatprep.subr.bf16.mxu1 %v9207_v13 }
 0x578   : >> { %8022 = vmatmul.mubr.bf16.vlgmr.msra.gmra.mrb[0].mxu0 %v10121_v45  ;;  %8202 = vmatmul.mubr.bf16.vlgmr.msra.gmra.mrb[0].mxu1 %v10215_v38  ;;  %v6769_v45 = vld [vmem:[%s10063_s14 + $0x31] sm:$0xff]  ;;  %s6774_s14 = sshll.u32 %s9199_s19, 2  ;;  %s3068_s19 = sadd.s32 1, %s9199_s19  }
 0x579   : >> { %8026 = vmatpush3.bf16.msra.mxu0 %v9053_v39  ;;  %8206 = vmatpush3.bf16.msra.mxu1 %v9053_v39  ;;  %v4338_v15 = vpack.c.bf16 %v6769_v45, %v6769_v45  ;;  %s4581_s15 = scalar_lea.vmem [#allocation4], %s6774_s14  ;;  %p3065_p6 = scmp.ge.s32.totalorder %s3068_s19, 4  }
 0x57a   : >> { %8027 = vmatprep.subr.bf16.mxu0 %v9207_v13  ;;  %8207 = vmatprep.subr.bf16.mxu1 %v9207_v13  ;;  %vm9209_vm14 = vmmov (%p3065_p6), 0   ;;  %v9096_v63 = vld [vmem:[%s10915_s7 + $0x58] sm:$0xff] (%p3065_p6)   ;;  %v9102_v25 = vld [vmem:[%s10915_s7 + $0x8] sm:$0xff] (%p3065_p6)   ;;  %vm5934_vm15 = vcmask (%p3065_p6), 1041408   ;;  %vm5930_vm0 = vcmask (%p3065_p6), 15360   ;;  %vm6086_vm2 = vcmask (%p3065_p6), 1040384  }
 0x57b   : >> { %8041 = vmatprep.mubr.msk.bf16.mxu0 %vm9208_vm12, %v9207_v13  ;;  %8221 = vmatprep.mubr.msk.bf16.mxu1 %vm9208_vm12, %v9207_v13 }
 0x57d   : >> { %8028 = vmatpush3.bf16.msra.mxu0 %v9054_v20  ;;  %8208 = vmatpush3.bf16.msra.mxu1 %v9054_v20 }
 0x57e   : >> { %8029 = vmatprep.subr.bf16.mxu0 %v9207_v13  ;;  %8209 = vmatprep.subr.bf16.mxu1 %v9207_v13 }
 0x581   : >> { %8030 = vmatpush3.bf16.msra.mxu0 %v9055_v21  ;;  %8210 = vmatpush3.bf16.msra.mxu1 %v9055_v21 }
 0x582   : >> { %8031 = vmatprep.subr.bf16.mxu0 %v9207_v13  ;;  %8211 = vmatprep.subr.bf16.mxu1 %v9207_v13 }
 0x585   : >> { %8032 = vmatpush3.bf16.msra.mxu0 %v9056_v54  ;;  %8212 = vmatpush3.bf16.msra.mxu1 %v9056_v54 }
 0x586   : >> { %8033 = vmatprep.subr.bf16.mxu0 %v9207_v13  ;;  %8213 = vmatprep.subr.bf16.mxu1 %v9207_v13 }
 0x589   : >> { %8034 = vmatpush3.bf16.msra.mxu0 %v9057_v35  ;;  %8214 = vmatpush3.bf16.msra.mxu1 %v9057_v35 }
 0x58a   : >> { %8035 = vmatprep.subr.bf16.mxu0 %v9207_v13  ;;  %8215 = vmatprep.subr.bf16.mxu1 %v9207_v13 }
 0x58d   : >> { %8036 = vmatpush3.bf16.msra.mxu0 %v9058_v6  ;;  %8216 = vmatpush3.bf16.msra.mxu1 %v9058_v6  ;;  %v10933_v6 = vmov (%p3065_p6), 0.0  }
 0x58e   : >> { %8037 = vmatprep.subr.bf16.mxu0 %v9207_v13  ;;  %8217 = vmatprep.subr.bf16.mxu1 %v9207_v13 }
 0x591   : >> { %8038 = vmatpush3.bf16.msra.mxu0 %v9059_v30  ;;  %8218 = vmatpush3.bf16.msra.mxu1 %v9059_v30  ;;  %v9093_v30 = vld [vmem:[%s10915_s7 + $0x40] sm:$0xff] (%p3065_p6)  }
 0x592   : >> { %8039 = vmatprep.subr.bf16.mxu0 %v9207_v13  ;;  %8219 = vmatprep.subr.bf16.mxu1 %v9207_v13 }
 0x595   : >> { %8040 = vmatpush3.bf16.msra.mxu0 %v9060_v36  ;;  %8220 = vmatpush3.bf16.msra.mxu1 %v9060_v36  ;;  %v9095_v36 = vld [vmem:[%s10915_s7 + $0x50] sm:$0xff] (%p3065_p6)  }
 0x596   : >> { %8045 = vmatprep.subr.bf16.mxu0 %v9207_v13  ;;  %8225 = vmatprep.subr.bf16.mxu1 %v9207_v13 }
 0x598   : >> { %8042 = vmatmul.mubr.bf16.vlgmr.msra.gmra.mrb[0].mxu0 %v10069_v7  ;;  %8222 = vmatmul.mubr.bf16.vlgmr.msra.gmra.mrb[0].mxu1 %v10264_v18  ;;  %v9074_v7 = vld [vmem:[%s10913_s5 + $0x1a8] sm:$0xff]  }
 0x599   : >> { %8046 = vmatpush3.bf16.msra.mxu0 %v9061_v37  ;;  %8226 = vmatpush3.bf16.msra.mxu1 %v9061_v37  ;;  %v9098_v37 = vld [vmem:[%s10915_s7 + $0x68] sm:$0xff] (%p3065_p6)  }
 0x59a   : >> { %8047 = vmatprep.subr.bf16.mxu0 %v9207_v13  ;;  %8227 = vmatprep.subr.bf16.mxu1 %v9207_v13 }
 0x59b   : >> { %8061 = vmatprep.mubr.msk.bf16.mxu0 %vm9208_vm12, %v9207_v13  ;;  %8241 = vmatprep.mubr.msk.bf16.mxu1 %vm9208_vm12, %v9207_v13 }
 0x59d   : >> { %8048 = vmatpush3.bf16.msra.mxu0 %v9062_v12  ;;  %8228 = vmatpush3.bf16.msra.mxu1 %v9062_v12  ;;  %v9099_v12 = vld [vmem:[%s10915_s7 + $0x70] sm:$0xff] (%p3065_p6)  }
 0x59e   : >> { %8049 = vmatprep.subr.bf16.mxu0 %v9207_v13  ;;  %8229 = vmatprep.subr.bf16.mxu1 %v9207_v13 }
 0x5a1   : >> { %8050 = vmatpush3.bf16.msra.mxu0 %v9063_v8  ;;  %8230 = vmatpush3.bf16.msra.mxu1 %v9063_v8  ;;  %v9100_v8 = vld [vmem:[%s10915_s7 + $0x78] sm:$0xff] (%p3065_p6)  }
 0x5a2   : >> { %8051 = vmatprep.subr.bf16.mxu0 %v9207_v13  ;;  %8231 = vmatprep.subr.bf16.mxu1 %v9207_v13 }
 0x5a5   : >> { %8052 = vmatpush3.bf16.msra.mxu0 %v9064_v10  ;;  %8232 = vmatpush3.bf16.msra.mxu1 %v9064_v10 }
 0x5a6   : >> { %8053 = vmatprep.subr.bf16.mxu0 %v9207_v13  ;;  %8233 = vmatprep.subr.bf16.mxu1 %v9207_v13 }
 0x5a9   : >> { %8054 = vmatpush3.bf16.msra.mxu0 %v9065_v59  ;;  %8234 = vmatpush3.bf16.msra.mxu1 %v9065_v59 }
 0x5aa   : >> { %8055 = vmatprep.subr.bf16.mxu0 %v9207_v13  ;;  %8235 = vmatprep.subr.bf16.mxu1 %v9207_v13 }
 0x5ad   : >> { %8056 = vmatpush3.bf16.msra.mxu0 %v9066_v14  ;;  %8236 = vmatpush3.bf16.msra.mxu1 %v9066_v14 }
 0x5ae   : >> { %8057 = vmatprep.subr.bf16.mxu0 %v9207_v13  ;;  %8237 = vmatprep.subr.bf16.mxu1 %v9207_v13 }
 0x5b1   : >> { %8058 = vmatpush3.bf16.msra.mxu0 %v9067_v17  ;;  %8238 = vmatpush3.bf16.msra.mxu1 %v9067_v17 }
 0x5b2   : >> { %8059 = vmatprep.subr.bf16.mxu0 %v9207_v13  ;;  %8239 = vmatprep.subr.bf16.mxu1 %v9207_v13 }
 0x5b5   : >> { %8060 = vmatpush3.bf16.msra.mxu0 %v9068_v57  ;;  %8240 = vmatpush3.bf16.msra.mxu1 %v9068_v57  ;;  %v9101_v57 = vld [vmem:[%s10915_s7] sm:$0xff] (%p3065_p6)  }
 0x5b6   : >> { %8065 = vmatprep.subr.bf16.mxu0 %v9207_v13  ;;  %8245 = vmatprep.subr.bf16.mxu1 %v9207_v13 }
 0x5b8   : >> { %8062 = vmatmul.mubr.bf16.vlgmr.msra.gmra.mrb[0].mxu0 %v10167_v50  ;;  %8242 = vmatmul.mubr.bf16.vlgmr.msra.gmra.mrb[0].mxu1 %v10313_v26  ;;  %v4381_v50 = vpack.c.bf16 %v6770_v44, %v6770_v44  ;;  %v9124_v44 = vld [vmem:[%s10915_s7 + $0xf8] sm:$0xff] (%p3065_p6)  }
 0x5b9   : >> { %8066 = vmatpush3.bf16.msra.mxu0 %v9069_v32  ;;  %8246 = vmatpush3.bf16.msra.mxu1 %v9069_v32  ;;  %v9104_v32 = vld [vmem:[%s10915_s7 + $0x18] sm:$0xff] (%p3065_p6)  }
 0x5ba   : >> { %8067 = vmatprep.subr.bf16.mxu0 %v9207_v13  ;;  %8247 = vmatprep.subr.bf16.mxu1 %v9207_v13 }
 0x5bb   : >> { %8081 = vmatprep.mubr.msk.bf16.mxu0 %vm9208_vm12, %v9207_v13  ;;  %8261 = vmatprep.mubr.msk.bf16.mxu1 %vm9208_vm12, %v9207_v13 }
 0x5bd   : >> { %8068 = vmatpush3.bf16.msra.mxu0 %v9070_v2  ;;  %8248 = vmatpush3.bf16.msra.mxu1 %v9070_v2  ;;  %v9105_v2 = vld [vmem:[%s10915_s7 + $0x20] sm:$0xff] (%p3065_p6)  }
 0x5be   : >> { %8069 = vmatprep.subr.bf16.mxu0 %v9207_v13  ;;  %8249 = vmatprep.subr.bf16.mxu1 %v9207_v13 }
 0x5c1   : >> { %8070 = vmatpush3.bf16.msra.mxu0 %v9071_v61  ;;  %8250 = vmatpush3.bf16.msra.mxu1 %v9071_v61  ;;  %v9106_v61 = vld [vmem:[%s10915_s7 + $0x28] sm:$0xff] (%p3065_p6)  }
 0x5c2   : >> { %8071 = vmatprep.subr.bf16.mxu0 %v9207_v13  ;;  %8251 = vmatprep.subr.bf16.mxu1 %v9207_v13 }
 0x5c5   : >> { %8072 = vmatpush3.bf16.msra.mxu0 %v9072_v51  ;;  %8252 = vmatpush3.bf16.msra.mxu1 %v9072_v51  ;;  %v9107_v51 = vld [vmem:[%s10915_s7 + $0x30] sm:$0xff] (%p3065_p6)  }
 0x5c6   : >> { %8073 = vmatprep.subr.bf16.mxu0 %v9207_v13  ;;  %8253 = vmatprep.subr.bf16.mxu1 %v9207_v13 }
 0x5c9   : >> { %8074 = vmatpush3.bf16.msra.mxu0 %v9073_v34  ;;  %8254 = vmatpush3.bf16.msra.mxu1 %v9073_v34  ;;  %v9108_v34 = vld [vmem:[%s10915_s7 + $0x38] sm:$0xff] (%p3065_p6)  }
 0x5ca   : >> { %8075 = vmatprep.subr.bf16.mxu0 %v9207_v13  ;;  %8255 = vmatprep.subr.bf16.mxu1 %v9207_v13 }
 0x5cd   : >> { %8076 = vmatpush3.bf16.msra.mxu0 %v9074_v7  ;;  %8256 = vmatpush3.bf16.msra.mxu1 %v9074_v7 }
 0x5ce   : >> { %8077 = vmatprep.subr.bf16.mxu0 %v9207_v13  ;;  %8257 = vmatprep.subr.bf16.mxu1 %v9207_v13 }
 0x5d1   : >> { %8078 = vmatpush3.bf16.msra.mxu0 %v9075_v52  ;;  %8258 = vmatpush3.bf16.msra.mxu1 %v9075_v52 }
 0x5d2   : >> { %8079 = vmatprep.subr.bf16.mxu0 %v9207_v13  ;;  %8259 = vmatprep.subr.bf16.mxu1 %v9207_v13 }
 0x5d5   : >> { %8080 = vmatpush3.bf16.msra.mxu0 %v9076_v9  ;;  %8260 = vmatpush3.bf16.msra.mxu1 %v9076_v9  ;;  %v9109_v9 = vld [vmem:[%s10915_s7 + $0x80] sm:$0xff] (%p3065_p6)  }
 0x5d6   : >> { %8085 = vmatprep.subr.bf16.mxu0 %v9207_v13  ;;  %8265 = vmatprep.subr.bf16.mxu1 %v9207_v13 }
 0x5d8   : >> { %8082 = vmatmul.mubr.bf16.vlgmr.msra.gmra.mrb[0].mxu0 %v10215_v38  ;;  %8262 = vmatmul.mubr.bf16.vlgmr.msra.gmra.mrb[0].mxu1 %v4295_v60 }
 0x5d9   : >> { %8086 = vmatpush3.bf16.msra.mxu0 %v9077_v1  ;;  %8266 = vmatpush3.bf16.msra.mxu1 %v9077_v1  ;;  %v9110_v1 = vld [vmem:[%s10915_s7 + $0x88] sm:$0xff] (%p3065_p6)  }
 0x5da   : >> { %8087 = vmatprep.subr.bf16.mxu0 %v9207_v13  ;;  %8267 = vmatprep.subr.bf16.mxu1 %v9207_v13 }
 0x5db   : >> { %8101 = vmatprep.mubr.msk.bf16.mxu0 %vm9208_vm12, %v9207_v13  ;;  %8281 = vmatprep.mubr.msk.bf16.mxu1 %vm9208_vm12, %v9207_v13 }
 0x5dd   : >> { %8088 = vmatpush3.bf16.msra.mxu0 %v9078_v4  ;;  %8268 = vmatpush3.bf16.msra.mxu1 %v9078_v4  ;;  %v9111_v4 = vld [vmem:[%s10915_s7 + $0x90] sm:$0xff] (%p3065_p6)  }
 0x5de   : >> { %8089 = vmatprep.subr.bf16.mxu0 %v9207_v13  ;;  %8269 = vmatprep.subr.bf16.mxu1 %v9207_v13 }
 0x5e1   : >> { %8090 = vmatpush3.bf16.msra.mxu0 %v9079_v49  ;;  %8270 = vmatpush3.bf16.msra.mxu1 %v9079_v49  ;;  %v9112_v49 = vld [vmem:[%s10915_s7 + $0x98] sm:$0xff] (%p3065_p6)  }
 0x5e2   : >> { %8091 = vmatprep.subr.bf16.mxu0 %v9207_v13  ;;  %8271 = vmatprep.subr.bf16.mxu1 %v9207_v13 }
 0x5e5   : >> { %8092 = vmatpush3.bf16.msra.mxu0 %v9080_v47  ;;  %8272 = vmatpush3.bf16.msra.mxu1 %v9080_v47  ;;  %v9113_v47 = vld [vmem:[%s10915_s7 + $0xa0] sm:$0xff] (%p3065_p6)  }
 0x5e6   : >> { %8093 = vmatprep.subr.bf16.mxu0 %v9207_v13  ;;  %8273 = vmatprep.subr.bf16.mxu1 %v9207_v13 }
 0x5e9   : >> { %8094 = vmatpush3.bf16.msra.mxu0 %v9081_v0  ;;  %8274 = vmatpush3.bf16.msra.mxu1 %v9081_v0  ;;  %v9114_v0 = vld [vmem:[%s10915_s7 + $0xa8] sm:$0xff] (%p3065_p6)  }
 0x5ea   : >> { %8095 = vmatprep.subr.bf16.mxu0 %v9207_v13  ;;  %8275 = vmatprep.subr.bf16.mxu1 %v9207_v13 }
 0x5ed   : >> { %8096 = vmatpush3.bf16.msra.mxu0 %v9082_v48  ;;  %8276 = vmatpush3.bf16.msra.mxu1 %v9082_v48  ;;  %v9115_v48 = vld [vmem:[%s10915_s7 + $0xb0] sm:$0xff] (%p3065_p6)  }
 0x5ee   : >> { %8097 = vmatprep.subr.bf16.mxu0 %v9207_v13  ;;  %8277 = vmatprep.subr.bf16.mxu1 %v9207_v13 }
 0x5f1   : >> { %8098 = vmatpush3.bf16.msra.mxu0 %v9083_v43  ;;  %8278 = vmatpush3.bf16.msra.mxu1 %v9083_v43  ;;  %v9116_v43 = vld [vmem:[%s10915_s7 + $0xb8] sm:$0xff] (%p3065_p6)  }
 0x5f2   : >> { %8099 = vmatprep.subr.bf16.mxu0 %v9207_v13  ;;  %8279 = vmatprep.subr.bf16.mxu1 %v9207_v13 }
 0x5f5   : >> { %8100 = vmatpush3.bf16.msra.mxu0 %v9084_v56  ;;  %8280 = vmatpush3.bf16.msra.mxu1 %v9084_v56 }
 0x5f6   : >> { %8105 = vmatprep.subr.bf16.mxu0 %v9207_v13  ;;  %8285 = vmatprep.subr.bf16.mxu1 %v9207_v13 }
 0x5f8   : >> { %8102 = vmatmul.mubr.bf16.vlgmr.msra.gmra.mrb[0].mxu0 %v10264_v18  ;;  %8282 = vmatmul.mubr.bf16.vlgmr.msra.gmra.mrb[0].mxu1 %v4338_v15  ;;  %v9097_v18 = vld [vmem:[%s10915_s7 + $0x60] sm:$0xff] (%p3065_p6)  }
 0x5f9   : >> { %8106 = vmatpush3.bf16.msra.mxu0 %v9085_v46  ;;  %8286 = vmatpush3.bf16.msra.mxu1 %v9085_v46 }
 0x5fa   : >> { %8107 = vmatprep.subr.bf16.mxu0 %v9207_v13  ;;  %8287 = vmatprep.subr.bf16.mxu1 %v9207_v13 }
 0x5fb   : >> { %8121 = vmatprep.mubr.msk.bf16.mxu0 %vm9208_vm12, %v9207_v13  ;;  %8301 = vmatprep.mubr.msk.bf16.mxu1 %vm9208_vm12, %v9207_v13 }
 0x5fd   : >> { %8108 = vmatpush3.bf16.msra.mxu0 %v9086_v42  ;;  %8288 = vmatpush3.bf16.msra.mxu1 %v9086_v42  ;;  %v9117_v42 = vld [vmem:[%s10915_s7 + $0xc0] sm:$0xff] (%p3065_p6)  }
 0x5fe   : >> { %8109 = vmatprep.subr.bf16.mxu0 %v9207_v13  ;;  %8289 = vmatprep.subr.bf16.mxu1 %v9207_v13 }
 0x601   : >> { %8110 = vmatpush3.bf16.msra.mxu0 %v9087_v22  ;;  %8290 = vmatpush3.bf16.msra.mxu1 %v9087_v22  ;;  %v9118_v22 = vld [vmem:[%s10915_s7 + $0xc8] sm:$0xff] (%p3065_p6)  }
 0x602   : >> { %8111 = vmatprep.subr.bf16.mxu0 %v9207_v13  ;;  %8291 = vmatprep.subr.bf16.mxu1 %v9207_v13 }
 0x605   : >> { %8112 = vmatpush3.bf16.msra.mxu0 %v9088_v23  ;;  %8292 = vmatpush3.bf16.msra.mxu1 %v9088_v23  ;;  %v9119_v23 = vld [vmem:[%s10915_s7 + $0xd0] sm:$0xff] (%p3065_p6)  }
 0x606   : >> { %8113 = vmatprep.subr.bf16.mxu0 %v9207_v13  ;;  %8293 = vmatprep.subr.bf16.mxu1 %v9207_v13 }
 0x609   : >> { %8114 = vmatpush3.bf16.msra.mxu0 %v9089_v58  ;;  %8294 = vmatpush3.bf16.msra.mxu1 %v9089_v58  ;;  %v9120_v58 = vld [vmem:[%s10915_s7 + $0xd8] sm:$0xff] (%p3065_p6)  }
 0x60a   : >> { %8115 = vmatprep.subr.bf16.mxu0 %v9207_v13  ;;  %8295 = vmatprep.subr.bf16.mxu1 %v9207_v13 }
 0x60d   : >> { %8116 = vmatpush3.bf16.msra.mxu0 %v9090_v5  ;;  %8296 = vmatpush3.bf16.msra.mxu1 %v9090_v5  ;;  %v9121_v5 = vld [vmem:[%s10915_s7 + $0xe0] sm:$0xff] (%p3065_p6)  }
 0x60e   : >> { %8117 = vmatprep.subr.bf16.mxu0 %v9207_v13  ;;  %8297 = vmatprep.subr.bf16.mxu1 %v9207_v13 }
 0x611   : >> { %8118 = vmatpush3.bf16.msra.mxu0 %v9091_v24  ;;  %8298 = vmatpush3.bf16.msra.mxu1 %v9091_v24  ;;  %v9122_v24 = vld [vmem:[%s10915_s7 + $0xe8] sm:$0xff] (%p3065_p6)  }
 0x612   : >> { %8119 = vmatprep.subr.bf16.mxu0 %v9207_v13  ;;  %8299 = vmatprep.subr.bf16.mxu1 %v9207_v13 }
 0x615   : >> { %8120 = vmatpush3.bf16.msra.mxu0 %v9092_v28  ;;  %8300 = vmatpush3.bf16.msra.mxu1 %v9092_v28  ;;  %v9123_v28 = vld [vmem:[%s10915_s7 + $0xf0] sm:$0xff] (%p3065_p6)  }
 0x616   : >> { %8305 = vmatprep.subr.mxu0 %v9207_v13  ;;  %8310 = vmatprep.subr.mxu1 %v9207_v13 }
 0x618   : >> { %8122 = vmatmul.mubr.bf16.vlgmr.msra.gmra.mrb[0].mxu0 %v10313_v26  ;;  %8302 = vmatmul.mubr.bf16.vlgmr.msra.gmra.mrb[0].mxu1 %v4381_v50  ;;  %v9103_v26 = vld [vmem:[%s10915_s7 + $0x10] sm:$0xff] (%p3065_p6)  }
 0x619   : >> { %8307 = vmatprep.mubr.msk.f32.mxu0 %vm9208_vm12, %v9207_v13  ;;  %8312 = vmatprep.mubr.msk.f32.mxu1 %vm9208_vm12, %v9207_v13 }
 0x6eb   : >> { %v4040_v29 = vpop.f32.mrb[0].mxu0  ;;  %v4416_v19 = vpop.f32.mrb[0].mxu1 }
 0x6ec   : >> { %v4423_v55 = vmax.f32 %v4040_v29, %v4416_v19  ;;  %v8123_v40 = vpop.f32.mrb[1].mxu0  ;;  %v8303_v27 = vpop.f32.mrb[1].mxu1  ;;  %v9125_v19 = vld [vmem:[%s10915_s7 + $0x100] sm:$0xff] (%p3065_p6)  }
 0x6ed   : >> { %v4043_v33 = vpop.f32.mrb[2].mxu0  ;;  %v4419_v41 = vpop.f32.mrb[2].mxu1  ;;  %v9127_v40 = vld [vmem:[%s10915_s7 + $0x110] sm:$0xff] (%p3065_p6)   ;;  %v9128_v27 = vld [vmem:[%s10915_s7 + $0x118] sm:$0xff] (%p3065_p6)  }
 0x6ee   : >> { %v8124_v62 = vpop.f32.mrb[3].mxu0  ;;  %v8304_v3 = vpop.f32.mrb[3].mxu1  ;;  %8306 = vmatpush3.msra.mxu0 %v4423_v55  ;;  %8311 = vmatpush3.msra.mxu1 %v4423_v55  ;;  %v9126_v55 = vld [vmem:[%s10915_s7 + $0x108] sm:$0xff] (%p3065_p6)   ;;  %v9129_v33 = vld [vmem:[%s10915_s7 + $0x120] sm:$0xff] (%p3065_p6)  }
 0x6ef   : >> { %8308 = vmatmul.mubr.msk.f32.vlgmr.msra.gmra.mrb[4].mxu0 %vm4424_vm13, %v9289_v11  ;;  %8313 = vmatmul.mubr.msk.f32.vlgmr.msra.gmra.mrb[4].mxu1 %vm4424_vm13, %v9303_v16  ;;  %v9130_v41 = vld [vmem:[%s10915_s7 + $0x128] sm:$0xff] (%p3065_p6)   ;;  %v9131_v62 = vld [vmem:[%s10915_s7 + $0x130] sm:$0xff] (%p3065_p6)   ;;  %v9132_v3 = vld [vmem:[%s10915_s7 + $0x138] sm:$0xff] (%p3065_p6)  }
 0x6f0   : > { %8315 = vmatprep.subr.bf16.mxu0 (%p3065_p6), %v10933_v6  ;;  %8495 = vmatprep.subr.bf16.mxu1 (%p3065_p6), %v10933_v6 }
 0x6f1   : > { %8331 = vmatprep.mubr.msk.bf16.mxu0 (%p3065_p6), %vm9209_vm14, %v10933_v6  ;;  %8511 = vmatprep.mubr.msk.bf16.mxu1 (%p3065_p6), %vm9209_vm14, %v10933_v6 }
 0x6f2   : > { %8316 = vmatpush3.bf16.msra.mxu0 (%p3065_p6), %v9093_v30  ;;  %8496 = vmatpush3.bf16.msra.mxu1 (%p3065_p6), %v9093_v30  ;;  %v9138_v30 = vld [vmem:[%s10915_s7 + $0x168] sm:$0xff] (%p3065_p6)  }
 0x6f3   : > { %8317 = vmatprep.subr.bf16.mxu0 (%p3065_p6), %v10933_v6  ;;  %8497 = vmatprep.subr.bf16.mxu1 (%p3065_p6), %v10933_v6 }
 0x7c2   : >> { %v4494_v38 = vpop.f32.mrb[4].mxu0  ;;  %v4567_v39 = vpop.f32.mrb[4].mxu1 }
 0x7c3   : >> { %v4571_v13 = vmax.f32 %v4494_v38, %v4567_v39  ;;  %v8309_v20 = vpop.f32.mrb[5].mxu0  ;;  %v8314_v21 = vpop.f32.mrb[5].mxu1  ;;  %3067 = sbr.rel (!%p3065_p6) target bundleno = 1271 (0x4f7), region = 179 }
 0x7c4   : > { %v9134_v20 = vld [vmem:[%s10915_s7 + $0x148] sm:$0xff] (%p3065_p6)   ;;  %v9135_v21 = vld [vmem:[%s10915_s7 + $0x150] sm:$0xff] (%p3065_p6)  }
 0x7c5   : >> { %v4578_v54 = vadd.f32 %v10013_v53, %v4571_v13  ;;  %v9094_v53 = vld [vmem:[%s10915_s7 + $0x48] sm:$0xff] (%p3065_p6)   ;;  %v9133_v13 = vld [vmem:[%s10915_s7 + $0x140] sm:$0xff] (%p3065_p6)  }
 0x7c6   : > { %8318 = vmatpush3.bf16.msra.mxu0 (%p3065_p6), %v9094_v53  ;;  %8498 = vmatpush3.bf16.msra.mxu1 (%p3065_p6), %v9094_v53  ;;  %v9139_v53 = vld [vmem:[%s10915_s7 + $0x170] sm:$0xff] (%p3065_p6)  }
 0x7c7   : >> { %v4579_v35 = vmax.f32 %v4578_v54, 0.0  ;;  %8319 = vmatprep.subr.bf16.mxu0 (%p3065_p6), %v10933_v6  ;;  %8499 = vmatprep.subr.bf16.mxu1 (%p3065_p6), %v10933_v6  ;;  %v9136_v54 = vld [vmem:[%s10915_s7 + $0x158] sm:$0xff] (%p3065_p6)  }
 0x7c9   : >> { %4582 = vst [vmem:[%s4581_s15] sm:$0xf] %v4579_v35  ;;  %v9137_v35 = vld [vmem:[%s10915_s7 + $0x160] sm:$0xff] (%p3065_p6)  }
 0x7ca   : > { %8320 = vmatpush3.bf16.msra.mxu0 %v9095_v36  ;;  %8500 = vmatpush3.bf16.msra.mxu1 %v9095_v36  ;;  %v9140_v36 = vld [vmem:[%s10915_s7 + $0x178] sm:$0xff]  }
 0x7cb   : > { %8321 = vmatprep.subr.bf16.mxu0 %v10933_v6  ;;  %8501 = vmatprep.subr.bf16.mxu1 %v10933_v6 }
 0x7ce   : > { %8322 = vmatpush3.bf16.msra.mxu0 %v9096_v63  ;;  %8502 = vmatpush3.bf16.msra.mxu1 %v9096_v63 }
 0x7cf   : > { %8323 = vmatprep.subr.bf16.mxu0 %v10933_v6  ;;  %8503 = vmatprep.subr.bf16.mxu1 %v10933_v6 }
 0x7d0   : > { %v4602_v10 = vld [vmem:[#allocation4 + $0x1] sm:$0x3]  ;;  %v5014_v59 = vld [vmem:[#allocation4 + $0x5] sm:$0x3]  ;;  %v5231_v50 = vld [vmem:[#allocation4 + $0x8] sm:$0x3] }
 0x7d1   : > { %v4603_v14 = vpack.c.bf16 %v4602_v10, %v4602_v10  ;;  %v10512_v17 = vpack.c.bf16 %v5014_v59, %v5014_v59  ;;  %v4584_v7 = vld [vmem:[#allocation4] sm:$0x3]  ;;  %v4906_v52 = vld [vmem:[#allocation4 + $0x4] sm:$0x3]  ;;  %v4797_v56 = vld [vmem:[#allocation4 + $0x2] sm:$0x3]  ;;  %v10653_v29 = vpack.c.bf16 %v5231_v50, %v5231_v50 }
 0x7d2   : > { %8324 = vmatpush3.bf16.msra.mxu0 %v9097_v18  ;;  %8504 = vmatpush3.bf16.msra.mxu1 %v9097_v18  ;;  %v4585_v31 = vpack.c.bf16 %v4584_v7, %v4584_v7  ;;  %v10562_v60 = vpack.c.bf16 %v4906_v52, %v4906_v52  ;;  %v5122_v45 = vld [vmem:[#allocation4 + $0x6] sm:$0x3]  ;;  %v4798_v15 = vpack.c.bf16 %v4797_v56, %v4797_v56  ;;  %v5339_v38 = vld [vmem:[#allocation4 + $0x9] sm:$0x3]  ;;  %v9145_v59 = vld [vmem:[%s10915_s7 + $0x1a0] sm:$0xff]  }
 0x7d3   : > { %8325 = vmatprep.subr.bf16.mxu0 %v10933_v6  ;;  %8505 = vmatprep.subr.bf16.mxu1 %v10933_v6  ;;  %v10606_v46 = vpack.c.bf16 %v5122_v45, %v5122_v45  ;;  %v10701_v39 = vpack.c.bf16 %v5339_v38, %v5339_v38  ;;  %v5447_v63 = vld [vmem:[#allocation4 + $0xa] sm:$0x3]  ;;  %v9154_v7 = vld [vmem:[%s10915_s7 + $0x1e8] sm:$0xff]   ;;  %v9155_v52 = vld [vmem:[%s10915_s7 + $0x1f0] sm:$0xff]  }
 0x7d4   : > { %v10749_v18 = vpack.c.bf16 %v5447_v63, %v5447_v63  ;;  %v9144_v10 = vld [vmem:[%s10915_s7 + $0x198] sm:$0xff]  }
 0x7d5   : > { %v9164_v56 = vld [vmem:[%s10915_s7 + $0x238] sm:$0xff]  }
 0x7d6   : > { %8326 = vmatpush3.bf16.msra.mxu0 %v9098_v37  ;;  %8506 = vmatpush3.bf16.msra.mxu1 %v9098_v37  ;;  %v9141_v37 = vld [vmem:[%s10915_s7 + $0x180] sm:$0xff]   ;;  %v5886_v45 = vld [vmem:[#allocation4 + $0xe] sm:$0x3] }
 0x7d7   : > { %8327 = vmatprep.subr.bf16.mxu0 %v10933_v6  ;;  %8507 = vmatprep.subr.bf16.mxu1 %v10933_v6 }
 0x7da   : > { %8328 = vmatpush3.bf16.msra.mxu0 %v9099_v12  ;;  %8508 = vmatpush3.bf16.msra.mxu1 %v9099_v12  ;;  %v9142_v12 = vld [vmem:[%s10915_s7 + $0x188] sm:$0xff]  }
 0x7db   : > { %8329 = vmatprep.subr.bf16.mxu0 %v10933_v6  ;;  %8509 = vmatprep.subr.bf16.mxu1 %v10933_v6 }
 0x7de   : > { %8330 = vmatpush3.bf16.msra.mxu0 %v9100_v8  ;;  %8510 = vmatpush3.bf16.msra.mxu1 %v9100_v8  ;;  %v9143_v8 = vld [vmem:[%s10915_s7 + $0x190] sm:$0xff]  }
 0x7df   : > { %8335 = vmatprep.subr.bf16.mxu0 %v10933_v6  ;;  %8515 = vmatprep.subr.bf16.mxu1 %v10933_v6 }
 0x7e1   : > { %8332 = vmatmul.mubr.bf16.vlgmr.msra.gmra.mrb[0].mxu0 %v4603_v14  ;;  %8512 = vmatmul.mubr.bf16.vlgmr.msra.gmra.mrb[0].mxu1 %v10512_v17  ;;  %v9146_v14 = vld [vmem:[%s10915_s7 + $0x1a8] sm:$0xff]  }
 0x7e2   : > { %8336 = vmatpush3.bf16.msra.mxu0 %v9101_v57  ;;  %8516 = vmatpush3.bf16.msra.mxu1 %v9101_v57  ;;  %v9148_v57 = vld [vmem:[%s10915_s7 + $0x1b8] sm:$0xff]  }
 0x7e3   : > { %8337 = vmatprep.subr.bf16.mxu0 %v10933_v6  ;;  %8517 = vmatprep.subr.bf16.mxu1 %v10933_v6 }
 0x7e4   : > { %8351 = vmatprep.mubr.msk.bf16.mxu0 %vm9209_vm14, %v10933_v6  ;;  %8531 = vmatprep.mubr.msk.bf16.mxu1 %vm9209_vm14, %v10933_v6 }
 0x7e6   : > { %8338 = vmatpush3.bf16.msra.mxu0 %v9102_v25  ;;  %8518 = vmatpush3.bf16.msra.mxu1 %v9102_v25  ;;  %v5800_v25 = vld [vmem:[#allocation4 + $0xc] sm:$0x3] }
 0x7e7   : > { %8339 = vmatprep.subr.bf16.mxu0 %v10933_v6  ;;  %8519 = vmatprep.subr.bf16.mxu1 %v10933_v6 }
 0x7ea   : > { %8340 = vmatpush3.bf16.msra.mxu0 %v9103_v26  ;;  %8520 = vmatpush3.bf16.msra.mxu1 %v9103_v26  ;;  %v5801_v26 = vpack.c.bf16 %v5800_v25, %v5800_v25 }
 0x7eb   : > { %8341 = vmatprep.subr.bf16.mxu0 %v10933_v6  ;;  %8521 = vmatprep.subr.bf16.mxu1 %v10933_v6 }
 0x7ee   : > { %8342 = vmatpush3.bf16.msra.mxu0 %v9104_v32  ;;  %8522 = vmatpush3.bf16.msra.mxu1 %v9104_v32  ;;  %v9149_v32 = vld [vmem:[%s10915_s7 + $0x1c0] sm:$0xff]  }
 0x7ef   : > { %8343 = vmatprep.subr.bf16.mxu0 %v10933_v6  ;;  %8523 = vmatprep.subr.bf16.mxu1 %v10933_v6 }
 0x7f2   : > { %8344 = vmatpush3.bf16.msra.mxu0 %v9105_v2  ;;  %8524 = vmatpush3.bf16.msra.mxu1 %v9105_v2  ;;  %v9150_v2 = vld [vmem:[%s10915_s7 + $0x1c8] sm:$0xff]  }
 0x7f3   : > { %8345 = vmatprep.subr.bf16.mxu0 %v10933_v6  ;;  %8525 = vmatprep.subr.bf16.mxu1 %v10933_v6 }
 0x7f6   : > { %8346 = vmatpush3.bf16.msra.mxu0 %v9106_v61  ;;  %8526 = vmatpush3.bf16.msra.mxu1 %v9106_v61  ;;  %v9151_v61 = vld [vmem:[%s10915_s7 + $0x1d0] sm:$0xff]  }
 0x7f7   : > { %8347 = vmatprep.subr.bf16.mxu0 %v10933_v6  ;;  %8527 = vmatprep.subr.bf16.mxu1 %v10933_v6 }
 0x7fa   : > { %8348 = vmatpush3.bf16.msra.mxu0 %v9107_v51  ;;  %8528 = vmatpush3.bf16.msra.mxu1 %v9107_v51  ;;  %v9152_v51 = vld [vmem:[%s10915_s7 + $0x1d8] sm:$0xff]  }
 0x7fb   : > { %8349 = vmatprep.subr.bf16.mxu0 %v10933_v6  ;;  %8529 = vmatprep.subr.bf16.mxu1 %v10933_v6 }
 0x7fe   : > { %8350 = vmatpush3.bf16.msra.mxu0 %v9108_v34  ;;  %8530 = vmatpush3.bf16.msra.mxu1 %v9108_v34  ;;  %v9153_v34 = vld [vmem:[%s10915_s7 + $0x1e0] sm:$0xff]  }
 0x7ff   : > { %8355 = vmatprep.subr.bf16.mxu0 %v10933_v6  ;;  %8535 = vmatprep.subr.bf16.mxu1 %v10933_v6 }
 0x801   : > { %8352 = vmatmul.mubr.bf16.vlgmr.msra.gmra.mrb[0].mxu0 %v4585_v31  ;;  %8532 = vmatmul.mubr.bf16.vlgmr.msra.gmra.mrb[0].mxu1 %v10562_v60  ;;  %v5843_v31 = vld [vmem:[#allocation4 + $0xd] sm:$0x3] }
 0x802   : > { %8356 = vmatpush3.bf16.msra.mxu0 %v9109_v9  ;;  %8536 = vmatpush3.bf16.msra.mxu1 %v9109_v9  ;;  %v9156_v9 = vld [vmem:[%s10915_s7 + $0x1f8] sm:$0xff]  }
 0x803   : > { %8357 = vmatprep.subr.bf16.mxu0 %v10933_v6  ;;  %8537 = vmatprep.subr.bf16.mxu1 %v10933_v6 }
 0x804   : > { %8371 = vmatprep.mubr.msk.bf16.mxu0 %vm9209_vm14, %v10933_v6  ;;  %8551 = vmatprep.mubr.msk.bf16.mxu1 %vm9209_vm14, %v10933_v6 }
 0x806   : > { %8358 = vmatpush3.bf16.msra.mxu0 %v9110_v1  ;;  %8538 = vmatpush3.bf16.msra.mxu1 %v9110_v1  ;;  %v9157_v1 = vld [vmem:[%s10915_s7 + $0x200] sm:$0xff]  }
 0x807   : > { %8359 = vmatprep.subr.bf16.mxu0 %v10933_v6  ;;  %8539 = vmatprep.subr.bf16.mxu1 %v10933_v6 }
 0x80a   : > { %8360 = vmatpush3.bf16.msra.mxu0 %v9111_v4  ;;  %8540 = vmatpush3.bf16.msra.mxu1 %v9111_v4  ;;  %v9158_v4 = vld [vmem:[%s10915_s7 + $0x208] sm:$0xff]  }
 0x80b   : > { %8361 = vmatprep.subr.bf16.mxu0 %v10933_v6  ;;  %8541 = vmatprep.subr.bf16.mxu1 %v10933_v6 }
 0x80e   : > { %8362 = vmatpush3.bf16.msra.mxu0 %v9112_v49  ;;  %8542 = vmatpush3.bf16.msra.mxu1 %v9112_v49  ;;  %v9159_v49 = vld [vmem:[%s10915_s7 + $0x210] sm:$0xff]  }
 0x80f   : > { %8363 = vmatprep.subr.bf16.mxu0 %v10933_v6  ;;  %8543 = vmatprep.subr.bf16.mxu1 %v10933_v6 }
 0x812   : > { %8364 = vmatpush3.bf16.msra.mxu0 %v9113_v47  ;;  %8544 = vmatpush3.bf16.msra.mxu1 %v9113_v47  ;;  %v9160_v47 = vld [vmem:[%s10915_s7 + $0x218] sm:$0xff]  }
 0x813   : > { %8365 = vmatprep.subr.bf16.mxu0 %v10933_v6  ;;  %8545 = vmatprep.subr.bf16.mxu1 %v10933_v6 }
 0x816   : > { %8366 = vmatpush3.bf16.msra.mxu0 %v9114_v0  ;;  %8546 = vmatpush3.bf16.msra.mxu1 %v9114_v0  ;;  %v9161_v0 = vld [vmem:[%s10915_s7 + $0x220] sm:$0xff]  }
 0x817   : > { %8367 = vmatprep.subr.bf16.mxu0 %v10933_v6  ;;  %8547 = vmatprep.subr.bf16.mxu1 %v10933_v6 }
 0x81a   : > { %8368 = vmatpush3.bf16.msra.mxu0 %v9115_v48  ;;  %8548 = vmatpush3.bf16.msra.mxu1 %v9115_v48  ;;  %v9162_v48 = vld [vmem:[%s10915_s7 + $0x228] sm:$0xff]  }
 0x81b   : > { %8369 = vmatprep.subr.bf16.mxu0 %v10933_v6  ;;  %8549 = vmatprep.subr.bf16.mxu1 %v10933_v6 }
 0x81e   : > { %8370 = vmatpush3.bf16.msra.mxu0 %v9116_v43  ;;  %8550 = vmatpush3.bf16.msra.mxu1 %v9116_v43  ;;  %v9163_v43 = vld [vmem:[%s10915_s7 + $0x230] sm:$0xff]  }
 0x81f   : > { %8375 = vmatprep.subr.bf16.mxu0 %v10933_v6  ;;  %8555 = vmatprep.subr.bf16.mxu1 %v10933_v6 }
 0x821   : > { %8372 = vmatmul.mubr.bf16.vlgmr.msra.gmra.mrb[0].mxu0 %v4798_v15  ;;  %8552 = vmatmul.mubr.bf16.vlgmr.msra.gmra.mrb[0].mxu1 %v10606_v46  ;;  %v5887_v15 = vpack.c.bf16 %v5886_v45, %v5886_v45 }
 0x822   : > { %8376 = vmatpush3.bf16.msra.mxu0 %v9117_v42  ;;  %8556 = vmatpush3.bf16.msra.mxu1 %v9117_v42 }
 0x823   : > { %8377 = vmatprep.subr.bf16.mxu0 %v10933_v6  ;;  %8557 = vmatprep.subr.bf16.mxu1 %v10933_v6 }
 0x824   : > { %8391 = vmatprep.mubr.msk.bf16.mxu0 %vm9209_vm14, %v10933_v6  ;;  %8571 = vmatprep.mubr.msk.bf16.mxu1 %vm9209_vm14, %v10933_v6 }
 0x826   : > { %8378 = vmatpush3.bf16.msra.mxu0 %v9118_v22  ;;  %8558 = vmatpush3.bf16.msra.mxu1 %v9118_v22 }
 0x827   : > { %8379 = vmatprep.subr.bf16.mxu0 %v10933_v6  ;;  %8559 = vmatprep.subr.bf16.mxu1 %v10933_v6 }
 0x82a   : > { %8380 = vmatpush3.bf16.msra.mxu0 %v9119_v23  ;;  %8560 = vmatpush3.bf16.msra.mxu1 %v9119_v23 }
 0x82b   : > { %8381 = vmatprep.subr.bf16.mxu0 %v10933_v6  ;;  %8561 = vmatprep.subr.bf16.mxu1 %v10933_v6 }
 0x82e   : > { %8382 = vmatpush3.bf16.msra.mxu0 %v9120_v58  ;;  %8562 = vmatpush3.bf16.msra.mxu1 %v9120_v58 }
 0x82f   : > { %8383 = vmatprep.subr.bf16.mxu0 %v10933_v6  ;;  %8563 = vmatprep.subr.bf16.mxu1 %v10933_v6 }
 0x832   : > { %8384 = vmatpush3.bf16.msra.mxu0 %v9121_v5  ;;  %8564 = vmatpush3.bf16.msra.mxu1 %v9121_v5 }
 0x833   : > { %8385 = vmatprep.subr.bf16.mxu0 %v10933_v6  ;;  %8565 = vmatprep.subr.bf16.mxu1 %v10933_v6 }
 0x836   : > { %8386 = vmatpush3.bf16.msra.mxu0 %v9122_v24  ;;  %8566 = vmatpush3.bf16.msra.mxu1 %v9122_v24 }
 0x837   : > { %8387 = vmatprep.subr.bf16.mxu0 %v10933_v6  ;;  %8567 = vmatprep.subr.bf16.mxu1 %v10933_v6 }
 0x83a   : > { %8388 = vmatpush3.bf16.msra.mxu0 %v9123_v28  ;;  %8568 = vmatpush3.bf16.msra.mxu1 %v9123_v28 }
 0x83b   : > { %8389 = vmatprep.subr.bf16.mxu0 %v10933_v6  ;;  %8569 = vmatprep.subr.bf16.mxu1 %v10933_v6 }
 0x83e   : > { %8390 = vmatpush3.bf16.msra.mxu0 %v9124_v44  ;;  %8570 = vmatpush3.bf16.msra.mxu1 %v9124_v44 }
 0x83f   : > { %8395 = vmatprep.subr.bf16.mxu0 %v10933_v6  ;;  %8575 = vmatprep.subr.bf16.mxu1 %v10933_v6 }
 0x841   : > { %8392 = vmatmul.mubr.bf16.vlgmr.msra.gmra.mrb[0].mxu0 %v10562_v60  ;;  %8572 = vmatmul.mubr.bf16.vlgmr.msra.gmra.mrb[0].mxu1 %v10653_v29  ;;  %v5844_v60 = vpack.c.bf16 %v5843_v31, %v5843_v31 }
 0x842   : > { %8396 = vmatpush3.bf16.msra.mxu0 %v9125_v19  ;;  %8576 = vmatpush3.bf16.msra.mxu1 %v9125_v19 }
 0x843   : > { %8397 = vmatprep.subr.bf16.mxu0 %v10933_v6  ;;  %8577 = vmatprep.subr.bf16.mxu1 %v10933_v6 }
 0x844   : > { %8411 = vmatprep.mubr.msk.bf16.mxu0 %vm9209_vm14, %v10933_v6  ;;  %8591 = vmatprep.mubr.msk.bf16.mxu1 %vm9209_vm14, %v10933_v6 }
 0x846   : > { %8398 = vmatpush3.bf16.msra.mxu0 %v9126_v55  ;;  %8578 = vmatpush3.bf16.msra.mxu1 %v9126_v55 }
 0x847   : > { %8399 = vmatprep.subr.bf16.mxu0 %v10933_v6  ;;  %8579 = vmatprep.subr.bf16.mxu1 %v10933_v6 }
 0x84a   : > { %8400 = vmatpush3.bf16.msra.mxu0 %v9127_v40  ;;  %8580 = vmatpush3.bf16.msra.mxu1 %v9127_v40 }
 0x84b   : > { %8401 = vmatprep.subr.bf16.mxu0 %v10933_v6  ;;  %8581 = vmatprep.subr.bf16.mxu1 %v10933_v6 }
 0x84e   : > { %8402 = vmatpush3.bf16.msra.mxu0 %v9128_v27  ;;  %8582 = vmatpush3.bf16.msra.mxu1 %v9128_v27 }
 0x84f   : > { %8403 = vmatprep.subr.bf16.mxu0 %v10933_v6  ;;  %8583 = vmatprep.subr.bf16.mxu1 %v10933_v6 }
 0x852   : > { %8404 = vmatpush3.bf16.msra.mxu0 %v9129_v33  ;;  %8584 = vmatpush3.bf16.msra.mxu1 %v9129_v33  ;;  %v10934_v33 = vld [vmem:[#allocation6_spill] sm:$0xff] }
 0x853   : > { %8405 = vmatprep.subr.bf16.mxu0 %v10933_v6  ;;  %8585 = vmatprep.subr.bf16.mxu1 %v10933_v6  ;;  %vm6084_vm1 = vcmp.lt.s32.totalorder %v10934_v33, 66 }
 0x856   : > { %8406 = vmatpush3.bf16.msra.mxu0 %v9130_v41  ;;  %8586 = vmatpush3.bf16.msra.mxu1 %v9130_v41 }
 0x857   : > { %8407 = vmatprep.subr.bf16.mxu0 %v10933_v6  ;;  %8587 = vmatprep.subr.bf16.mxu1 %v10933_v6 }
 0x85a   : > { %8408 = vmatpush3.bf16.msra.mxu0 %v9131_v62  ;;  %8588 = vmatpush3.bf16.msra.mxu1 %v9131_v62 }
 0x85b   : > { %8409 = vmatprep.subr.bf16.mxu0 %v10933_v6  ;;  %8589 = vmatprep.subr.bf16.mxu1 %v10933_v6 }
 0x85e   : > { %8410 = vmatpush3.bf16.msra.mxu0 %v9132_v3  ;;  %8590 = vmatpush3.bf16.msra.mxu1 %v9132_v3 }
 0x85f   : > { %8415 = vmatprep.subr.bf16.mxu0 %v10933_v6  ;;  %8595 = vmatprep.subr.bf16.mxu1 %v10933_v6 }
 0x861   : > { %8412 = vmatmul.mubr.bf16.vlgmr.msra.gmra.mrb[0].mxu0 %v10512_v17  ;;  %8592 = vmatmul.mubr.bf16.vlgmr.msra.gmra.mrb[0].mxu1 %v10701_v39  ;;  %v9147_v17 = vld [vmem:[%s10915_s7 + $0x1b0] sm:$0xff]  }
 0x862   : > { %8416 = vmatpush3.bf16.msra.mxu0 %v9133_v13  ;;  %8596 = vmatpush3.bf16.msra.mxu1 %v9133_v13 }
 0x863   : > { %8417 = vmatprep.subr.bf16.mxu0 %v10933_v6  ;;  %8597 = vmatprep.subr.bf16.mxu1 %v10933_v6 }
 0x864   : > { %8431 = vmatprep.mubr.msk.bf16.mxu0 %vm9209_vm14, %v10933_v6  ;;  %8611 = vmatprep.mubr.msk.bf16.mxu1 %vm9209_vm14, %v10933_v6 }
 0x866   : > { %8418 = vmatpush3.bf16.msra.mxu0 %v9134_v20  ;;  %8598 = vmatpush3.bf16.msra.mxu1 %v9134_v20 }
 0x867   : > { %8419 = vmatprep.subr.bf16.mxu0 %v10933_v6  ;;  %8599 = vmatprep.subr.bf16.mxu1 %v10933_v6 }
 0x86a   : > { %8420 = vmatpush3.bf16.msra.mxu0 %v9135_v21  ;;  %8600 = vmatpush3.bf16.msra.mxu1 %v9135_v21 }
 0x86b   : > { %8421 = vmatprep.subr.bf16.mxu0 %v10933_v6  ;;  %8601 = vmatprep.subr.bf16.mxu1 %v10933_v6 }
 0x86e   : > { %8422 = vmatpush3.bf16.msra.mxu0 %v9136_v54  ;;  %8602 = vmatpush3.bf16.msra.mxu1 %v9136_v54 }
 0x86f   : > { %8423 = vmatprep.subr.bf16.mxu0 %v10933_v6  ;;  %8603 = vmatprep.subr.bf16.mxu1 %v10933_v6 }
 0x872   : > { %8424 = vmatpush3.bf16.msra.mxu0 %v9137_v35  ;;  %8604 = vmatpush3.bf16.msra.mxu1 %v9137_v35 }
 0x873   : > { %8425 = vmatprep.subr.bf16.mxu0 %v10933_v6  ;;  %8605 = vmatprep.subr.bf16.mxu1 %v10933_v6 }
 0x876   : > { %8426 = vmatpush3.bf16.msra.mxu0 %v9138_v30  ;;  %8606 = vmatpush3.bf16.msra.mxu1 %v9138_v30 }
 0x877   : > { %8427 = vmatprep.subr.bf16.mxu0 %v10933_v6  ;;  %8607 = vmatprep.subr.bf16.mxu1 %v10933_v6 }
 0x87a   : > { %8428 = vmatpush3.bf16.msra.mxu0 %v9139_v53  ;;  %8608 = vmatpush3.bf16.msra.mxu1 %v9139_v53 }
 0x87b   : > { %8429 = vmatprep.subr.bf16.mxu0 %v10933_v6  ;;  %8609 = vmatprep.subr.bf16.mxu1 %v10933_v6 }
 0x87e   : > { %8430 = vmatpush3.bf16.msra.mxu0 %v9140_v36  ;;  %8610 = vmatpush3.bf16.msra.mxu1 %v9140_v36 }
 0x87f   : > { %8435 = vmatprep.subr.bf16.mxu0 %v10933_v6  ;;  %8615 = vmatprep.subr.bf16.mxu1 %v10933_v6 }
 0x881   : > { %8432 = vmatmul.mubr.bf16.vlgmr.msra.gmra.mrb[0].mxu0 %v10606_v46  ;;  %8612 = vmatmul.mubr.bf16.vlgmr.msra.gmra.mrb[0].mxu1 %v10749_v18 }
 0x882   : > { %8436 = vmatpush3.bf16.msra.mxu0 %v9141_v37  ;;  %8616 = vmatpush3.bf16.msra.mxu1 %v9141_v37 }
 0x883   : > { %8437 = vmatprep.subr.bf16.mxu0 %v10933_v6  ;;  %8617 = vmatprep.subr.bf16.mxu1 %v10933_v6 }
 0x884   : > { %8451 = vmatprep.mubr.msk.bf16.mxu0 %vm9209_vm14, %v10933_v6  ;;  %8631 = vmatprep.mubr.msk.bf16.mxu1 %vm9209_vm14, %v10933_v6 }
 0x886   : > { %8438 = vmatpush3.bf16.msra.mxu0 %v9142_v12  ;;  %8618 = vmatpush3.bf16.msra.mxu1 %v9142_v12 }
 0x887   : > { %8439 = vmatprep.subr.bf16.mxu0 %v10933_v6  ;;  %8619 = vmatprep.subr.bf16.mxu1 %v10933_v6 }
 0x88a   : > { %8440 = vmatpush3.bf16.msra.mxu0 %v9143_v8  ;;  %8620 = vmatpush3.bf16.msra.mxu1 %v9143_v8 }
 0x88b   : > { %8441 = vmatprep.subr.bf16.mxu0 %v10933_v6  ;;  %8621 = vmatprep.subr.bf16.mxu1 %v10933_v6 }
 0x88e   : > { %8442 = vmatpush3.bf16.msra.mxu0 %v9144_v10  ;;  %8622 = vmatpush3.bf16.msra.mxu1 %v9144_v10 }
 0x88f   : > { %8443 = vmatprep.subr.bf16.mxu0 %v10933_v6  ;;  %8623 = vmatprep.subr.bf16.mxu1 %v10933_v6 }
 0x892   : > { %8444 = vmatpush3.bf16.msra.mxu0 %v9145_v59  ;;  %8624 = vmatpush3.bf16.msra.mxu1 %v9145_v59 }
 0x893   : > { %8445 = vmatprep.subr.bf16.mxu0 %v10933_v6  ;;  %8625 = vmatprep.subr.bf16.mxu1 %v10933_v6 }
 0x896   : > { %8446 = vmatpush3.bf16.msra.mxu0 %v9146_v14  ;;  %8626 = vmatpush3.bf16.msra.mxu1 %v9146_v14 }
 0x897   : > { %8447 = vmatprep.subr.bf16.mxu0 %v10933_v6  ;;  %8627 = vmatprep.subr.bf16.mxu1 %v10933_v6 }
 0x89a   : > { %8448 = vmatpush3.bf16.msra.mxu0 %v9147_v17  ;;  %8628 = vmatpush3.bf16.msra.mxu1 %v9147_v17 }
 0x89b   : > { %8449 = vmatprep.subr.bf16.mxu0 %v10933_v6  ;;  %8629 = vmatprep.subr.bf16.mxu1 %v10933_v6 }
 0x89e   : > { %8450 = vmatpush3.bf16.msra.mxu0 %v9148_v57  ;;  %8630 = vmatpush3.bf16.msra.mxu1 %v9148_v57 }
 0x89f   : > { %8455 = vmatprep.subr.bf16.mxu0 %v10933_v6  ;;  %8635 = vmatprep.subr.bf16.mxu1 %v10933_v6 }
 0x8a1   : > { %8452 = vmatmul.mubr.bf16.vlgmr.msra.gmra.mrb[0].mxu0 %v10653_v29  ;;  %8632 = vmatmul.mubr.bf16.vlgmr.msra.gmra.mrb[0].mxu1 %v5801_v26 }
 0x8a2   : > { %8456 = vmatpush3.bf16.msra.mxu0 %v9149_v32  ;;  %8636 = vmatpush3.bf16.msra.mxu1 %v9149_v32 }
 0x8a3   : > { %8457 = vmatprep.subr.bf16.mxu0 %v10933_v6  ;;  %8637 = vmatprep.subr.bf16.mxu1 %v10933_v6 }
 0x8a4   : > { %8471 = vmatprep.mubr.msk.bf16.mxu0 %vm9209_vm14, %v10933_v6  ;;  %8651 = vmatprep.mubr.msk.bf16.mxu1 %vm9209_vm14, %v10933_v6 }
 0x8a6   : > { %8458 = vmatpush3.bf16.msra.mxu0 %v9150_v2  ;;  %8638 = vmatpush3.bf16.msra.mxu1 %v9150_v2 }
 0x8a7   : > { %8459 = vmatprep.subr.bf16.mxu0 %v10933_v6  ;;  %8639 = vmatprep.subr.bf16.mxu1 %v10933_v6 }
 0x8aa   : > { %8460 = vmatpush3.bf16.msra.mxu0 %v9151_v61  ;;  %8640 = vmatpush3.bf16.msra.mxu1 %v9151_v61 }
 0x8ab   : > { %8461 = vmatprep.subr.bf16.mxu0 %v10933_v6  ;;  %8641 = vmatprep.subr.bf16.mxu1 %v10933_v6 }
 0x8ae   : > { %8462 = vmatpush3.bf16.msra.mxu0 %v9152_v51  ;;  %8642 = vmatpush3.bf16.msra.mxu1 %v9152_v51 }
 0x8af   : > { %8463 = vmatprep.subr.bf16.mxu0 %v10933_v6  ;;  %8643 = vmatprep.subr.bf16.mxu1 %v10933_v6 }
 0x8b2   : > { %8464 = vmatpush3.bf16.msra.mxu0 %v9153_v34  ;;  %8644 = vmatpush3.bf16.msra.mxu1 %v9153_v34 }
 0x8b3   : > { %8465 = vmatprep.subr.bf16.mxu0 %v10933_v6  ;;  %8645 = vmatprep.subr.bf16.mxu1 %v10933_v6 }
 0x8b6   : > { %8466 = vmatpush3.bf16.msra.mxu0 %v9154_v7  ;;  %8646 = vmatpush3.bf16.msra.mxu1 %v9154_v7 }
 0x8b7   : > { %8467 = vmatprep.subr.bf16.mxu0 %v10933_v6  ;;  %8647 = vmatprep.subr.bf16.mxu1 %v10933_v6 }
 0x8ba   : > { %8468 = vmatpush3.bf16.msra.mxu0 %v9155_v52  ;;  %8648 = vmatpush3.bf16.msra.mxu1 %v9155_v52 }
 0x8bb   : > { %8469 = vmatprep.subr.bf16.mxu0 %v10933_v6  ;;  %8649 = vmatprep.subr.bf16.mxu1 %v10933_v6 }
 0x8be   : > { %8470 = vmatpush3.bf16.msra.mxu0 %v9156_v9  ;;  %8650 = vmatpush3.bf16.msra.mxu1 %v9156_v9 }
 0x8bf   : > { %8475 = vmatprep.subr.bf16.mxu0 %v10933_v6  ;;  %8655 = vmatprep.subr.bf16.mxu1 %v10933_v6 }
 0x8c1   : > { %8472 = vmatmul.mubr.bf16.vlgmr.msra.gmra.mrb[0].mxu0 %v10701_v39  ;;  %8652 = vmatmul.mubr.bf16.vlgmr.msra.gmra.mrb[0].mxu1 %v5844_v60 }
 0x8c2   : > { %8476 = vmatpush3.bf16.msra.mxu0 %v9157_v1  ;;  %8656 = vmatpush3.bf16.msra.mxu1 %v9157_v1 }
 0x8c3   : > { %8477 = vmatprep.subr.bf16.mxu0 %v10933_v6  ;;  %8657 = vmatprep.subr.bf16.mxu1 %v10933_v6 }
 0x8c4   : > { %8491 = vmatprep.mubr.msk.bf16.mxu0 %vm9209_vm14, %v10933_v6  ;;  %8671 = vmatprep.mubr.msk.bf16.mxu1 %vm9209_vm14, %v10933_v6 }
 0x8c6   : > { %8478 = vmatpush3.bf16.msra.mxu0 %v9158_v4  ;;  %8658 = vmatpush3.bf16.msra.mxu1 %v9158_v4 }
 0x8c7   : > { %8479 = vmatprep.subr.bf16.mxu0 %v10933_v6  ;;  %8659 = vmatprep.subr.bf16.mxu1 %v10933_v6 }
 0x8ca   : > { %8480 = vmatpush3.bf16.msra.mxu0 %v9159_v49  ;;  %8660 = vmatpush3.bf16.msra.mxu1 %v9159_v49 }
 0x8cb   : > { %8481 = vmatprep.subr.bf16.mxu0 %v10933_v6  ;;  %8661 = vmatprep.subr.bf16.mxu1 %v10933_v6 }
 0x8ce   : > { %8482 = vmatpush3.bf16.msra.mxu0 %v9160_v47  ;;  %8662 = vmatpush3.bf16.msra.mxu1 %v9160_v47 }
 0x8cf   : > { %8483 = vmatprep.subr.bf16.mxu0 %v10933_v6  ;;  %8663 = vmatprep.subr.bf16.mxu1 %v10933_v6 }
 0x8d2   : > { %8484 = vmatpush3.bf16.msra.mxu0 %v9161_v0  ;;  %8664 = vmatpush3.bf16.msra.mxu1 %v9161_v0 }
 0x8d3   : > { %8485 = vmatprep.subr.bf16.mxu0 %v10933_v6  ;;  %8665 = vmatprep.subr.bf16.mxu1 %v10933_v6 }
 0x8d6   : > { %8486 = vmatpush3.bf16.msra.mxu0 %v9162_v48  ;;  %8666 = vmatpush3.bf16.msra.mxu1 %v9162_v48 }
 0x8d7   : > { %8487 = vmatprep.subr.bf16.mxu0 %v10933_v6  ;;  %8667 = vmatprep.subr.bf16.mxu1 %v10933_v6 }
 0x8da   : > { %8488 = vmatpush3.bf16.msra.mxu0 %v9163_v43  ;;  %8668 = vmatpush3.bf16.msra.mxu1 %v9163_v43 }
 0x8db   : > { %8489 = vmatprep.subr.bf16.mxu0 %v10933_v6  ;;  %8669 = vmatprep.subr.bf16.mxu1 %v10933_v6 }
 0x8de   : > { %8490 = vmatpush3.bf16.msra.mxu0 %v9164_v56  ;;  %8670 = vmatpush3.bf16.msra.mxu1 %v9164_v56 }
 0x8df   : > { %8675 = vmatprep.subr.mxu0 %v10933_v6  ;;  %8680 = vmatprep.subr.mxu1 %v10933_v6 }
 0x8e1   : > { %8492 = vmatmul.mubr.bf16.vlgmr.msra.gmra.mrb[0].mxu0 %v10749_v18  ;;  %8672 = vmatmul.mubr.bf16.vlgmr.msra.gmra.mrb[0].mxu1 %v5887_v15 }
 0x8e2   : > { %8677 = vmatprep.mubr.msk.f32.mxu0 %vm9209_vm14, %v10933_v6  ;;  %8682 = vmatprep.mubr.msk.f32.mxu1 %vm9209_vm14, %v10933_v6  ;;  %v4583_v6 = vld [vmem:[%s10916_s8] sm:$0x1] }
 0x9b4   : > { %v5548_v46 = vpop.f32.mrb[0].mxu0  ;;  %v5922_v42 = vpop.f32.mrb[0].mxu1 }
 0x9b5   : > { %v5929_v22 = vmax.f32 %v5548_v46, %v5922_v42  ;;  %v8493_v23 = vpop.f32.mrb[1].mxu0  ;;  %v8673_v58 = vpop.f32.mrb[1].mxu1 }
 0x9b6   : > { %v5551_v5 = vpop.f32.mrb[2].mxu0  ;;  %v5925_v24 = vpop.f32.mrb[2].mxu1 }
 0x9b7   : > { %v8494_v28 = vpop.f32.mrb[3].mxu0  ;;  %v8674_v44 = vpop.f32.mrb[3].mxu1  ;;  %8676 = vmatpush3.msk.msra.mxu0 %vm5934_vm15, %v5929_v22  ;;  %8681 = vmatpush3.msk.msra.mxu1 %vm5934_vm15, %v5929_v22 }
 0x9b8   : > { %8678 = vmatmul.mubr.msk.f32.vlgmr.msra.gmra.mrb[4].mxu0 %vm5930_vm0, %v9289_v11  ;;  %8683 = vmatmul.mubr.msk.f32.vlgmr.msra.gmra.mrb[4].mxu1 %vm5930_vm0, %v9303_v16 }
 0xa8b   : > { %v6004_v50 = vpop.f32.mrb[4].mxu0  ;;  %v6077_v29 = vpop.f32.mrb[4].mxu1 }
 0xa8c   : > { %v6081_v19 = vmax.f32 %v6004_v50, %v6077_v29  ;;  %v8679_v55 = vpop.f32.mrb[5].mxu0  ;;  %v8684_v40 = vpop.f32.mrb[5].mxu1 }
 0xa8e   : > { %v6082_v27 = vadd.f32 %v6081_v19, %v4583_v6 }
 0xa90   : > { %v6083_v41 = vmax.f32 %v6082_v27, 0.0 }
 0xa92   : > { %v6085_v62 = vsel %vm6084_vm1, %v6083_v41, -1e+30 }
 0xa93   : > { %v6087_v3 = vsel %vm6086_vm2, %v6085_v62, -inf }
 0xa94   : > { %6088 = vmax.xlane.f32.xlu0 %v6087_v3 }
 0xb21   : > { %v6089_v11 = vpop.xlane.xlu0 %6088 }
 0xb22   : > { %v6090_v16 = vsub.f32 %v6085_v62, %v6089_v11 }
 0xb24   : > { %v6091_v38 = vmul.f32 1.442695, %v6090_v16 }
 0xb26   : > { %9165 = vpow2.f32 %v6091_v38 }
 0xb30   : > { %v9166_v39 = vpop.eup %9165 }
 0xb31   : > { %v6093_v13 = vsel %vm6086_vm2, %v9166_v39, 0.0 }
 0xb32   : > { %6094 = vadd.xlane.f32.xlu0 %v6093_v13 }
 0xbbf   : > { %v6095_v20 = vpop.xlane.xlu0 %6094 }
 0xbc0   : > { %9167 = vlog2.f32 %v6095_v20 }
 0xbca   : > { %v9168_v21 = vpop.eup %9167 }
 0xbcb   : > { %v6097_v54 = vmul.f32 0.6931472, %v9168_v21 }
 0xbcd   : > { %v6098_v35 = vadd.f32 %v6097_v54, %v6089_v11 }
 0xbcf   : > { %v6099_v30 = vsub.f32 %v6083_v41, %v6098_v35 }
 0xbd1   : > { %6100 = vst [vmem:[%s328_s16] sm:$0x1] %v6099_v30 }
 0xbd2 PF: > { %s19_s30 = sadd.s32 1, %s9187_s30  }
 0xbd3   : > { %p16_p7 = scmp.ge.s32.totalorder %s19_s30, 4  }
 0xbd5   :  { %18 = sbr.rel (!%p16_p7) target bundleno = 1 (0x1), region = 190 }

</bundles_post_ra>
